<compile_context>
chip_gen: v7x
topology: tpu7x:2x2x1
jax: 0.10.0
libtpu: 0.0.40
codegen_flags: <defaults>
</compile_context>

<pallas_src>
import functools

import jax
import jax.numpy as jnp
from jax.experimental import pallas as pl
from jax.experimental.pallas import tpu as pltpu


def _make_aspp_kernel(th, W, R, dil_rates, ck, planes):
    """Fused ASPP forward for one (batch, row-tile, Cin-chunk) grid cell."""
    tm = th * W  # pixels per tile

    def kernel(xpad_ref, w1_ref, w3_ref, wcat_ref, bbr_ref, bout_ref,
               o_ref, acc_ref):
        # xpad_ref : (Hp, Wp, ck)   bf16  padded image, one Cin chunk, batch n
        # w1_ref   : (ck, P)        bf16  1x1 branch weight chunk (BN folded)
        # w3_ref   : (3, 9, ck, P)  bf16  dilated 3x3 tap weight chunks
        # wcat_ref : (4, P, P)      bf16  conv1 weight, one (P,P) block / branch
        # bbr_ref  : (4, P)         f32   per-branch BN bias
        # bout_ref : (1, P)         f32   per-batch bias (bn1 bias + pooled br.)
        # o_ref    : (th*W, P)      bf16  output pixels for this tile
        # acc_ref  : (4, th*W, P)   f32   pre-activation branch accumulators
        t = pl.program_id(1)
        kc = pl.program_id(2)
        nk = pl.num_programs(2)
        r0 = t * th + R  # padded-image row of this tile's first centre pixel

        @pl.when(kc == 0)
        def _():
            acc_ref[...] = jnp.zeros_like(acc_ref)

        def window(dr, dc):
            # shifted (th, W, ck) view of the padded image -> (tm, ck) matrix.
            # TODO(synk): this slice+reshape is a sublane relayout copy for
            # unaligned offsets; revisit when Mosaic supports rank-3 dots.
            blk = xpad_ref[pl.ds(r0 + dr, th), pl.ds(R + dc, W), :]
            return blk.reshape(tm, ck)

        # branch 0: 1x1 conv (rate == 1)
        acc_ref[0] += jnp.dot(window(0, 0), w1_ref[...],
                              preferred_element_type=jnp.float32)

        # branches 1..3: dilated 3x3 conv == 9 shifted matmuls; the local
        # partial sum starts from the first tap's dot (no zero fill).
        for bi, rate in enumerate(dil_rates):
            part = None
            for kh in range(3):
                for kw in range(3):
                    d = jnp.dot(window((kh - 1) * rate, (kw - 1) * rate),
                                w3_ref[bi, kh * 3 + kw],
                                preferred_element_type=jnp.float32)
                    part = d if part is None else part + d
            acc_ref[bi + 1] += part

        @pl.when(kc == nk - 1)
        def _():
            # per-branch BN bias + ReLU, then cat + conv1 fused as 4
            # accumulating (tm,P)x(P,P) matmuls (no concat staging buffer);
            # bn1 scale is folded into wcat, bn1 bias + pooled branch in bout.
            out = bout_ref[...]                       # (1, P) f32, broadcasts
            for bi in range(4):
                ybr = jnp.maximum(acc_ref[bi] + bbr_ref[bi][None, :], 0.0)
                out = out + jnp.dot(ybr.astype(wcat_ref.dtype), wcat_ref[bi],
                                    preferred_element_type=jnp.float32)
            o_ref[...] = jnp.maximum(out, 0.0).astype(o_ref.dtype)

    return kernel


def _pick_vmem_limit():
    """Per-generation scoped-VMEM budget (bytes), leaving headroom."""
    try:
        kind = jax.devices()[0].device_kind.lower()
    except Exception:  # pragma: no cover
        kind = ""
    if "v7" in kind or "7x" in kind:
        return 48 * 1024 * 1024          # v7x: 64 MiB physical per TC
    if any(s in kind for s in ("v3", "v4", "v5", "v6")):
        return 100 * 1024 * 1024         # 128 MiB physical: raise the default
    return 48 * 1024 * 1024              # unknown chip: stay conservative


@functools.partial(jax.jit, static_argnames=("rates", "tile_rows", "cin_chunk"))
def aspp_forward(x_nchw, params, rates, tile_rows=8, cin_chunk=None):
    """Returns NHWC bf16 output (N, H, W, P); transpose outside if NCHW needed."""
    assert rates[0] == 1, "aspp1 is the 1x1 branch (rate == 1)"
    N, Cin, H, W = x_nchw.shape
    P = params["w_aspp1"].shape[0]
    dil_rates = tuple(rates[1:])
    R = max(dil_rates)

    # Row tiling: largest divisor of H <= tile_rows.  In production pick th so
    # tm = th*W lands near a multiple of 256 (v6e/v7x MXU) / 128 (v5e), and use
    # P >= 128 so output stores are lane-dense.
    # TODO(synk): pad H (or pl.BoundedSlice) for heights with no good divisor.
    th = max(1, min(tile_rows, H))
    while H % th:
        th -= 1
    T = H // th
    tm = th * W

    # Cin chunking (K-blocking) so production Cin=2048 fits v7x VMEM; with
    # cin_chunk == Cin this is a single K step and x_pad stays fully resident.
    ck = cin_chunk if cin_chunk is not None else (Cin if Cin <= 512 else 512)
    assert Cin % ck == 0, "Cin must be divisible by cin_chunk"
    KC = Cin // ck

    Hp, Wp = H + 2 * R, W + 2 * R

    # One fused wrapper pass: NCHW->NHWC transpose + bf16 cast + zero halo pad.
    x_nhwc_bf = jnp.transpose(x_nchw, (0, 2, 3, 1)).astype(jnp.bfloat16)
    x_pad = jnp.pad(x_nhwc_bf, ((0, 0), (R, R), (R, R), (0, 0)))
    # Global average pool from the padded bf16 tensor (zero halo contributes
    # nothing to the sum) -- no extra f32 read of the activation.
    pooled = jnp.sum(x_pad, axis=(1, 2), dtype=jnp.float32) / float(H * W)

    eps = 1e-5

    def bn_sb(p):  # (gamma, beta, mean, var) -> (scale, bias)
        g, b, mu, var = p
        s = g / jnp.sqrt(var + eps)
        return s, b - mu * s

    def w1x1(w):   # (P, Cin, 1, 1) -> (Cin, P)
        return jnp.transpose(w[:, :, 0, 0], (1, 0))

    def w3x3(w):   # (P, Cin, 3, 3) -> (9, Cin, P), tap index = kh*3 + kw
        return jnp.transpose(w, (2, 3, 1, 0)).reshape(9, Cin, P)

    s1, b1 = bn_sb(params["bn_a1"])
    s2, b2 = bn_sb(params["bn_a2"])
    s3, b3 = bn_sb(params["bn_a3"])
    s4, b4 = bn_sb(params["bn_a4"])
    sp, bp = bn_sb(params["bn_pool"])
    so, bo = bn_sb(params["bn_out"])

    # fold BN scales into conv weights (per output column); keep biases.
    w1 = (w1x1(params["w_aspp1"]) * s1[None, :]).astype(jnp.bfloat16)
    w3 = jnp.stack([w3x3(params["w_aspp2"]) * s2[None, None, :],
                    w3x3(params["w_aspp3"]) * s3[None, None, :],
                    w3x3(params["w_aspp4"]) * s4[None, None, :]],
                   axis=0).astype(jnp.bfloat16)                 # (3, 9, Cin, P)
    bbr = jnp.stack([b1, b2, b3, b4], axis=0)                   # (4, P) f32

    # conv1 (5P -> P): fold bn1 scale; split the pooled-branch block off.
    wcat_full = jnp.transpose(params["w_conv1"][:, :, 0, 0], (1, 0)) * so[None, :]
    wcat = wcat_full[:4 * P].reshape(4, P, P).astype(jnp.bfloat16)  # (4, P, P)

    # pooled branch: conv1x1 + BN + ReLU on the pooled vector, then its conv1
    # contribution -- all folded into a per-batch output bias.
    y5 = jnp.maximum(pooled @ (w1x1(params["w_pool"]) * sp[None, :]) + bp[None, :],
                     0.0)                                       # (N, P)
    bout = (bo[None, :] + y5 @ wcat_full[4 * P:]).reshape(N, 1, P)  # f32

    kernel = _make_aspp_kernel(th, W, R, dil_rates, ck, P)

    def spec(shape, imap, single_buffer):
        if single_buffer:
            return pl.BlockSpec(shape, imap, pipeline_mode=pl.Buffered(1))
        return pl.BlockSpec(shape, imap)

    resident = (KC == 1)   # single-buffer blocks whose index is ~constant
    in_specs = [
        # padded image chunk: constant across row tiles -> single-buffer when
        # the whole Cin fits (one DMA per batch, half the VMEM footprint).
        spec((None, Hp, Wp, ck), lambda n, t, k: (n, 0, 0, k), resident),
        spec((ck, P), lambda n, t, k: (k, 0), resident),                 # w1
        spec((3, 9, ck, P), lambda n, t, k: (0, 0, k, 0), resident),     # w3
        spec((4, P, P), lambda n, t, k: (0, 0, 0), True),                # wcat
        spec((4, P), lambda n, t, k: (0, 0), True),                      # bbr
        spec((None, 1, P), lambda n, t, k: (n, 0, 0), True),             # bout
    ]
    out_specs = pl.BlockSpec((None, tm, P), lambda n, t, k: (n, t, 0))

    ntaps = 1 + 9 * len(dil_rates)
    flops = int(N * T * (ntaps * 2 * tm * Cin * P + 4 * 2 * tm * P * P))
    bytes_accessed = int(N * Hp * Wp * Cin * 2            # image (bf16)
                         + (ntaps * Cin * P + 4 * P * P) * 2   # folded weights
                         + (4 * P + N * P) * 4                 # biases
                         + N * H * W * P * 2)                  # bf16 output
    cost = pl.CostEstimate(flops=flops, transcendentals=0,
                           bytes_accessed=bytes_accessed)

    out = pl.pallas_call(
        kernel,
        out_shape=jax.ShapeDtypeStruct((N, H * W, P), jnp.bfloat16),
        grid=(N, T, KC),
        in_specs=in_specs,
        out_specs=out_specs,
        scratch_shapes=[pltpu.VMEM((4, tm, P), jnp.float32)],
        compiler_params=pltpu.CompilerParams(
            # batch axis parallel (megacore splits whole images, not row tiles
            # of the same resident image); t and the Cin reduction arbitrary.
            dimension_semantics=("parallel", "arbitrary", "arbitrary"),
            vmem_limit_bytes=_pick_vmem_limit()),
        cost_estimate=cost,
    )(x_pad, w1, w3, wcat, bbr, bout)

    # free metadata reshape; output stays NHWC bf16 (no HBM transpose pass).
    return out.reshape(N, H, W, P)


# ----------------------------- reference (plain JAX, f32) --------------------

def aspp_reference(x, params, rates):
    eps = 1e-5

    def conv(xx, w, rate, pad):
        return jax.lax.conv_general_dilated(
            xx, w, (1, 1), ((pad, pad), (pad, pad)),
            rhs_dilation=(rate, rate),
            dimension_numbers=("NCHW", "OIHW", "NCHW"))

    def bn(xx, p):
        g, b, mu, var = [a.reshape(1, -1, 1, 1) for a in p]
        return (xx - mu) / jnp.sqrt(var + eps) * g + b

    relu = lambda z: jnp.maximum(z, 0.0)
    x1 = relu(bn(conv(x, params["w_aspp1"], 1, 0), params["bn_a1"]))
    x2 = relu(bn(conv(x, params["w_aspp2"], rates[1], rates[1]), params["bn_a2"]))
    x3 = relu(bn(conv(x, params["w_aspp3"], rates[2], rates[2]), params["bn_a3"]))
    x4 = relu(bn(conv(x, params["w_aspp4"], rates[3], rates[3]), params["bn_a4"]))
    xp = jnp.mean(x, axis=(2, 3), keepdims=True)
    x5 = relu(bn(conv(xp, params["w_pool"], 1, 0), params["bn_pool"]))
    x5 = jnp.broadcast_to(x5, (x.shape[0], x5.shape[1]) + x4.shape[2:])  # 1x1->HxW
    cat = jnp.concatenate([x1, x2, x3, x4, x5], axis=1)
    return relu(bn(conv(cat, params["w_conv1"], 1, 0), params["bn_out"]))


# ----------------------------- param init ------------------------------------

def init_params(key, inplanes, planes):
    ks = jax.random.split(key, 6)

    def kaiming(k, shape):  # kaiming_normal_, fan_in, gain=sqrt(2)
        fan_in = shape[1] * shape[2] * shape[3]
        return jax.random.normal(k, shape, jnp.float32) * jnp.sqrt(2.0 / fan_in)

    def bn_state(c):  # (gamma, beta, running_mean, running_var)
        return (jnp.ones((c,), jnp.float32), jnp.zeros((c,), jnp.float32),
                jnp.zeros((c,), jnp.float32), jnp.ones((c,), jnp.float32))

    return {
        "w_aspp1": kaiming(ks[0], (planes, inplanes, 1, 1)),
        "w_aspp2": kaiming(ks[1], (planes, inplanes, 3, 3)),
        "w_aspp3": kaiming(ks[2], (planes, inplanes, 3, 3)),
        "w_aspp4": kaiming(ks[3], (planes, inplanes, 3, 3)),
        "w_pool": kaiming(ks[4], (planes, inplanes, 1, 1)),
        "w_conv1": kaiming(ks[5], (planes, planes * 5, 1, 1)),
        "bn_a1": bn_state(planes), "bn_a2": bn_state(planes),
        "bn_a3": bn_state(planes), "bn_a4": bn_state(planes),
        "bn_pool": bn_state(planes), "bn_out": bn_state(planes),
    }


if __name__ == "__main__":
    key = jax.random.PRNGKey(0)
    k_x, k_p = jax.random.split(key)

    N, Cin, H, W = 2, 4, 16, 16
    planes = 8
    rates = (1, 2, 3, 4)  # rates[0] == 1 -> 1x1 branch, others dilated 3x3

    x = jax.random.normal(k_x, (N, Cin, H, W), jnp.float32)
    params = init_params(k_p, Cin, planes)

    # round x and conv weights to bf16-representable values so the bf16-MXU
    # kernel and the f32 reference consume identical operands.
    rb = lambda a: a.astype(jnp.bfloat16).astype(jnp.float32)
    x = rb(x)
    params = {k: (rb(v) if k.startswith("w_") else v) for k, v in params.items()}

    out_nhwc = jax.block_until_ready(aspp_forward(x, params, rates))
    ref_nchw = jax.block_until_ready(aspp_reference(x, params, rates))
    ref_nhwc = jnp.transpose(ref_nchw, (0, 2, 3, 1))

    assert out_nhwc.shape == (N, H, W, planes), out_nhwc.shape
    assert out_nhwc.dtype == jnp.bfloat16, out_nhwc.dtype
    out_f32 = out_nhwc.astype(jnp.float32)
    max_err = float(jnp.max(jnp.abs(out_f32 - ref_nhwc)))
    assert jnp.allclose(out_f32, ref_nhwc, rtol=5e-2, atol=5e-2), max_err

    print("KERNEL_OK")
</pallas_src>

<mosaic_0001>
module attributes {stable_mosaic.version = 11 : i64} {
  func.func @kernel(%arg0: i32, %arg1: i32, %arg2: i32, %arg3: memref<1x24x24x4xbf16, #tpu.memory_space<vmem>>, %arg4: memref<4x8xbf16, #tpu.memory_space<vmem>>, %arg5: memref<3x9x4x8xbf16, #tpu.memory_space<vmem>>, %arg6: memref<4x8x8xbf16, #tpu.memory_space<vmem>>, %arg7: memref<4x8xf32, #tpu.memory_space<vmem>>, %arg8: memref<1x1x8xf32, #tpu.memory_space<vmem>>, %arg9: memref<1x128x8xbf16, #tpu.memory_space<vmem>>, %arg10: memref<4x128x8xf32, #tpu.memory_space<vmem>>) attributes {dimension_semantics = [#tpu.dimension_semantics<parallel>, #tpu.dimension_semantics<arbitrary>, #tpu.dimension_semantics<arbitrary>], iteration_bounds = array<i64: 2, 2, 1>, scalar_prefetch = 0 : i64, scratch_operands = 1 : i64, tpu.core_type = #tpu.core_type<tc>, window_params = [{pipeline_mode = #tpu.pipeline_mode<synchronous>, transform_indices = @transform_0, window_bounds = array<i64: 1, 24, 24, 4>}, {pipeline_mode = #tpu.pipeline_mode<synchronous>, transform_indices = @transform_1, window_bounds = array<i64: 4, 8>}, {pipeline_mode = #tpu.pipeline_mode<synchronous>, transform_indices = @transform_2, window_bounds = array<i64: 3, 9, 4, 8>}, {pipeline_mode = #tpu.pipeline_mode<synchronous>, transform_indices = @transform_3, window_bounds = array<i64: 4, 8, 8>}, {pipeline_mode = #tpu.pipeline_mode<synchronous>, transform_indices = @transform_4, window_bounds = array<i64: 4, 8>}, {pipeline_mode = #tpu.pipeline_mode<synchronous>, transform_indices = @transform_5, window_bounds = array<i64: 1, 1, 8>}, {transform_indices = @transform_6, window_bounds = array<i64: 1, 128, 8>}]} {
    %c8_i32 = arith.constant 8 : i32
    %0 = arith.muli %arg1, %c8_i32 : i32
    %c4_i32 = arith.constant 4 : i32
    %1 = arith.addi %0, %c4_i32 : i32
    %c0_i32 = arith.constant 0 : i32
    %2 = arith.cmpi eq, %arg2, %c0_i32 : i32
    %3 = arith.extui %2 : i1 to i32
    %c0_i32_0 = arith.constant 0 : i32
    %4 = arith.cmpi ne, %3, %c0_i32_0 : i32
    scf.if %4 {
      %cst_262 = arith.constant 0.000000e+00 : f32
      %279 = vector.broadcast %cst_262 : f32 to vector<4x128x8xf32>
      %c0_263 = arith.constant 0 : index
      %c0_264 = arith.constant 0 : index
      %c0_265 = arith.constant 0 : index
      %280 = vector.load %arg10[%c0_263, %c0_264, %c0_265] : memref<4x128x8xf32, #tpu.memory_space<vmem>>, vector<4x128x8xf32>
      tpu.vector_store %arg10[%c0_263, %c0_264, %c0_265], %279 {strides = array<i32>} : memref<4x128x8xf32, #tpu.memory_space<vmem>>, vector<4x128x8xf32>,
    } else {
    }
    %c0 = arith.constant 0 : index
    %c0_1 = arith.constant 0 : index
    %c0_2 = arith.constant 0 : index
    %5 = vector.load %arg10[%c0, %c0_1, %c0_2] : memref<4x128x8xf32, #tpu.memory_space<vmem>>, vector<1x128x8xf32>
    %6 = vector.shape_cast %5 : vector<1x128x8xf32> to vector<128x8xf32>
    %c0_i32_3 = arith.constant 0 : i32
    %7 = arith.addi %1, %c0_i32_3 : i32
    %c0_4 = arith.constant 0 : index
    %8 = arith.index_cast %7 : i32 to index
    %c4 = arith.constant 4 : index
    %c0_5 = arith.constant 0 : index
    %9 = vector.load %arg3[%c0_4, %8, %c4, %c0_5] : memref<1x24x24x4xbf16, #tpu.memory_space<vmem>>, vector<1x8x16x4xbf16>
    %10 = vector.shape_cast %9 : vector<1x8x16x4xbf16> to vector<8x16x4xbf16>
    %11 = vector.shape_cast %10 : vector<8x16x4xbf16> to vector<128x4xbf16>
    %c0_6 = arith.constant 0 : index
    %c0_7 = arith.constant 0 : index
    %12 = vector.load %arg4[%c0_6, %c0_7] : memref<4x8xbf16, #tpu.memory_space<vmem>>, vector<4x8xbf16>
    %cst = arith.constant dense<0.000000e+00> : vector<128x8xf32>
    %13 = tpu.matmul %11, %12, %cst {dimension_numbers = #tpu.dot_dimension_numbers<[1], [0], [0], [1], [0, 0, 1, 1], [], []>} : vector<128x4xbf16>, vector<4x8xbf16>, vector<128x8xf32> -> vector<128x8xf32>
    %14 = arith.addf %6, %13 : vector<128x8xf32>
    %c0_8 = arith.constant 0 : index
    %c0_9 = arith.constant 0 : index
    %c0_10 = arith.constant 0 : index
    %15 = vector.load %arg10[%c0_8, %c0_9, %c0_10] : memref<4x128x8xf32, #tpu.memory_space<vmem>>, vector<1x128x8xf32>
    %16 = vector.shape_cast %15 : vector<1x128x8xf32> to vector<128x8xf32>
    %17 = vector.shape_cast %14 : vector<128x8xf32> to vector<1x128x8xf32>
    tpu.vector_store %arg10[%c0_8, %c0_9, %c0_10], %17 {strides = array<i32>} : memref<4x128x8xf32, #tpu.memory_space<vmem>>, vector<1x128x8xf32>,
    %c-2_i32 = arith.constant -2 : i32
    %18 = arith.addi %1, %c-2_i32 : i32
    %c0_11 = arith.constant 0 : index
    %19 = arith.index_cast %18 : i32 to index
    %c2 = arith.constant 2 : index
    %c0_12 = arith.constant 0 : index
    %20 = vector.load %arg3[%c0_11, %19, %c2, %c0_12] : memref<1x24x24x4xbf16, #tpu.memory_space<vmem>>, vector<1x8x16x4xbf16>
    %21 = vector.shape_cast %20 : vector<1x8x16x4xbf16> to vector<8x16x4xbf16>
    %22 = vector.shape_cast %21 : vector<8x16x4xbf16> to vector<128x4xbf16>
    %c0_13 = arith.constant 0 : index
    %c0_14 = arith.constant 0 : index
    %c0_15 = arith.constant 0 : index
    %c0_16 = arith.constant 0 : index
    %23 = vector.load %arg5[%c0_13, %c0_14, %c0_15, %c0_16] : memref<3x9x4x8xbf16, #tpu.memory_space<vmem>>, vector<1x1x4x8xbf16>
    %24 = vector.shape_cast %23 : vector<1x1x4x8xbf16> to vector<4x8xbf16>
    %cst_17 = arith.constant dense<0.000000e+00> : vector<128x8xf32>
    %25 = tpu.matmul %22, %24, %cst_17 {dimension_numbers = #tpu.dot_dimension_numbers<[1], [0], [0], [1], [0, 0, 1, 1], [], []>} : vector<128x4xbf16>, vector<4x8xbf16>, vector<128x8xf32> -> vector<128x8xf32>
    %c-2_i32_18 = arith.constant -2 : i32
    %26 = arith.addi %1, %c-2_i32_18 : i32
    %c0_19 = arith.constant 0 : index
    %27 = arith.index_cast %26 : i32 to index
    %c4_20 = arith.constant 4 : index
    %c0_21 = arith.constant 0 : index
    %28 = vector.load %arg3[%c0_19, %27, %c4_20, %c0_21] : memref<1x24x24x4xbf16, #tpu.memory_space<vmem>>, vector<1x8x16x4xbf16>
    %29 = vector.shape_cast %28 : vector<1x8x16x4xbf16> to vector<8x16x4xbf16>
    %30 = vector.shape_cast %29 : vector<8x16x4xbf16> to vector<128x4xbf16>
    %c0_22 = arith.constant 0 : index
    %c1 = arith.constant 1 : index
    %c0_23 = arith.constant 0 : index
    %c0_24 = arith.constant 0 : index
    %31 = vector.load %arg5[%c0_22, %c1, %c0_23, %c0_24] : memref<3x9x4x8xbf16, #tpu.memory_space<vmem>>, vector<1x1x4x8xbf16>
    %32 = vector.shape_cast %31 : vector<1x1x4x8xbf16> to vector<4x8xbf16>
    %cst_25 = arith.constant dense<0.000000e+00> : vector<128x8xf32>
    %33 = tpu.matmul %30, %32, %cst_25 {dimension_numbers = #tpu.dot_dimension_numbers<[1], [0], [0], [1], [0, 0, 1, 1], [], []>} : vector<128x4xbf16>, vector<4x8xbf16>, vector<128x8xf32> -> vector<128x8xf32>
    %34 = arith.addf %25, %33 : vector<128x8xf32>
    %c-2_i32_26 = arith.constant -2 : i32
    %35 = arith.addi %1, %c-2_i32_26 : i32
    %c0_27 = arith.constant 0 : index
    %36 = arith.index_cast %35 : i32 to index
    %c6 = arith.constant 6 : index
    %c0_28 = arith.constant 0 : index
    %37 = vector.load %arg3[%c0_27, %36, %c6, %c0_28] : memref<1x24x24x4xbf16, #tpu.memory_space<vmem>>, vector<1x8x16x4xbf16>
    %38 = vector.shape_cast %37 : vector<1x8x16x4xbf16> to vector<8x16x4xbf16>
    %39 = vector.shape_cast %38 : vector<8x16x4xbf16> to vector<128x4xbf16>
    %c0_29 = arith.constant 0 : index
    %c2_30 = arith.constant 2 : index
    %c0_31 = arith.constant 0 : index
    %c0_32 = arith.constant 0 : index
    %40 = vector.load %arg5[%c0_29, %c2_30, %c0_31, %c0_32] : memref<3x9x4x8xbf16, #tpu.memory_space<vmem>>, vector<1x1x4x8xbf16>
    %41 = vector.shape_cast %40 : vector<1x1x4x8xbf16> to vector<4x8xbf16>
    %cst_33 = arith.constant dense<0.000000e+00> : vector<128x8xf32>
    %42 = tpu.matmul %39, %41, %cst_33 {dimension_numbers = #tpu.dot_dimension_numbers<[1], [0], [0], [1], [0, 0, 1, 1], [], []>} : vector<128x4xbf16>, vector<4x8xbf16>, vector<128x8xf32> -> vector<128x8xf32>
    %43 = arith.addf %34, %42 : vector<128x8xf32>
    %c0_i32_34 = arith.constant 0 : i32
    %44 = arith.addi %1, %c0_i32_34 : i32
    %c0_35 = arith.constant 0 : index
    %45 = arith.index_cast %44 : i32 to index
    %c2_36 = arith.constant 2 : index
    %c0_37 = arith.constant 0 : index
    %46 = vector.load %arg3[%c0_35, %45, %c2_36, %c0_37] : memref<1x24x24x4xbf16, #tpu.memory_space<vmem>>, vector<1x8x16x4xbf16>
    %47 = vector.shape_cast %46 : vector<1x8x16x4xbf16> to vector<8x16x4xbf16>
    %48 = vector.shape_cast %47 : vector<8x16x4xbf16> to vector<128x4xbf16>
    %c0_38 = arith.constant 0 : index
    %c3 = arith.constant 3 : index
    %c0_39 = arith.constant 0 : index
    %c0_40 = arith.constant 0 : index
    %49 = vector.load %arg5[%c0_38, %c3, %c0_39, %c0_40] : memref<3x9x4x8xbf16, #tpu.memory_space<vmem>>, vector<1x1x4x8xbf16>
    %50 = vector.shape_cast %49 : vector<1x1x4x8xbf16> to vector<4x8xbf16>
    %cst_41 = arith.constant dense<0.000000e+00> : vector<128x8xf32>
    %51 = tpu.matmul %48, %50, %cst_41 {dimension_numbers = #tpu.dot_dimension_numbers<[1], [0], [0], [1], [0, 0, 1, 1], [], []>} : vector<128x4xbf16>, vector<4x8xbf16>, vector<128x8xf32> -> vector<128x8xf32>
    %52 = arith.addf %43, %51 : vector<128x8xf32>
    %c0_i32_42 = arith.constant 0 : i32
    %53 = arith.addi %1, %c0_i32_42 : i32
    %c0_43 = arith.constant 0 : index
    %54 = arith.index_cast %53 : i32 to index
    %c4_44 = arith.constant 4 : index
    %c0_45 = arith.constant 0 : index
    %55 = vector.load %arg3[%c0_43, %54, %c4_44, %c0_45] : memref<1x24x24x4xbf16, #tpu.memory_space<vmem>>, vector<1x8x16x4xbf16>
    %56 = vector.shape_cast %55 : vector<1x8x16x4xbf16> to vector<8x16x4xbf16>
    %57 = vector.shape_cast %56 : vector<8x16x4xbf16> to vector<128x4xbf16>
    %c0_46 = arith.constant 0 : index
    %c4_47 = arith.constant 4 : index
    %c0_48 = arith.constant 0 : index
    %c0_49 = arith.constant 0 : index
    %58 = vector.load %arg5[%c0_46, %c4_47, %c0_48, %c0_49] : memref<3x9x4x8xbf16, #tpu.memory_space<vmem>>, vector<1x1x4x8xbf16>
    %59 = vector.shape_cast %58 : vector<1x1x4x8xbf16> to vector<4x8xbf16>
    %cst_50 = arith.constant dense<0.000000e+00> : vector<128x8xf32>
    %60 = tpu.matmul %57, %59, %cst_50 {dimension_numbers = #tpu.dot_dimension_numbers<[1], [0], [0], [1], [0, 0, 1, 1], [], []>} : vector<128x4xbf16>, vector<4x8xbf16>, vector<128x8xf32> -> vector<128x8xf32>
    %61 = arith.addf %52, %60 : vector<128x8xf32>
    %c0_i32_51 = arith.constant 0 : i32
    %62 = arith.addi %1, %c0_i32_51 : i32
    %c0_52 = arith.constant 0 : index
    %63 = arith.index_cast %62 : i32 to index
    %c6_53 = arith.constant 6 : index
    %c0_54 = arith.constant 0 : index
    %64 = vector.load %arg3[%c0_52, %63, %c6_53, %c0_54] : memref<1x24x24x4xbf16, #tpu.memory_space<vmem>>, vector<1x8x16x4xbf16>
    %65 = vector.shape_cast %64 : vector<1x8x16x4xbf16> to vector<8x16x4xbf16>
    %66 = vector.shape_cast %65 : vector<8x16x4xbf16> to vector<128x4xbf16>
    %c0_55 = arith.constant 0 : index
    %c5 = arith.constant 5 : index
    %c0_56 = arith.constant 0 : index
    %c0_57 = arith.constant 0 : index
    %67 = vector.load %arg5[%c0_55, %c5, %c0_56, %c0_57] : memref<3x9x4x8xbf16, #tpu.memory_space<vmem>>, vector<1x1x4x8xbf16>
    %68 = vector.shape_cast %67 : vector<1x1x4x8xbf16> to vector<4x8xbf16>
    %cst_58 = arith.constant dense<0.000000e+00> : vector<128x8xf32>
    %69 = tpu.matmul %66, %68, %cst_58 {dimension_numbers = #tpu.dot_dimension_numbers<[1], [0], [0], [1], [0, 0, 1, 1], [], []>} : vector<128x4xbf16>, vector<4x8xbf16>, vector<128x8xf32> -> vector<128x8xf32>
    %70 = arith.addf %61, %69 : vector<128x8xf32>
    %c2_i32 = arith.constant 2 : i32
    %71 = arith.addi %1, %c2_i32 : i32
    %c0_59 = arith.constant 0 : index
    %72 = arith.index_cast %71 : i32 to index
    %c2_60 = arith.constant 2 : index
    %c0_61 = arith.constant 0 : index
    %73 = vector.load %arg3[%c0_59, %72, %c2_60, %c0_61] : memref<1x24x24x4xbf16, #tpu.memory_space<vmem>>, vector<1x8x16x4xbf16>
    %74 = vector.shape_cast %73 : vector<1x8x16x4xbf16> to vector<8x16x4xbf16>
    %75 = vector.shape_cast %74 : vector<8x16x4xbf16> to vector<128x4xbf16>
    %c0_62 = arith.constant 0 : index
    %c6_63 = arith.constant 6 : index
    %c0_64 = arith.constant 0 : index
    %c0_65 = arith.constant 0 : index
    %76 = vector.load %arg5[%c0_62, %c6_63, %c0_64, %c0_65] : memref<3x9x4x8xbf16, #tpu.memory_space<vmem>>, vector<1x1x4x8xbf16>
    %77 = vector.shape_cast %76 : vector<1x1x4x8xbf16> to vector<4x8xbf16>
    %cst_66 = arith.constant dense<0.000000e+00> : vector<128x8xf32>
    %78 = tpu.matmul %75, %77, %cst_66 {dimension_numbers = #tpu.dot_dimension_numbers<[1], [0], [0], [1], [0, 0, 1, 1], [], []>} : vector<128x4xbf16>, vector<4x8xbf16>, vector<128x8xf32> -> vector<128x8xf32>
    %79 = arith.addf %70, %78 : vector<128x8xf32>
    %c2_i32_67 = arith.constant 2 : i32
    %80 = arith.addi %1, %c2_i32_67 : i32
    %c0_68 = arith.constant 0 : index
    %81 = arith.index_cast %80 : i32 to index
    %c4_69 = arith.constant 4 : index
    %c0_70 = arith.constant 0 : index
    %82 = vector.load %arg3[%c0_68, %81, %c4_69, %c0_70] : memref<1x24x24x4xbf16, #tpu.memory_space<vmem>>, vector<1x8x16x4xbf16>
    %83 = vector.shape_cast %82 : vector<1x8x16x4xbf16> to vector<8x16x4xbf16>
    %84 = vector.shape_cast %83 : vector<8x16x4xbf16> to vector<128x4xbf16>
    %c0_71 = arith.constant 0 : index
    %c7 = arith.constant 7 : index
    %c0_72 = arith.constant 0 : index
    %c0_73 = arith.constant 0 : index
    %85 = vector.load %arg5[%c0_71, %c7, %c0_72, %c0_73] : memref<3x9x4x8xbf16, #tpu.memory_space<vmem>>, vector<1x1x4x8xbf16>
    %86 = vector.shape_cast %85 : vector<1x1x4x8xbf16> to vector<4x8xbf16>
    %cst_74 = arith.constant dense<0.000000e+00> : vector<128x8xf32>
    %87 = tpu.matmul %84, %86, %cst_74 {dimension_numbers = #tpu.dot_dimension_numbers<[1], [0], [0], [1], [0, 0, 1, 1], [], []>} : vector<128x4xbf16>, vector<4x8xbf16>, vector<128x8xf32> -> vector<128x8xf32>
    %88 = arith.addf %79, %87 : vector<128x8xf32>
    %c2_i32_75 = arith.constant 2 : i32
    %89 = arith.addi %1, %c2_i32_75 : i32
    %c0_76 = arith.constant 0 : index
    %90 = arith.index_cast %89 : i32 to index
    %c6_77 = arith.constant 6 : index
    %c0_78 = arith.constant 0 : index
    %91 = vector.load %arg3[%c0_76, %90, %c6_77, %c0_78] : memref<1x24x24x4xbf16, #tpu.memory_space<vmem>>, vector<1x8x16x4xbf16>
    %92 = vector.shape_cast %91 : vector<1x8x16x4xbf16> to vector<8x16x4xbf16>
    %93 = vector.shape_cast %92 : vector<8x16x4xbf16> to vector<128x4xbf16>
    %c0_79 = arith.constant 0 : index
    %c8 = arith.constant 8 : index
    %c0_80 = arith.constant 0 : index
    %c0_81 = arith.constant 0 : index
    %94 = vector.load %arg5[%c0_79, %c8, %c0_80, %c0_81] : memref<3x9x4x8xbf16, #tpu.memory_space<vmem>>, vector<1x1x4x8xbf16>
    %95 = vector.shape_cast %94 : vector<1x1x4x8xbf16> to vector<4x8xbf16>
    %cst_82 = arith.constant dense<0.000000e+00> : vector<128x8xf32>
    %96 = tpu.matmul %93, %95, %cst_82 {dimension_numbers = #tpu.dot_dimension_numbers<[1], [0], [0], [1], [0, 0, 1, 1], [], []>} : vector<128x4xbf16>, vector<4x8xbf16>, vector<128x8xf32> -> vector<128x8xf32>
    %97 = arith.addf %88, %96 : vector<128x8xf32>
    %c1_83 = arith.constant 1 : index
    %c0_84 = arith.constant 0 : index
    %c0_85 = arith.constant 0 : index
    %98 = vector.load %arg10[%c1_83, %c0_84, %c0_85] : memref<4x128x8xf32, #tpu.memory_space<vmem>>, vector<1x128x8xf32>
    %99 = vector.shape_cast %98 : vector<1x128x8xf32> to vector<128x8xf32>
    %100 = arith.addf %99, %97 : vector<128x8xf32>
    %c1_86 = arith.constant 1 : index
    %c0_87 = arith.constant 0 : index
    %c0_88 = arith.constant 0 : index
    %101 = vector.load %arg10[%c1_86, %c0_87, %c0_88] : memref<4x128x8xf32, #tpu.memory_space<vmem>>, vector<1x128x8xf32>
    %102 = vector.shape_cast %101 : vector<1x128x8xf32> to vector<128x8xf32>
    %103 = vector.shape_cast %100 : vector<128x8xf32> to vector<1x128x8xf32>
    tpu.vector_store %arg10[%c1_86, %c0_87, %c0_88], %103 {strides = array<i32>} : memref<4x128x8xf32, #tpu.memory_space<vmem>>, vector<1x128x8xf32>,
    %c-3_i32 = arith.constant -3 : i32
    %104 = arith.addi %1, %c-3_i32 : i32
    %c0_89 = arith.constant 0 : index
    %105 = arith.index_cast %104 : i32 to index
    %c1_90 = arith.constant 1 : index
    %c0_91 = arith.constant 0 : index
    %106 = vector.load %arg3[%c0_89, %105, %c1_90, %c0_91] : memref<1x24x24x4xbf16, #tpu.memory_space<vmem>>, vector<1x8x16x4xbf16>
    %107 = vector.shape_cast %106 : vector<1x8x16x4xbf16> to vector<8x16x4xbf16>
    %108 = vector.shape_cast %107 : vector<8x16x4xbf16> to vector<128x4xbf16>
    %c1_92 = arith.constant 1 : index
    %c0_93 = arith.constant 0 : index
    %c0_94 = arith.constant 0 : index
    %c0_95 = arith.constant 0 : index
    %109 = vector.load %arg5[%c1_92, %c0_93, %c0_94, %c0_95] : memref<3x9x4x8xbf16, #tpu.memory_space<vmem>>, vector<1x1x4x8xbf16>
    %110 = vector.shape_cast %109 : vector<1x1x4x8xbf16> to vector<4x8xbf16>
    %cst_96 = arith.constant dense<0.000000e+00> : vector<128x8xf32>
    %111 = tpu.matmul %108, %110, %cst_96 {dimension_numbers = #tpu.dot_dimension_numbers<[1], [0], [0], [1], [0, 0, 1, 1], [], []>} : vector<128x4xbf16>, vector<4x8xbf16>, vector<128x8xf32> -> vector<128x8xf32>
    %c-3_i32_97 = arith.constant -3 : i32
    %112 = arith.addi %1, %c-3_i32_97 : i32
    %c0_98 = arith.constant 0 : index
    %113 = arith.index_cast %112 : i32 to index
    %c4_99 = arith.constant 4 : index
    %c0_100 = arith.constant 0 : index
    %114 = vector.load %arg3[%c0_98, %113, %c4_99, %c0_100] : memref<1x24x24x4xbf16, #tpu.memory_space<vmem>>, vector<1x8x16x4xbf16>
    %115 = vector.shape_cast %114 : vector<1x8x16x4xbf16> to vector<8x16x4xbf16>
    %116 = vector.shape_cast %115 : vector<8x16x4xbf16> to vector<128x4xbf16>
    %c1_101 = arith.constant 1 : index
    %c1_102 = arith.constant 1 : index
    %c0_103 = arith.constant 0 : index
    %c0_104 = arith.constant 0 : index
    %117 = vector.load %arg5[%c1_101, %c1_102, %c0_103, %c0_104] : memref<3x9x4x8xbf16, #tpu.memory_space<vmem>>, vector<1x1x4x8xbf16>
    %118 = vector.shape_cast %117 : vector<1x1x4x8xbf16> to vector<4x8xbf16>
    %cst_105 = arith.constant dense<0.000000e+00> : vector<128x8xf32>
    %119 = tpu.matmul %116, %118, %cst_105 {dimension_numbers = #tpu.dot_dimension_numbers<[1], [0], [0], [1], [0, 0, 1, 1], [], []>} : vector<128x4xbf16>, vector<4x8xbf16>, vector<128x8xf32> -> vector<128x8xf32>
    %120 = arith.addf %111, %119 : vector<128x8xf32>
    %c-3_i32_106 = arith.constant -3 : i32
    %121 = arith.addi %1, %c-3_i32_106 : i32
    %c0_107 = arith.constant 0 : index
    %122 = arith.index_cast %121 : i32 to index
    %c7_108 = arith.constant 7 : index
    %c0_109 = arith.constant 0 : index
    %123 = vector.load %arg3[%c0_107, %122, %c7_108, %c0_109] : memref<1x24x24x4xbf16, #tpu.memory_space<vmem>>, vector<1x8x16x4xbf16>
    %124 = vector.shape_cast %123 : vector<1x8x16x4xbf16> to vector<8x16x4xbf16>
    %125 = vector.shape_cast %124 : vector<8x16x4xbf16> to vector<128x4xbf16>
    %c1_110 = arith.constant 1 : index
    %c2_111 = arith.constant 2 : index
    %c0_112 = arith.constant 0 : index
    %c0_113 = arith.constant 0 : index
    %126 = vector.load %arg5[%c1_110, %c2_111, %c0_112, %c0_113] : memref<3x9x4x8xbf16, #tpu.memory_space<vmem>>, vector<1x1x4x8xbf16>
    %127 = vector.shape_cast %126 : vector<1x1x4x8xbf16> to vector<4x8xbf16>
    %cst_114 = arith.constant dense<0.000000e+00> : vector<128x8xf32>
    %128 = tpu.matmul %125, %127, %cst_114 {dimension_numbers = #tpu.dot_dimension_numbers<[1], [0], [0], [1], [0, 0, 1, 1], [], []>} : vector<128x4xbf16>, vector<4x8xbf16>, vector<128x8xf32> -> vector<128x8xf32>
    %129 = arith.addf %120, %128 : vector<128x8xf32>
    %c0_i32_115 = arith.constant 0 : i32
    %130 = arith.addi %1, %c0_i32_115 : i32
    %c0_116 = arith.constant 0 : index
    %131 = arith.index_cast %130 : i32 to index
    %c1_117 = arith.constant 1 : index
    %c0_118 = arith.constant 0 : index
    %132 = vector.load %arg3[%c0_116, %131, %c1_117, %c0_118] : memref<1x24x24x4xbf16, #tpu.memory_space<vmem>>, vector<1x8x16x4xbf16>
    %133 = vector.shape_cast %132 : vector<1x8x16x4xbf16> to vector<8x16x4xbf16>
    %134 = vector.shape_cast %133 : vector<8x16x4xbf16> to vector<128x4xbf16>
    %c1_119 = arith.constant 1 : index
    %c3_120 = arith.constant 3 : index
    %c0_121 = arith.constant 0 : index
    %c0_122 = arith.constant 0 : index
    %135 = vector.load %arg5[%c1_119, %c3_120, %c0_121, %c0_122] : memref<3x9x4x8xbf16, #tpu.memory_space<vmem>>, vector<1x1x4x8xbf16>
    %136 = vector.shape_cast %135 : vector<1x1x4x8xbf16> to vector<4x8xbf16>
    %cst_123 = arith.constant dense<0.000000e+00> : vector<128x8xf32>
    %137 = tpu.matmul %134, %136, %cst_123 {dimension_numbers = #tpu.dot_dimension_numbers<[1], [0], [0], [1], [0, 0, 1, 1], [], []>} : vector<128x4xbf16>, vector<4x8xbf16>, vector<128x8xf32> -> vector<128x8xf32>
    %138 = arith.addf %129, %137 : vector<128x8xf32>
    %c0_i32_124 = arith.constant 0 : i32
    %139 = arith.addi %1, %c0_i32_124 : i32
    %c0_125 = arith.constant 0 : index
    %140 = arith.index_cast %139 : i32 to index
    %c4_126 = arith.constant 4 : index
    %c0_127 = arith.constant 0 : index
    %141 = vector.load %arg3[%c0_125, %140, %c4_126, %c0_127] : memref<1x24x24x4xbf16, #tpu.memory_space<vmem>>, vector<1x8x16x4xbf16>
    %142 = vector.shape_cast %141 : vector<1x8x16x4xbf16> to vector<8x16x4xbf16>
    %143 = vector.shape_cast %142 : vector<8x16x4xbf16> to vector<128x4xbf16>
    %c1_128 = arith.constant 1 : index
    %c4_129 = arith.constant 4 : index
    %c0_130 = arith.constant 0 : index
    %c0_131 = arith.constant 0 : index
    %144 = vector.load %arg5[%c1_128, %c4_129, %c0_130, %c0_131] : memref<3x9x4x8xbf16, #tpu.memory_space<vmem>>, vector<1x1x4x8xbf16>
    %145 = vector.shape_cast %144 : vector<1x1x4x8xbf16> to vector<4x8xbf16>
    %cst_132 = arith.constant dense<0.000000e+00> : vector<128x8xf32>
    %146 = tpu.matmul %143, %145, %cst_132 {dimension_numbers = #tpu.dot_dimension_numbers<[1], [0], [0], [1], [0, 0, 1, 1], [], []>} : vector<128x4xbf16>, vector<4x8xbf16>, vector<128x8xf32> -> vector<128x8xf32>
    %147 = arith.addf %138, %146 : vector<128x8xf32>
    %c0_i32_133 = arith.constant 0 : i32
    %148 = arith.addi %1, %c0_i32_133 : i32
    %c0_134 = arith.constant 0 : index
    %149 = arith.index_cast %148 : i32 to index
    %c7_135 = arith.constant 7 : index
    %c0_136 = arith.constant 0 : index
    %150 = vector.load %arg3[%c0_134, %149, %c7_135, %c0_136] : memref<1x24x24x4xbf16, #tpu.memory_space<vmem>>, vector<1x8x16x4xbf16>
    %151 = vector.shape_cast %150 : vector<1x8x16x4xbf16> to vector<8x16x4xbf16>
    %152 = vector.shape_cast %151 : vector<8x16x4xbf16> to vector<128x4xbf16>
    %c1_137 = arith.constant 1 : index
    %c5_138 = arith.constant 5 : index
    %c0_139 = arith.constant 0 : index
    %c0_140 = arith.constant 0 : index
    %153 = vector.load %arg5[%c1_137, %c5_138, %c0_139, %c0_140] : memref<3x9x4x8xbf16, #tpu.memory_space<vmem>>, vector<1x1x4x8xbf16>
    %154 = vector.shape_cast %153 : vector<1x1x4x8xbf16> to vector<4x8xbf16>
    %cst_141 = arith.constant dense<0.000000e+00> : vector<128x8xf32>
    %155 = tpu.matmul %152, %154, %cst_141 {dimension_numbers = #tpu.dot_dimension_numbers<[1], [0], [0], [1], [0, 0, 1, 1], [], []>} : vector<128x4xbf16>, vector<4x8xbf16>, vector<128x8xf32> -> vector<128x8xf32>
    %156 = arith.addf %147, %155 : vector<128x8xf32>
    %c3_i32 = arith.constant 3 : i32
    %157 = arith.addi %1, %c3_i32 : i32
    %c0_142 = arith.constant 0 : index
    %158 = arith.index_cast %157 : i32 to index
    %c1_143 = arith.constant 1 : index
    %c0_144 = arith.constant 0 : index
    %159 = vector.load %arg3[%c0_142, %158, %c1_143, %c0_144] : memref<1x24x24x4xbf16, #tpu.memory_space<vmem>>, vector<1x8x16x4xbf16>
    %160 = vector.shape_cast %159 : vector<1x8x16x4xbf16> to vector<8x16x4xbf16>
    %161 = vector.shape_cast %160 : vector<8x16x4xbf16> to vector<128x4xbf16>
    %c1_145 = arith.constant 1 : index
    %c6_146 = arith.constant 6 : index
    %c0_147 = arith.constant 0 : index
    %c0_148 = arith.constant 0 : index
    %162 = vector.load %arg5[%c1_145, %c6_146, %c0_147, %c0_148] : memref<3x9x4x8xbf16, #tpu.memory_space<vmem>>, vector<1x1x4x8xbf16>
    %163 = vector.shape_cast %162 : vector<1x1x4x8xbf16> to vector<4x8xbf16>
    %cst_149 = arith.constant dense<0.000000e+00> : vector<128x8xf32>
    %164 = tpu.matmul %161, %163, %cst_149 {dimension_numbers = #tpu.dot_dimension_numbers<[1], [0], [0], [1], [0, 0, 1, 1], [], []>} : vector<128x4xbf16>, vector<4x8xbf16>, vector<128x8xf32> -> vector<128x8xf32>
    %165 = arith.addf %156, %164 : vector<128x8xf32>
    %c3_i32_150 = arith.constant 3 : i32
    %166 = arith.addi %1, %c3_i32_150 : i32
    %c0_151 = arith.constant 0 : index
    %167 = arith.index_cast %166 : i32 to index
    %c4_152 = arith.constant 4 : index
    %c0_153 = arith.constant 0 : index
    %168 = vector.load %arg3[%c0_151, %167, %c4_152, %c0_153] : memref<1x24x24x4xbf16, #tpu.memory_space<vmem>>, vector<1x8x16x4xbf16>
    %169 = vector.shape_cast %168 : vector<1x8x16x4xbf16> to vector<8x16x4xbf16>
    %170 = vector.shape_cast %169 : vector<8x16x4xbf16> to vector<128x4xbf16>
    %c1_154 = arith.constant 1 : index
    %c7_155 = arith.constant 7 : index
    %c0_156 = arith.constant 0 : index
    %c0_157 = arith.constant 0 : index
    %171 = vector.load %arg5[%c1_154, %c7_155, %c0_156, %c0_157] : memref<3x9x4x8xbf16, #tpu.memory_space<vmem>>, vector<1x1x4x8xbf16>
    %172 = vector.shape_cast %171 : vector<1x1x4x8xbf16> to vector<4x8xbf16>
    %cst_158 = arith.constant dense<0.000000e+00> : vector<128x8xf32>
    %173 = tpu.matmul %170, %172, %cst_158 {dimension_numbers = #tpu.dot_dimension_numbers<[1], [0], [0], [1], [0, 0, 1, 1], [], []>} : vector<128x4xbf16>, vector<4x8xbf16>, vector<128x8xf32> -> vector<128x8xf32>
    %174 = arith.addf %165, %173 : vector<128x8xf32>
    %c3_i32_159 = arith.constant 3 : i32
    %175 = arith.addi %1, %c3_i32_159 : i32
    %c0_160 = arith.constant 0 : index
    %176 = arith.index_cast %175 : i32 to index
    %c7_161 = arith.constant 7 : index
    %c0_162 = arith.constant 0 : index
    %177 = vector.load %arg3[%c0_160, %176, %c7_161, %c0_162] : memref<1x24x24x4xbf16, #tpu.memory_space<vmem>>, vector<1x8x16x4xbf16>
    %178 = vector.shape_cast %177 : vector<1x8x16x4xbf16> to vector<8x16x4xbf16>
    %179 = vector.shape_cast %178 : vector<8x16x4xbf16> to vector<128x4xbf16>
    %c1_163 = arith.constant 1 : index
    %c8_164 = arith.constant 8 : index
    %c0_165 = arith.constant 0 : index
    %c0_166 = arith.constant 0 : index
    %180 = vector.load %arg5[%c1_163, %c8_164, %c0_165, %c0_166] : memref<3x9x4x8xbf16, #tpu.memory_space<vmem>>, vector<1x1x4x8xbf16>
    %181 = vector.shape_cast %180 : vector<1x1x4x8xbf16> to vector<4x8xbf16>
    %cst_167 = arith.constant dense<0.000000e+00> : vector<128x8xf32>
    %182 = tpu.matmul %179, %181, %cst_167 {dimension_numbers = #tpu.dot_dimension_numbers<[1], [0], [0], [1], [0, 0, 1, 1], [], []>} : vector<128x4xbf16>, vector<4x8xbf16>, vector<128x8xf32> -> vector<128x8xf32>
    %183 = arith.addf %174, %182 : vector<128x8xf32>
    %c2_168 = arith.constant 2 : index
    %c0_169 = arith.constant 0 : index
    %c0_170 = arith.constant 0 : index
    %184 = vector.load %arg10[%c2_168, %c0_169, %c0_170] : memref<4x128x8xf32, #tpu.memory_space<vmem>>, vector<1x128x8xf32>
    %185 = vector.shape_cast %184 : vector<1x128x8xf32> to vector<128x8xf32>
    %186 = arith.addf %185, %183 : vector<128x8xf32>
    %c2_171 = arith.constant 2 : index
    %c0_172 = arith.constant 0 : index
    %c0_173 = arith.constant 0 : index
    %187 = vector.load %arg10[%c2_171, %c0_172, %c0_173] : memref<4x128x8xf32, #tpu.memory_space<vmem>>, vector<1x128x8xf32>
    %188 = vector.shape_cast %187 : vector<1x128x8xf32> to vector<128x8xf32>
    %189 = vector.shape_cast %186 : vector<128x8xf32> to vector<1x128x8xf32>
    tpu.vector_store %arg10[%c2_171, %c0_172, %c0_173], %189 {strides = array<i32>} : memref<4x128x8xf32, #tpu.memory_space<vmem>>, vector<1x128x8xf32>,
    %c-4_i32 = arith.constant -4 : i32
    %190 = arith.addi %1, %c-4_i32 : i32
    %c0_174 = arith.constant 0 : index
    %191 = arith.index_cast %190 : i32 to index
    %c0_175 = arith.constant 0 : index
    %c0_176 = arith.constant 0 : index
    %192 = vector.load %arg3[%c0_174, %191, %c0_175, %c0_176] : memref<1x24x24x4xbf16, #tpu.memory_space<vmem>>, vector<1x8x16x4xbf16>
    %193 = vector.shape_cast %192 : vector<1x8x16x4xbf16> to vector<8x16x4xbf16>
    %194 = vector.shape_cast %193 : vector<8x16x4xbf16> to vector<128x4xbf16>
    %c2_177 = arith.constant 2 : index
    %c0_178 = arith.constant 0 : index
    %c0_179 = arith.constant 0 : index
    %c0_180 = arith.constant 0 : index
    %195 = vector.load %arg5[%c2_177, %c0_178, %c0_179, %c0_180] : memref<3x9x4x8xbf16, #tpu.memory_space<vmem>>, vector<1x1x4x8xbf16>
    %196 = vector.shape_cast %195 : vector<1x1x4x8xbf16> to vector<4x8xbf16>
    %cst_181 = arith.constant dense<0.000000e+00> : vector<128x8xf32>
    %197 = tpu.matmul %194, %196, %cst_181 {dimension_numbers = #tpu.dot_dimension_numbers<[1], [0], [0], [1], [0, 0, 1, 1], [], []>} : vector<128x4xbf16>, vector<4x8xbf16>, vector<128x8xf32> -> vector<128x8xf32>
    %c-4_i32_182 = arith.constant -4 : i32
    %198 = arith.addi %1, %c-4_i32_182 : i32
    %c0_183 = arith.constant 0 : index
    %199 = arith.index_cast %198 : i32 to index
    %c4_184 = arith.constant 4 : index
    %c0_185 = arith.constant 0 : index
    %200 = vector.load %arg3[%c0_183, %199, %c4_184, %c0_185] : memref<1x24x24x4xbf16, #tpu.memory_space<vmem>>, vector<1x8x16x4xbf16>
    %201 = vector.shape_cast %200 : vector<1x8x16x4xbf16> to vector<8x16x4xbf16>
    %202 = vector.shape_cast %201 : vector<8x16x4xbf16> to vector<128x4xbf16>
    %c2_186 = arith.constant 2 : index
    %c1_187 = arith.constant 1 : index
    %c0_188 = arith.constant 0 : index
    %c0_189 = arith.constant 0 : index
    %203 = vector.load %arg5[%c2_186, %c1_187, %c0_188, %c0_189] : memref<3x9x4x8xbf16, #tpu.memory_space<vmem>>, vector<1x1x4x8xbf16>
    %204 = vector.shape_cast %203 : vector<1x1x4x8xbf16> to vector<4x8xbf16>
    %cst_190 = arith.constant dense<0.000000e+00> : vector<128x8xf32>
    %205 = tpu.matmul %202, %204, %cst_190 {dimension_numbers = #tpu.dot_dimension_numbers<[1], [0], [0], [1], [0, 0, 1, 1], [], []>} : vector<128x4xbf16>, vector<4x8xbf16>, vector<128x8xf32> -> vector<128x8xf32>
    %206 = arith.addf %197, %205 : vector<128x8xf32>
    %c-4_i32_191 = arith.constant -4 : i32
    %207 = arith.addi %1, %c-4_i32_191 : i32
    %c0_192 = arith.constant 0 : index
    %208 = arith.index_cast %207 : i32 to index
    %c8_193 = arith.constant 8 : index
    %c0_194 = arith.constant 0 : index
    %209 = vector.load %arg3[%c0_192, %208, %c8_193, %c0_194] : memref<1x24x24x4xbf16, #tpu.memory_space<vmem>>, vector<1x8x16x4xbf16>
    %210 = vector.shape_cast %209 : vector<1x8x16x4xbf16> to vector<8x16x4xbf16>
    %211 = vector.shape_cast %210 : vector<8x16x4xbf16> to vector<128x4xbf16>
    %c2_195 = arith.constant 2 : index
    %c2_196 = arith.constant 2 : index
    %c0_197 = arith.constant 0 : index
    %c0_198 = arith.constant 0 : index
    %212 = vector.load %arg5[%c2_195, %c2_196, %c0_197, %c0_198] : memref<3x9x4x8xbf16, #tpu.memory_space<vmem>>, vector<1x1x4x8xbf16>
    %213 = vector.shape_cast %212 : vector<1x1x4x8xbf16> to vector<4x8xbf16>
    %cst_199 = arith.constant dense<0.000000e+00> : vector<128x8xf32>
    %214 = tpu.matmul %211, %213, %cst_199 {dimension_numbers = #tpu.dot_dimension_numbers<[1], [0], [0], [1], [0, 0, 1, 1], [], []>} : vector<128x4xbf16>, vector<4x8xbf16>, vector<128x8xf32> -> vector<128x8xf32>
    %215 = arith.addf %206, %214 : vector<128x8xf32>
    %c0_i32_200 = arith.constant 0 : i32
    %216 = arith.addi %1, %c0_i32_200 : i32
    %c0_201 = arith.constant 0 : index
    %217 = arith.index_cast %216 : i32 to index
    %c0_202 = arith.constant 0 : index
    %c0_203 = arith.constant 0 : index
    %218 = vector.load %arg3[%c0_201, %217, %c0_202, %c0_203] : memref<1x24x24x4xbf16, #tpu.memory_space<vmem>>, vector<1x8x16x4xbf16>
    %219 = vector.shape_cast %218 : vector<1x8x16x4xbf16> to vector<8x16x4xbf16>
    %220 = vector.shape_cast %219 : vector<8x16x4xbf16> to vector<128x4xbf16>
    %c2_204 = arith.constant 2 : index
    %c3_205 = arith.constant 3 : index
    %c0_206 = arith.constant 0 : index
    %c0_207 = arith.constant 0 : index
    %221 = vector.load %arg5[%c2_204, %c3_205, %c0_206, %c0_207] : memref<3x9x4x8xbf16, #tpu.memory_space<vmem>>, vector<1x1x4x8xbf16>
    %222 = vector.shape_cast %221 : vector<1x1x4x8xbf16> to vector<4x8xbf16>
    %cst_208 = arith.constant dense<0.000000e+00> : vector<128x8xf32>
    %223 = tpu.matmul %220, %222, %cst_208 {dimension_numbers = #tpu.dot_dimension_numbers<[1], [0], [0], [1], [0, 0, 1, 1], [], []>} : vector<128x4xbf16>, vector<4x8xbf16>, vector<128x8xf32> -> vector<128x8xf32>
    %224 = arith.addf %215, %223 : vector<128x8xf32>
    %c0_i32_209 = arith.constant 0 : i32
    %225 = arith.addi %1, %c0_i32_209 : i32
    %c0_210 = arith.constant 0 : index
    %226 = arith.index_cast %225 : i32 to index
    %c4_211 = arith.constant 4 : index
    %c0_212 = arith.constant 0 : index
    %227 = vector.load %arg3[%c0_210, %226, %c4_211, %c0_212] : memref<1x24x24x4xbf16, #tpu.memory_space<vmem>>, vector<1x8x16x4xbf16>
    %228 = vector.shape_cast %227 : vector<1x8x16x4xbf16> to vector<8x16x4xbf16>
    %229 = vector.shape_cast %228 : vector<8x16x4xbf16> to vector<128x4xbf16>
    %c2_213 = arith.constant 2 : index
    %c4_214 = arith.constant 4 : index
    %c0_215 = arith.constant 0 : index
    %c0_216 = arith.constant 0 : index
    %230 = vector.load %arg5[%c2_213, %c4_214, %c0_215, %c0_216] : memref<3x9x4x8xbf16, #tpu.memory_space<vmem>>, vector<1x1x4x8xbf16>
    %231 = vector.shape_cast %230 : vector<1x1x4x8xbf16> to vector<4x8xbf16>
    %cst_217 = arith.constant dense<0.000000e+00> : vector<128x8xf32>
    %232 = tpu.matmul %229, %231, %cst_217 {dimension_numbers = #tpu.dot_dimension_numbers<[1], [0], [0], [1], [0, 0, 1, 1], [], []>} : vector<128x4xbf16>, vector<4x8xbf16>, vector<128x8xf32> -> vector<128x8xf32>
    %233 = arith.addf %224, %232 : vector<128x8xf32>
    %c0_i32_218 = arith.constant 0 : i32
    %234 = arith.addi %1, %c0_i32_218 : i32
    %c0_219 = arith.constant 0 : index
    %235 = arith.index_cast %234 : i32 to index
    %c8_220 = arith.constant 8 : index
    %c0_221 = arith.constant 0 : index
    %236 = vector.load %arg3[%c0_219, %235, %c8_220, %c0_221] : memref<1x24x24x4xbf16, #tpu.memory_space<vmem>>, vector<1x8x16x4xbf16>
    %237 = vector.shape_cast %236 : vector<1x8x16x4xbf16> to vector<8x16x4xbf16>
    %238 = vector.shape_cast %237 : vector<8x16x4xbf16> to vector<128x4xbf16>
    %c2_222 = arith.constant 2 : index
    %c5_223 = arith.constant 5 : index
    %c0_224 = arith.constant 0 : index
    %c0_225 = arith.constant 0 : index
    %239 = vector.load %arg5[%c2_222, %c5_223, %c0_224, %c0_225] : memref<3x9x4x8xbf16, #tpu.memory_space<vmem>>, vector<1x1x4x8xbf16>
    %240 = vector.shape_cast %239 : vector<1x1x4x8xbf16> to vector<4x8xbf16>
    %cst_226 = arith.constant dense<0.000000e+00> : vector<128x8xf32>
    %241 = tpu.matmul %238, %240, %cst_226 {dimension_numbers = #tpu.dot_dimension_numbers<[1], [0], [0], [1], [0, 0, 1, 1], [], []>} : vector<128x4xbf16>, vector<4x8xbf16>, vector<128x8xf32> -> vector<128x8xf32>
    %242 = arith.addf %233, %241 : vector<128x8xf32>
    %c4_i32_227 = arith.constant 4 : i32
    %243 = arith.addi %1, %c4_i32_227 : i32
    %c0_228 = arith.constant 0 : index
    %244 = arith.index_cast %243 : i32 to index
    %c0_229 = arith.constant 0 : index
    %c0_230 = arith.constant 0 : index
    %245 = vector.load %arg3[%c0_228, %244, %c0_229, %c0_230] : memref<1x24x24x4xbf16, #tpu.memory_space<vmem>>, vector<1x8x16x4xbf16>
    %246 = vector.shape_cast %245 : vector<1x8x16x4xbf16> to vector<8x16x4xbf16>
    %247 = vector.shape_cast %246 : vector<8x16x4xbf16> to vector<128x4xbf16>
    %c2_231 = arith.constant 2 : index
    %c6_232 = arith.constant 6 : index
    %c0_233 = arith.constant 0 : index
    %c0_234 = arith.constant 0 : index
    %248 = vector.load %arg5[%c2_231, %c6_232, %c0_233, %c0_234] : memref<3x9x4x8xbf16, #tpu.memory_space<vmem>>, vector<1x1x4x8xbf16>
    %249 = vector.shape_cast %248 : vector<1x1x4x8xbf16> to vector<4x8xbf16>
    %cst_235 = arith.constant dense<0.000000e+00> : vector<128x8xf32>
    %250 = tpu.matmul %247, %249, %cst_235 {dimension_numbers = #tpu.dot_dimension_numbers<[1], [0], [0], [1], [0, 0, 1, 1], [], []>} : vector<128x4xbf16>, vector<4x8xbf16>, vector<128x8xf32> -> vector<128x8xf32>
    %251 = arith.addf %242, %250 : vector<128x8xf32>
    %c4_i32_236 = arith.constant 4 : i32
    %252 = arith.addi %1, %c4_i32_236 : i32
    %c0_237 = arith.constant 0 : index
    %253 = arith.index_cast %252 : i32 to index
    %c4_238 = arith.constant 4 : index
    %c0_239 = arith.constant 0 : index
    %254 = vector.load %arg3[%c0_237, %253, %c4_238, %c0_239] : memref<1x24x24x4xbf16, #tpu.memory_space<vmem>>, vector<1x8x16x4xbf16>
    %255 = vector.shape_cast %254 : vector<1x8x16x4xbf16> to vector<8x16x4xbf16>
    %256 = vector.shape_cast %255 : vector<8x16x4xbf16> to vector<128x4xbf16>
    %c2_240 = arith.constant 2 : index
    %c7_241 = arith.constant 7 : index
    %c0_242 = arith.constant 0 : index
    %c0_243 = arith.constant 0 : index
    %257 = vector.load %arg5[%c2_240, %c7_241, %c0_242, %c0_243] : memref<3x9x4x8xbf16, #tpu.memory_space<vmem>>, vector<1x1x4x8xbf16>
    %258 = vector.shape_cast %257 : vector<1x1x4x8xbf16> to vector<4x8xbf16>
    %cst_244 = arith.constant dense<0.000000e+00> : vector<128x8xf32>
    %259 = tpu.matmul %256, %258, %cst_244 {dimension_numbers = #tpu.dot_dimension_numbers<[1], [0], [0], [1], [0, 0, 1, 1], [], []>} : vector<128x4xbf16>, vector<4x8xbf16>, vector<128x8xf32> -> vector<128x8xf32>
    %260 = arith.addf %251, %259 : vector<128x8xf32>
    %c4_i32_245 = arith.constant 4 : i32
    %261 = arith.addi %1, %c4_i32_245 : i32
    %c0_246 = arith.constant 0 : index
    %262 = arith.index_cast %261 : i32 to index
    %c8_247 = arith.constant 8 : index
    %c0_248 = arith.constant 0 : index
    %263 = vector.load %arg3[%c0_246, %262, %c8_247, %c0_248] : memref<1x24x24x4xbf16, #tpu.memory_space<vmem>>, vector<1x8x16x4xbf16>
    %264 = vector.shape_cast %263 : vector<1x8x16x4xbf16> to vector<8x16x4xbf16>
    %265 = vector.shape_cast %264 : vector<8x16x4xbf16> to vector<128x4xbf16>
    %c2_249 = arith.constant 2 : index
    %c8_250 = arith.constant 8 : index
    %c0_251 = arith.constant 0 : index
    %c0_252 = arith.constant 0 : index
    %266 = vector.load %arg5[%c2_249, %c8_250, %c0_251, %c0_252] : memref<3x9x4x8xbf16, #tpu.memory_space<vmem>>, vector<1x1x4x8xbf16>
    %267 = vector.shape_cast %266 : vector<1x1x4x8xbf16> to vector<4x8xbf16>
    %cst_253 = arith.constant dense<0.000000e+00> : vector<128x8xf32>
    %268 = tpu.matmul %265, %267, %cst_253 {dimension_numbers = #tpu.dot_dimension_numbers<[1], [0], [0], [1], [0, 0, 1, 1], [], []>} : vector<128x4xbf16>, vector<4x8xbf16>, vector<128x8xf32> -> vector<128x8xf32>
    %269 = arith.addf %260, %268 : vector<128x8xf32>
    %c3_254 = arith.constant 3 : index
    %c0_255 = arith.constant 0 : index
    %c0_256 = arith.constant 0 : index
    %270 = vector.load %arg10[%c3_254, %c0_255, %c0_256] : memref<4x128x8xf32, #tpu.memory_space<vmem>>, vector<1x128x8xf32>
    %271 = vector.shape_cast %270 : vector<1x128x8xf32> to vector<128x8xf32>
    %272 = arith.addf %271, %269 : vector<128x8xf32>
    %c3_257 = arith.constant 3 : index
    %c0_258 = arith.constant 0 : index
    %c0_259 = arith.constant 0 : index
    %273 = vector.load %arg10[%c3_257, %c0_258, %c0_259] : memref<4x128x8xf32, #tpu.memory_space<vmem>>, vector<1x128x8xf32>
    %274 = vector.shape_cast %273 : vector<1x128x8xf32> to vector<128x8xf32>
    %275 = vector.shape_cast %272 : vector<128x8xf32> to vector<1x128x8xf32>
    tpu.vector_store %arg10[%c3_257, %c0_258, %c0_259], %275 {strides = array<i32>} : memref<4x128x8xf32, #tpu.memory_space<vmem>>, vector<1x128x8xf32>,
    %c0_i32_260 = arith.constant 0 : i32
    %276 = arith.cmpi eq, %arg2, %c0_i32_260 : i32
    %277 = arith.extui %276 : i1 to i32
    %c0_i32_261 = arith.constant 0 : i32
    %278 = arith.cmpi ne, %277, %c0_i32_261 : i32
    scf.if %278 {
      %c0_262 = arith.constant 0 : index
      %c0_263 = arith.constant 0 : index
      %c0_264 = arith.constant 0 : index
      %279 = vector.load %arg8[%c0_262, %c0_263, %c0_264] : memref<1x1x8xf32, #tpu.memory_space<vmem>>, vector<1x1x8xf32>
      %280 = vector.shape_cast %279 : vector<1x1x8xf32> to vector<1x8xf32>
      %c0_265 = arith.constant 0 : index
      %c0_266 = arith.constant 0 : index
      %c0_267 = arith.constant 0 : index
      %281 = vector.load %arg10[%c0_265, %c0_266, %c0_267] : memref<4x128x8xf32, #tpu.memory_space<vmem>>, vector<1x128x8xf32>
      %282 = vector.shape_cast %281 : vector<1x128x8xf32> to vector<128x8xf32>
      %c0_268 = arith.constant 0 : index
      %c0_269 = arith.constant 0 : index
      %283 = vector.load %arg7[%c0_268, %c0_269] : memref<4x8xf32, #tpu.memory_space<vmem>>, vector<1x8xf32>
      %284 = vector.shape_cast %283 : vector<1x8xf32> to vector<8xf32>
      %285 = vector.shape_cast %284 : vector<8xf32> to vector<1x8xf32>
      %286 = vector.broadcast %285 : vector<1x8xf32> to vector<128x8xf32>
      %287 = arith.addf %282, %286 : vector<128x8xf32>
      %cst_270 = arith.constant 0.000000e+00 : f32
      %288 = vector.broadcast %cst_270 : f32 to vector<128x8xf32>
      %289 = arith.maximumf %287, %288 : vector<128x8xf32>
      %290 = arith.truncf %289 : vector<128x8xf32> to vector<128x8xbf16>
      %c0_271 = arith.constant 0 : index
      %c0_272 = arith.constant 0 : index
      %c0_273 = arith.constant 0 : index
      %291 = vector.load %arg6[%c0_271, %c0_272, %c0_273] : memref<4x8x8xbf16, #tpu.memory_space<vmem>>, vector<1x8x8xbf16>
      %292 = vector.shape_cast %291 : vector<1x8x8xbf16> to vector<8x8xbf16>
      %cst_274 = arith.constant dense<0.000000e+00> : vector<128x8xf32>
      %293 = tpu.matmul %290, %292, %cst_274 {dimension_numbers = #tpu.dot_dimension_numbers<[1], [0], [0], [1], [0, 0, 1, 1], [], []>} : vector<128x8xbf16>, vector<8x8xbf16>, vector<128x8xf32> -> vector<128x8xf32>
      %294 = vector.broadcast %280 : vector<1x8xf32> to vector<128x8xf32>
      %295 = arith.addf %294, %293 : vector<128x8xf32>
      %c1_275 = arith.constant 1 : index
      %c0_276 = arith.constant 0 : index
      %c0_277 = arith.constant 0 : index
      %296 = vector.load %arg10[%c1_275, %c0_276, %c0_277] : memref<4x128x8xf32, #tpu.memory_space<vmem>>, vector<1x128x8xf32>
      %297 = vector.shape_cast %296 : vector<1x128x8xf32> to vector<128x8xf32>
      %c1_278 = arith.constant 1 : index
      %c0_279 = arith.constant 0 : index
      %298 = vector.load %arg7[%c1_278, %c0_279] : memref<4x8xf32, #tpu.memory_space<vmem>>, vector<1x8xf32>
      %299 = vector.shape_cast %298 : vector<1x8xf32> to vector<8xf32>
      %300 = vector.shape_cast %299 : vector<8xf32> to vector<1x8xf32>
      %301 = vector.broadcast %300 : vector<1x8xf32> to vector<128x8xf32>
      %302 = arith.addf %297, %301 : vector<128x8xf32>
      %cst_280 = arith.constant 0.000000e+00 : f32
      %303 = vector.broadcast %cst_280 : f32 to vector<128x8xf32>
      %304 = arith.maximumf %302, %303 : vector<128x8xf32>
      %305 = arith.truncf %304 : vector<128x8xf32> to vector<128x8xbf16>
      %c1_281 = arith.constant 1 : index
      %c0_282 = arith.constant 0 : index
      %c0_283 = arith.constant 0 : index
      %306 = vector.load %arg6[%c1_281, %c0_282, %c0_283] : memref<4x8x8xbf16, #tpu.memory_space<vmem>>, vector<1x8x8xbf16>
      %307 = vector.shape_cast %306 : vector<1x8x8xbf16> to vector<8x8xbf16>
      %cst_284 = arith.constant dense<0.000000e+00> : vector<128x8xf32>
      %308 = tpu.matmul %305, %307, %cst_284 {dimension_numbers = #tpu.dot_dimension_numbers<[1], [0], [0], [1], [0, 0, 1, 1], [], []>} : vector<128x8xbf16>, vector<8x8xbf16>, vector<128x8xf32> -> vector<128x8xf32>
      %309 = arith.addf %295, %308 : vector<128x8xf32>
      %c2_285 = arith.constant 2 : index
      %c0_286 = arith.constant 0 : index
      %c0_287 = arith.constant 0 : index
      %310 = vector.load %arg10[%c2_285, %c0_286, %c0_287] : memref<4x128x8xf32, #tpu.memory_space<vmem>>, vector<1x128x8xf32>
      %311 = vector.shape_cast %310 : vector<1x128x8xf32> to vector<128x8xf32>
      %c2_288 = arith.constant 2 : index
      %c0_289 = arith.constant 0 : index
      %312 = vector.load %arg7[%c2_288, %c0_289] : memref<4x8xf32, #tpu.memory_space<vmem>>, vector<1x8xf32>
      %313 = vector.shape_cast %312 : vector<1x8xf32> to vector<8xf32>
      %314 = vector.shape_cast %313 : vector<8xf32> to vector<1x8xf32>
      %315 = vector.broadcast %314 : vector<1x8xf32> to vector<128x8xf32>
      %316 = arith.addf %311, %315 : vector<128x8xf32>
      %cst_290 = arith.constant 0.000000e+00 : f32
      %317 = vector.broadcast %cst_290 : f32 to vector<128x8xf32>
      %318 = arith.maximumf %316, %317 : vector<128x8xf32>
      %319 = arith.truncf %318 : vector<128x8xf32> to vector<128x8xbf16>
      %c2_291 = arith.constant 2 : index
      %c0_292 = arith.constant 0 : index
      %c0_293 = arith.constant 0 : index
      %320 = vector.load %arg6[%c2_291, %c0_292, %c0_293] : memref<4x8x8xbf16, #tpu.memory_space<vmem>>, vector<1x8x8xbf16>
      %321 = vector.shape_cast %320 : vector<1x8x8xbf16> to vector<8x8xbf16>
      %cst_294 = arith.constant dense<0.000000e+00> : vector<128x8xf32>
      %322 = tpu.matmul %319, %321, %cst_294 {dimension_numbers = #tpu.dot_dimension_numbers<[1], [0], [0], [1], [0, 0, 1, 1], [], []>} : vector<128x8xbf16>, vector<8x8xbf16>, vector<128x8xf32> -> vector<128x8xf32>
      %323 = arith.addf %309, %322 : vector<128x8xf32>
      %c3_295 = arith.constant 3 : index
      %c0_296 = arith.constant 0 : index
      %c0_297 = arith.constant 0 : index
      %324 = vector.load %arg10[%c3_295, %c0_296, %c0_297] : memref<4x128x8xf32, #tpu.memory_space<vmem>>, vector<1x128x8xf32>
      %325 = vector.shape_cast %324 : vector<1x128x8xf32> to vector<128x8xf32>
      %c3_298 = arith.constant 3 : index
      %c0_299 = arith.constant 0 : index
      %326 = vector.load %arg7[%c3_298, %c0_299] : memref<4x8xf32, #tpu.memory_space<vmem>>, vector<1x8xf32>
      %327 = vector.shape_cast %326 : vector<1x8xf32> to vector<8xf32>
      %328 = vector.shape_cast %327 : vector<8xf32> to vector<1x8xf32>
      %329 = vector.broadcast %328 : vector<1x8xf32> to vector<128x8xf32>
      %330 = arith.addf %325, %329 : vector<128x8xf32>
      %cst_300 = arith.constant 0.000000e+00 : f32
      %331 = vector.broadcast %cst_300 : f32 to vector<128x8xf32>
      %332 = arith.maximumf %330, %331 : vector<128x8xf32>
      %333 = arith.truncf %332 : vector<128x8xf32> to vector<128x8xbf16>
      %c3_301 = arith.constant 3 : index
      %c0_302 = arith.constant 0 : index
      %c0_303 = arith.constant 0 : index
      %334 = vector.load %arg6[%c3_301, %c0_302, %c0_303] : memref<4x8x8xbf16, #tpu.memory_space<vmem>>, vector<1x8x8xbf16>
      %335 = vector.shape_cast %334 : vector<1x8x8xbf16> to vector<8x8xbf16>
      %cst_304 = arith.constant dense<0.000000e+00> : vector<128x8xf32>
      %336 = tpu.matmul %333, %335, %cst_304 {dimension_numbers = #tpu.dot_dimension_numbers<[1], [0], [0], [1], [0, 0, 1, 1], [], []>} : vector<128x8xbf16>, vector<8x8xbf16>, vector<128x8xf32> -> vector<128x8xf32>
      %337 = arith.addf %323, %336 : vector<128x8xf32>
      %cst_305 = arith.constant 0.000000e+00 : f32
      %338 = vector.broadcast %cst_305 : f32 to vector<128x8xf32>
      %339 = arith.maximumf %337, %338 : vector<128x8xf32>
      %340 = arith.truncf %339 : vector<128x8xf32> to vector<128x8xbf16>
      %c0_306 = arith.constant 0 : index
      %c0_307 = arith.constant 0 : index
      %c0_308 = arith.constant 0 : index
      %341 = vector.load %arg9[%c0_306, %c0_307, %c0_308] : memref<1x128x8xbf16, #tpu.memory_space<vmem>>, vector<1x128x8xbf16>
      %342 = vector.shape_cast %341 : vector<1x128x8xbf16> to vector<128x8xbf16>
      %343 = vector.shape_cast %340 : vector<128x8xbf16> to vector<1x128x8xbf16>
      tpu.vector_store %arg9[%c0_306, %c0_307, %c0_308], %343 {strides = array<i32>} : memref<1x128x8xbf16, #tpu.memory_space<vmem>>, vector<1x128x8xbf16>,
    } else {
    }
    return
  }
  func.func @transform_0(%arg0: i32, %arg1: i32, %arg2: i32) -> (i32, i32, i32, i32) {
    %c0_i32 = arith.constant 0 : i32
    %c0_i32_0 = arith.constant 0 : i32
    %c0_i32_1 = arith.constant 0 : i32
    return %arg0, %c0_i32, %c0_i32_0, %arg2 : i32, i32, i32, i32
  }
  func.func @transform_1(%arg0: i32, %arg1: i32, %arg2: i32) -> (i32, i32) {
    %c0_i32 = arith.constant 0 : i32
    %c0_i32_0 = arith.constant 0 : i32
    return %arg2, %c0_i32 : i32, i32
  }
  func.func @transform_2(%arg0: i32, %arg1: i32, %arg2: i32) -> (i32, i32, i32, i32) {
    %c0_i32 = arith.constant 0 : i32
    %c0_i32_0 = arith.constant 0 : i32
    %c0_i32_1 = arith.constant 0 : i32
    %c0_i32_2 = arith.constant 0 : i32
    return %c0_i32, %c0_i32_0, %arg2, %c0_i32_1 : i32, i32, i32, i32
  }
  func.func @transform_3(%arg0: i32, %arg1: i32, %arg2: i32) -> (i32, i32, i32) {
    %c0_i32 = arith.constant 0 : i32
    %c0_i32_0 = arith.constant 0 : i32
    %c0_i32_1 = arith.constant 0 : i32
    %c0_i32_2 = arith.constant 0 : i32
    return %c0_i32, %c0_i32_0, %c0_i32_1 : i32, i32, i32
  }
  func.func @transform_4(%arg0: i32, %arg1: i32, %arg2: i32) -> (i32, i32) {
    %c0_i32 = arith.constant 0 : i32
    %c0_i32_0 = arith.constant 0 : i32
    %c0_i32_1 = arith.constant 0 : i32
    return %c0_i32, %c0_i32_0 : i32, i32
  }
  func.func @transform_5(%arg0: i32, %arg1: i32, %arg2: i32) -> (i32, i32, i32) {
    %c0_i32 = arith.constant 0 : i32
    %c0_i32_0 = arith.constant 0 : i32
    %c0_i32_1 = arith.constant 0 : i32
    return %arg0, %c0_i32, %c0_i32_0 : i32, i32, i32
  }
  func.func @transform_6(%arg0: i32, %arg1: i32, %arg2: i32) -> (i32, i32, i32) {
    %c0_i32 = arith.constant 0 : i32
    %c0_i32_0 = arith.constant 0 : i32
    return %arg0, %arg1, %c0_i32 : i32, i32, i32
  }
}

</mosaic_0001>

<bundles_post_ra>
// kernel: aspp_forward.1
= control target key start
LH: loop header
LB: loop body
LE: loop exit
PB: predicated region body
PF: predicated region fallthrough
CT: control target
= control target key end

     0   :  { %s11725_s21 = smov 0   ;;  %s11727_s22 = smov 0   ;;  %s15015_s0 = inlined_call_operand.vmem [shape: bf16[2,24,24,4], index: 0, kind: input, shape index: {}]   ;;  %s15016_s1 = inlined_call_operand.vmem [shape: bf16[4,8], index: 1, kind: input, shape index: {}]   ;;  %s15017_s2 = inlined_call_operand.vmem [shape: bf16[3,9,4,8], index: 2, kind: input, shape index: {}]   ;;  %s15018_s3 = inlined_call_operand.vmem [shape: bf16[4,8,8], index: 3, kind: input, shape index: {}]   ;;  %s15019_s4 = inlined_call_operand.vmem [shape: f32[4,8], index: 4, kind: input, shape index: {}]   ;;  %s15020_s5 = inlined_call_operand.vmem [shape: f32[2,1,8], index: 5, kind: input, shape index: {}]   ;;  %s15021_s6 = inlined_call_operand.vmem [shape: bf16[2,256,8], index: 6, kind: output, shape index: {}]  }
   0x1   :  { %s11729_s23 = smov 0   ;;  %s11731_s24 = smov 0  }
   0x2   :  { %s11733_s25 = smov 0  }
   0x3 LB: > { %s31_s26 = sadd.s32 1, %s11679_s23  ;;  %s35_s27 = sadd.s32 1, %s11683_s24  ;;  %s11687_s25 = sphi %s11733_s25, %s16_s25   ;;  %s11683_s24 = sphi %s11731_s24, %s15117_s24   ;;  %s11679_s23 = sphi %s11729_s23, %s15116_s23   ;;  %s11675_s22 = sphi %s11727_s22, %s15115_s22   ;;  %s11671_s21 = sphi %s11725_s21, %s15114_s21  }
   0x4   : > { %p33_p0 = scmp.ge.s32.totalorder %s31_s26, 2  ;;  %p9042_p1 = scmp.ge.s32.totalorder %s11687_s25, 1 }
   0x5   : > { %p264_p2 = scmp.lt.s32.totalorder %s11687_s25, 5 }
   0x6   : > { %s15119_s26 = smov (%p33_p0, %s31_s26), 0  ;;  %s15121_s27 = smov (!%p33_p0, %s35_s27), %s11683_s24 }
   0x7   : > { %p265_p3 = pnand %p9042_p1, %p264_p2  ;;  %p37_p4 = scmp.ge.s32.totalorder %s15121_s27, 2 }
   0x9   : > { %s15123_s27 = smov (%p37_p4, %s15121_s27), 0  ;;  %268 = sbr.rel (%p265_p3) target bundleno = 1046 (0x416), region = 44 }
  0x10   : > { %vm480_vm0 = vcmask 1041408   ;;  %v9213_v0 = vld [vmem:[%s15017_s2 + $0x4] sm:$0x3]  ;;  %v539_v1 = vld [vmem:[%s15016_s1] sm:$0x3]  ;;  %p312_p5 = scmp.lt.s32.totalorder %s11675_s22, 1 }
  0x11   : > { %11534 = vmatprep.subr.msk.bf16.mxu1 %vm480_vm0, %v9213_v0  ;;  %11531 = vmatprep.subr.msk.bf16.mxu0 %vm480_vm0, %v539_v1  ;;  %v1363_v2 = vsel %vm480_vm0, %v9213_v0, 0  ;;  %v591_v3 = vsel %vm480_vm0, %v539_v1, 0  ;;  %v9262_v4 = vld [vmem:[%s15017_s2 + $0x6] sm:$0x3]  ;;  %s9049_s10 = smul.u32 96, %s11671_s21  ;;  %vm481_vm1 = vcmask 1045508  }
  0x12   : > { %10562 = vmatpush3.bf16.msra.mxu1 %v1363_v2  ;;  %10508 = vmatpush3.bf16.msra.mxu0 %v591_v3  ;;  %s15125_s22 = smov (!%p312_p5, %s11675_s22), 1  ;;  %v9156_v5 = vld [vmem:[%s15017_s2 + $0x2] sm:$0x3]  ;;  %v11782_v6 = vld [vmem:[%s15017_s2 + $0x8] sm:$0x3]  ;;  %vm564_vm2 = vcmask 31744   ;;  %vm11816_vm5 = vmor %vm480_vm0, %vm481_vm1 }
  0x13   : > { %11535 = vmatprep.subr.msk.bf16.mxu1 %vm480_vm0, %v9262_v4  ;;  %s11563_s13 = smul.u32 288, %s15125_s22  ;;  %11532 = vmatprep.subr.msk.bf16.mxu0 %vm480_vm0, %v9156_v5  ;;  %v11787_v7 = vld [vmem:[%s15017_s2] sm:$0x3]  ;;  %v11792_v8 = vld [vmem:[%s15017_s2 + $0xa] sm:$0x3]  ;;  %vm1253_vm3 = vcmask 1040384   ;;  %s330_s19 = scalar_lea.vmem %s15020_s5, %s15125_s22 }
  0x14   : > { %v11797_v9 = vld [vmem:[%s15017_s2 + $0x14] sm:$0x3]  ;;  %vm1254_vm4 = vcmask 1044484   ;;  %v11803_v10 = vsel %vm480_vm0, %v9262_v4, 0  ;;  %v11806_v11 = vsel %vm480_vm0, %v9156_v5, 0  ;;  %v11822_v14 = vsel %vm480_vm0, %v11782_v6, 0 }
  0x15   : > { %s319_s7 = scalar_lea.vmem %s15015_s0, %s11563_s13  ;;  %v11811_v12 = vld [vmem:[%s15017_s2 + $0xc] sm:$0x3]  ;;  %v11826_v15 = vsel %vm480_vm0, %v11787_v7, 0  ;;  %v11830_v16 = vsel %vm480_vm0, %v11792_v8, 0  ;;  %v11834_v17 = vsel %vm480_vm0, %v11797_v9, 0  ;;  %vm11852_vm6 = vmor %vm1253_vm3, %vm1254_vm4  ;;  %vm775_vm7 = vcmask 1042432  }
  0x16   : > { %s11813_s11 = scalar_lea.vmem %s319_s7, %s9049_s10  ;;  %v11844_v25 = vsel %vm480_vm0, %v11811_v12, 0  ;;  %vm776_vm8 = vcmask 1046532   ;;  %vm3115_vm10 = vsmask.f32 3328  ;;  %vm3116_vm11 = vsmask.f32 7440 }
  0x17   : > { %v9050_v18 = vld [vmem:[%s11813_s11 + $0x30] sm:$0xc]  ;;  %v9051_v19 = vld [vmem:[%s11813_s11 + $0x34] sm:$0xf]  ;;  %v9052_v20 = vld [vmem:[%s11813_s11 + $0x38] sm:$0x3] }
  0x18   : > { %v9074_v21 = vrot.slane %v9050_v18, 10  ;;  %v485_v22 = vrot.slane %v9051_v19, 6  ;;  %v488_v23 = vrot.slane %v9052_v20, 6  ;;  %v11840_v24 = vld [vmem:[%s11813_s11 + $0x1c] sm:$0xf]  ;;  %vm12016_vm9 = vmor %vm775_vm7, %vm776_vm8  ;;  %vm348_vm1 = vcmask 64512  }
  0x19   : > { %v780_v26 = vrot.slane %v11840_v24, 5  ;;  %v869_v27 = vrot.slane %v11840_v24, 6  ;;  %v9189_v28 = vld [vmem:[%s11813_s11 + $0x18] sm:$0x8]  ;;  %v9190_v29 = vld [vmem:[%s11813_s11 + $0x20] sm:$0x7]  ;;  %vm12753_vm12 = vmor %vm3115_vm10, %vm3116_vm11 }
  0x1a   : > { %v486_v31 = vsel %vm11816_vm5, %v9074_v21, %v485_v22  ;;  %v487_v32 = vrot.slane %v485_v22, 4  ;;  %v9205_v33 = vrot.slane %v9189_v28, 11  ;;  %v1258_v34 = vrot.slane %v11840_v24, 7  ;;  %v9053_v35 = vld [vmem:[%s11813_s11 + $0x3c] sm:$0xc]  ;;  %s9044_s16 = sshll.u32 %s11671_s21, 4 }
  0x1b   : > { %v1261_v36 = vrot.slane %v9190_v29, 7  ;;  %v9054_v37 = vld [vmem:[%s11813_s11 + $0x40] sm:$0xf]  ;;  %v9055_v38 = vld [vmem:[%s11813_s11 + $0x44] sm:$0x3]  ;;  %v9075_v39 = vrot.slane %v9053_v35, 10 }
  0x1c   : > { %v489_v40 = vsel %vm11816_vm5, %v487_v32, %v488_v23  ;;  %v1259_v41 = vsel %vm11852_vm6, %v9205_v33, %v1258_v34  ;;  %v1260_v42 = vrot.slane %v1258_v34, 4  ;;  %v492_v43 = vrot.slane %v9054_v37, 6  ;;  %v11867_v44 = vld [vmem:[%s11813_s11 + $0x28] sm:$0xf]  ;;  %v9191_v45 = vld [vmem:[%s11813_s11 + $0x24] sm:$0x8] }
  0x1d   : > { %v9082_v46 = vcombine.low %v486_v31, %v489_v40  ;;  %v495_v47 = vrot.slane %v9055_v38, 6  ;;  %v787_v48 = vrot.slane %v11867_v44, 5  ;;  %v876_v49 = vrot.slane %v11867_v44, 6  ;;  %v9192_v50 = vld [vmem:[%s11813_s11 + $0x2c] sm:$0x7]  ;;  %p334_p6 = scmp.lt.s32.totalorder %s9044_s16, 31 }
  0x1e   : > { %v1262_v51 = vsel %vm11852_vm6, %v1260_v42, %v1261_v36  ;;  %v493_v52 = vsel %vm11816_vm5, %v9075_v39, %v492_v43  ;;  %v494_v53 = vrot.slane %v492_v43, 4  ;;  %v9206_v54 = vrot.slane %v9191_v45, 11  ;;  %v9056_v55 = vld [vmem:[%s11813_s11 + $0x48] sm:$0xc]  ;;  %v9057_v56 = vld [vmem:[%s11813_s11 + $0x4c] sm:$0xf] }
  0x1f   : > { %10509 = vmatprep.mubr.msk.bf16.mxu0 %vm564_vm2, %v9082_v46  ;;  %v9214_v57 = vcombine.low %v1259_v41, %v1262_v51  ;;  %v11882_v58 = vrot.slane %v787_v48, 4  ;;  %v11886_v59 = vrot.slane %v876_v49, 4  ;;  %v1265_v60 = vrot.slane %v11867_v44, 7  ;;  %v9058_v61 = vld [vmem:[%s11813_s11 + $0x50] sm:$0x3]  ;;  %s15127_s16 = smov (!%p334_p6, %s9044_s16), 31 }
  0x20   : > { %v496_v62 = vsel %vm11816_vm5, %v494_v53, %v495_v47  ;;  %v1268_v63 = vrot.slane %v9192_v50, 7  ;;  %v9076_v0 = vrot.slane %v9056_v55, 10  ;;  %v499_v1 = vrot.slane %v9057_v56, 6  ;;  %v11893_v2 = vld [vmem:[%s11813_s11 + $0x34] sm:$0xf]  ;;  %s9045_s20 = sshll.u32 %s15125_s22, 5 }
  0x21   : > { %10563 = vmatprep.mubr.msk.bf16.mxu1 %vm564_vm2, %v9214_v57  ;;  %v9083_v3 = vcombine.low %v493_v52, %v496_v62  ;;  %v1266_v4 = vsel %vm11852_vm6, %v9206_v54, %v1265_v60  ;;  %v1267_v5 = vrot.slane %v1265_v60, 4  ;;  %v502_v18 = vrot.slane %v9058_v61, 6  ;;  %v9193_v19 = vld [vmem:[%s11813_s11 + $0x30] sm:$0x8]  ;;  %v9194_v20 = vld [vmem:[%s11813_s11 + $0x38] sm:$0x7]  ;;  %s337_s28 = sadd.s32 %s9045_s20, %s15127_s16 }
  0x22   : > { %v500_v21 = vsel %vm11816_vm5, %v9076_v0, %v499_v1  ;;  %v501_v22 = vrot.slane %v499_v1, 4  ;;  %v9207_v23 = vrot.slane %v9193_v19, 11  ;;  %v1272_v28 = vrot.slane %v11893_v2, 7  ;;  %v9059_v29 = vld [vmem:[%s11813_s11 + $0x54] sm:$0xc]  ;;  %s9046_s29 = sshll.u32 %s337_s28, 2 }
  0x23   : > { %10510 = vmatmul.mubr.msk.bf16.vlgmr.msra.gmra.mrb[0].mxu0 %vm564_vm2, %v9083_v3  ;;  %v1269_v31 = vsel %vm11852_vm6, %v1267_v5, %v1268_v63  ;;  %v1275_v32 = vrot.slane %v9194_v20, 7  ;;  %v9060_v33 = vld [vmem:[%s11813_s11 + $0x58] sm:$0xf]  ;;  %v9061_v34 = vld [vmem:[%s11813_s11 + $0x5c] sm:$0x3]  ;;  %v9077_v35 = vrot.slane %v9059_v29, 10  ;;  %s14953_s7 = scalar_lea.vmem %s15021_s6, %s9046_s29 }
  0x24   : > { %v9215_v36 = vcombine.low %v1266_v4, %v1269_v31  ;;  %v503_v37 = vsel %vm11816_vm5, %v501_v22, %v502_v18  ;;  %v1273_v38 = vsel %vm11852_vm6, %v9207_v23, %v1272_v28  ;;  %v1274_v39 = vrot.slane %v1272_v28, 4  ;;  %v11914_v40 = vld [vmem:[%s11813_s11 + $0x40] sm:$0xf]  ;;  %v9195_v41 = vld [vmem:[%s11813_s11 + $0x3c] sm:$0x8]  ;;  %10526 = vmatpush3.bf16.msra.mxu0 %v11806_v11 }
  0x25   : > { %v9084_v42 = vcombine.low %v500_v21, %v503_v37  ;;  %v506_v43 = vrot.slane %v9060_v33, 6  ;;  %v509_v45 = vrot.slane %v9061_v34, 6  ;;  %v9196_v46 = vld [vmem:[%s11813_s11 + $0x44] sm:$0x7]  ;;  %v9208_v47 = vrot.slane %v9195_v41, 11  ;;  %11533 = vmatprep.subr.msk.bf16.mxu0 %vm480_vm0, %v11787_v7 }
  0x26   : > { %10564 = vmatmul.mubr.msk.bf16.vlgmr.msra.gmra.mrb[0].mxu1 %vm564_vm2, %v9215_v36  ;;  %v1276_v50 = vsel %vm11852_vm6, %v1274_v39, %v1275_v32  ;;  %v1279_v51 = vrot.slane %v11914_v40, 7  ;;  %v1282_v52 = vrot.slane %v9196_v46, 7  ;;  %v9062_v11 = vld [vmem:[%s11813_s11 + $0x60] sm:$0xc]  ;;  %v9063_v53 = vld [vmem:[%s11813_s11 + $0x64] sm:$0xf] }
  0x27   : > { %10580 = vmatpush3.bf16.msra.mxu1 %v11803_v10  ;;  %10513 = vmatprep.mubr.msk.bf16.mxu0 %vm564_vm2, %v9084_v42  ;;  %v9216_v54 = vcombine.low %v1273_v38, %v1276_v50  ;;  %v507_v7 = vsel %vm11816_vm5, %v9077_v35, %v506_v43  ;;  %v508_v55 = vrot.slane %v506_v43, 4  ;;  %v9064_v56 = vld [vmem:[%s11813_s11 + $0x68] sm:$0x3]  ;;  %v9078_v57 = vrot.slane %v9062_v11, 10  ;;  %v11933_v60 = vld [vmem:[%s11813_s11 + $0x4c] sm:$0xf] }
  0x28   : > { %v1280_v61 = vsel %vm11852_vm6, %v9208_v47, %v1279_v51  ;;  %v1281_v62 = vrot.slane %v1279_v51, 4  ;;  %v513_v10 = vrot.slane %v9063_v53, 6  ;;  %v516_v63 = vrot.slane %v9064_v56, 6  ;;  %v9197_v0 = vld [vmem:[%s11813_s11 + $0x48] sm:$0x8]  ;;  %11536 = vmatprep.subr.msk.bf16.mxu1 %vm480_vm0, %v11782_v6 }
  0x29   : > { %10567 = vmatprep.mubr.msk.bf16.mxu1 %vm564_vm2, %v9216_v54  ;;  %v510_v1 = vsel %vm11816_vm5, %v508_v55, %v509_v45  ;;  %v9198_v3 = vld [vmem:[%s11813_s11 + $0x50] sm:$0x7]  ;;  %v9209_v4 = vrot.slane %v9197_v0, 11  ;;  %v1286_v5 = vrot.slane %v11933_v60, 7  ;;  %v9065_v18 = vld [vmem:[%s11813_s11 + $0x6c] sm:$0xc] }
  0x2a   : > { %v9085_v19 = vcombine.low %v507_v7, %v510_v1  ;;  %v1283_v20 = vsel %vm11852_vm6, %v1281_v62, %v1282_v52  ;;  %v514_v21 = vsel %vm11816_vm5, %v9078_v57, %v513_v10  ;;  %v515_v6 = vrot.slane %v513_v10, 4  ;;  %v9066_v22 = vld [vmem:[%s11813_s11 + $0x70] sm:$0xf]  ;;  %v9067_v23 = vld [vmem:[%s11813_s11 + $0x74] sm:$0x3] }
  0x2b   : > { %v9217_v28 = vcombine.low %v1280_v61, %v1283_v20  ;;  %v1287_v29 = vsel %vm11852_vm6, %v9209_v4, %v1286_v5  ;;  %v1288_v31 = vrot.slane %v1286_v5, 4  ;;  %v1289_v32 = vrot.slane %v9198_v3, 7  ;;  %v11955_v33 = vld [vmem:[%s11813_s11 + $0x58] sm:$0xf]  ;;  %v9199_v34 = vld [vmem:[%s11813_s11 + $0x54] sm:$0x8] }
  0x2c   : > { %10514 = vmatmul.mubr.msk.bf16.gmra.mrb[4].mxu0 %vm564_vm2, %v9085_v19  ;;  %v517_v35 = vsel %vm11816_vm5, %v515_v6, %v516_v63  ;;  %v9079_v36 = vrot.slane %v9065_v18, 10  ;;  %v520_v37 = vrot.slane %v9066_v22, 6  ;;  %v523_v38 = vrot.slane %v9067_v23, 6  ;;  %v9200_v39 = vld [vmem:[%s11813_s11 + $0x5c] sm:$0x7] }
  0x2d   : > { %v9086_v41 = vcombine.low %v514_v21, %v517_v35  ;;  %v1290_v42 = vsel %vm11852_vm6, %v1288_v31, %v1289_v32  ;;  %v9210_v43 = vrot.slane %v9199_v34, 11  ;;  %v1293_v45 = vrot.slane %v11955_v33, 7  ;;  %v9068_v46 = vld [vmem:[%s11813_s11 + $0x78] sm:$0xc]  ;;  %v9069_v47 = vld [vmem:[%s11813_s11 + $0x7c] sm:$0xf] }
  0x2e   : > { %10568 = vmatmul.mubr.msk.bf16.gmra.mrb[4].mxu1 %vm564_vm2, %v9217_v28  ;;  %v9218_v50 = vcombine.low %v1287_v29, %v1290_v42  ;;  %v521_v51 = vsel %vm11816_vm5, %v9079_v36, %v520_v37  ;;  %v522_v52 = vrot.slane %v520_v37, 4  ;;  %v1296_v11 = vrot.slane %v9200_v39, 7  ;;  %v9070_v53 = vld [vmem:[%s11813_s11 + $0x80] sm:$0x3]  ;;  %v11972_v54 = vld [vmem:[%s11813_s11 + $0x64] sm:$0xf] }
  0x2f   : > { %10517 = vmatprep.mubr.msk.bf16.mxu0 %vm564_vm2, %v9086_v41  ;;  %v1294_v7 = vsel %vm11852_vm6, %v9210_v43, %v1293_v45  ;;  %v1295_v55 = vrot.slane %v1293_v45, 4  ;;  %v9080_v56 = vrot.slane %v9068_v46, 10  ;;  %v527_v57 = vrot.slane %v9069_v47, 6  ;;  %v9201_v61 = vld [vmem:[%s11813_s11 + $0x60] sm:$0x8] }
  0x30   : > { %10571 = vmatprep.mubr.msk.bf16.mxu1 %vm564_vm2, %v9218_v50  ;;  %v524_v62 = vsel %vm11816_vm5, %v522_v52, %v523_v38  ;;  %v530_v10 = vrot.slane %v9070_v53, 6  ;;  %v9202_v63 = vld [vmem:[%s11813_s11 + $0x68] sm:$0x7]  ;;  %v9211_v0 = vrot.slane %v9201_v61, 11  ;;  %v1300_v1 = vrot.slane %v11972_v54, 7 }
  0x31   : > { %v9087_v3 = vcombine.low %v521_v51, %v524_v62  ;;  %v1297_v4 = vsel %vm11852_vm6, %v1295_v55, %v1296_v11  ;;  %v528_v5 = vsel %vm11816_vm5, %v9080_v56, %v527_v57  ;;  %v529_v18 = vrot.slane %v527_v57, 4  ;;  %v9071_v19 = vld [vmem:[%s11813_s11 + $0x84] sm:$0xc]  ;;  %v9072_v20 = vld [vmem:[%s11813_s11 + $0x88] sm:$0xf] }
  0x32   : > { %v9219_v21 = vcombine.low %v1294_v7, %v1297_v4  ;;  %v1301_v6 = vsel %vm11852_vm6, %v9211_v0, %v1300_v1  ;;  %v1302_v22 = vrot.slane %v1300_v1, 4  ;;  %v1303_v23 = vrot.slane %v9202_v63, 7  ;;  %v9073_v28 = vld [vmem:[%s11813_s11 + $0x8c] sm:$0x3]  ;;  %v11993_v29 = vld [vmem:[%s11813_s11 + $0x70] sm:$0xf] }
  0x33   : > { %v531_v31 = vsel %vm11816_vm5, %v529_v18, %v530_v10  ;;  %v9081_v32 = vrot.slane %v9071_v19, 10  ;;  %v534_v34 = vrot.slane %v9072_v20, 6  ;;  %v537_v35 = vrot.slane %v9073_v28, 6  ;;  %v9203_v36 = vld [vmem:[%s11813_s11 + $0x6c] sm:$0x8] }
  0x34   : > { %10518 = vmatmul.mubr.msk.bf16.gmra.mrb[8].mxu0 %vm564_vm2, %v9087_v3  ;;  %v9088_v37 = vcombine.low %v528_v5, %v531_v31  ;;  %v1304_v38 = vsel %vm11852_vm6, %v1302_v22, %v1303_v23  ;;  %v9204_v39 = vld [vmem:[%s11813_s11 + $0x74] sm:$0x7]  ;;  %v9212_v41 = vrot.slane %v9203_v36, 11  ;;  %v1307_v42 = vrot.slane %v11993_v29, 7  ;;  %v9132_v43 = vld [vmem:[%s11813_s11 + $0x18] sm:$0xc] }
  0x35   : > { %v9220_v45 = vcombine.low %v1301_v6, %v1304_v38  ;;  %v535_v46 = vsel %vm11816_vm5, %v9081_v32, %v534_v34  ;;  %v536_v47 = vrot.slane %v534_v34, 4  ;;  %v1310_v50 = vrot.slane %v9204_v39, 7  ;;  %v9133_v51 = vld [vmem:[%s11813_s11 + $0x20] sm:$0x3]  ;;  %v9230_v52 = vld [vmem:[%s11813_s11 + $0x30] sm:$0xe] }
  0x36   : > { %10572 = vmatmul.mubr.msk.bf16.gmra.mrb[8].mxu1 %vm564_vm2, %v9219_v21  ;;  %10521 = vmatprep.mubr.msk.bf16.mxu0 %vm564_vm2, %v9088_v37  ;;  %v1308_v11 = vsel %vm11852_vm6, %v9212_v41, %v1307_v42  ;;  %v1309_v53 = vrot.slane %v1307_v42, 4  ;;  %v9148_v7 = vrot.slane %v9132_v43, 10  ;;  %v871_v55 = vrot.slane %v869_v27, 4  ;;  %v12021_v57 = vld [vmem:[%s11813_s11 + $0x34] sm:$0xf] }
  0x37   : > { %10575 = vmatprep.mubr.msk.bf16.mxu1 %vm564_vm2, %v9220_v45  ;;  %v538_v61 = vsel %vm11816_vm5, %v536_v47, %v537_v35  ;;  %v872_v62 = vrot.slane %v9133_v51, 6  ;;  %v9232_v10 = vld [vmem:[%s11813_s11 + $0x38] sm:$0x1]  ;;  %v9254_v63 = vrot.slane %v9230_v52, 9  ;;  %v1528_v0 = vrot.slane %v12021_v57, 5 }
  0x38   : > { %v9089_v1 = vcombine.low %v535_v46, %v538_v61  ;;  %v1311_v3 = vsel %vm11852_vm6, %v1309_v53, %v1310_v50  ;;  %v870_v4 = vsel %vm11816_vm5, %v9148_v7, %v869_v27  ;;  %v1531_v5 = vrot.slane %v9232_v10, 5  ;;  %v9134_v18 = vld [vmem:[%s11813_s11 + $0x24] sm:$0xc]  ;;  %v9135_v19 = vld [vmem:[%s11813_s11 + $0x2c] sm:$0x3] }
  0x39   : > { %v9221_v20 = vcombine.low %v1308_v11, %v1311_v3  ;;  %v873_v21 = vsel %vm11816_vm5, %v871_v55, %v872_v62  ;;  %v1529_v6 = vsel %vm12016_vm9, %v9254_v63, %v1528_v0  ;;  %v1530_v22 = vrot.slane %v1528_v0, 4  ;;  %v9233_v23 = vld [vmem:[%s11813_s11 + $0x3c] sm:$0xe]  ;;  %v12042_v28 = vld [vmem:[%s11813_s11 + $0x40] sm:$0xf] }
  0x3a   : > { %v9157_v31 = vcombine.low %v870_v4, %v873_v21  ;;  %v9149_v27 = vrot.slane %v9134_v18, 10  ;;  %v879_v32 = vrot.slane %v9135_v19, 6  ;;  %v9235_v34 = vld [vmem:[%s11813_s11 + $0x44] sm:$0x1]  ;;  %v9255_v35 = vrot.slane %v9233_v23, 9 }
  0x3b   : > { %v1532_v36 = vsel %vm12016_vm9, %v1530_v22, %v1531_v5  ;;  %v1535_v37 = vrot.slane %v12042_v28, 5  ;;  %v1538_v38 = vrot.slane %v9235_v34, 5  ;;  %v9136_v39 = vld [vmem:[%s11813_s11 + $0x30] sm:$0xc]  ;;  %v9137_v41 = vld [vmem:[%s11813_s11 + $0x38] sm:$0x3] }
  0x3c   : > { %10522 = vmatmul.mubr.msk.bf16.gmra.mrb[12].mxu0 %vm564_vm2, %v9089_v1  ;;  %v9263_v42 = vcombine.low %v1529_v6, %v1532_v36  ;;  %v877_v43 = vsel %vm11816_vm5, %v9149_v27, %v876_v49  ;;  %v880_v45 = vsel %vm11816_vm5, %v11886_v59, %v879_v32  ;;  %v9150_v46 = vrot.slane %v9136_v39, 10  ;;  %v9236_v47 = vld [vmem:[%s11813_s11 + $0x48] sm:$0xe]  ;;  %v12060_v50 = vld [vmem:[%s11813_s11 + $0x4c] sm:$0xf] }
  0x3d   : > { %10527 = vmatprep.mubr.msk.bf16.mxu0 %vm564_vm2, %v9157_v31  ;;  %v9158_v51 = vcombine.low %v877_v43, %v880_v45  ;;  %v1536_v52 = vsel %vm12016_vm9, %v9255_v35, %v1535_v37  ;;  %v1537_v11 = vrot.slane %v1535_v37, 4  ;;  %v883_v49 = vrot.slane %v11893_v2, 6  ;;  %v9238_v53 = vld [vmem:[%s11813_s11 + $0x50] sm:$0x1]  ;;  %v9138_v7 = vld [vmem:[%s11813_s11 + $0x3c] sm:$0xc] }
  0x3e   : > { %10576 = vmatmul.mubr.msk.bf16.gmra.mrb[12].mxu1 %vm564_vm2, %v9221_v20  ;;  %v886_v59 = vrot.slane %v9137_v41, 6  ;;  %v9256_v55 = vrot.slane %v9236_v47, 9  ;;  %v1542_v61 = vrot.slane %v12060_v50, 5  ;;  %v1545_v62 = vrot.slane %v9238_v53, 5  ;;  %v9139_v10 = vld [vmem:[%s11813_s11 + $0x44] sm:$0x3] }
  0x3f   : > { %10581 = vmatprep.mubr.msk.bf16.mxu1 %vm564_vm2, %v9263_v42  ;;  %v1539_v63 = vsel %vm12016_vm9, %v1537_v11, %v1538_v38  ;;  %v884_v0 = vsel %vm11816_vm5, %v9150_v46, %v883_v49  ;;  %v885_v1 = vrot.slane %v883_v49, 4  ;;  %v9151_v3 = vrot.slane %v9138_v7, 10  ;;  %v9239_v4 = vld [vmem:[%s11813_s11 + $0x54] sm:$0xe]  ;;  %v12078_v5 = vld [vmem:[%s11813_s11 + $0x58] sm:$0xf] }
  0x40   : > { %v9264_v18 = vcombine.low %v1536_v52, %v1539_v63  ;;  %v1543_v19 = vsel %vm12016_vm9, %v9256_v55, %v1542_v61  ;;  %v1544_v20 = vrot.slane %v1542_v61, 4  ;;  %v890_v21 = vrot.slane %v11914_v40, 6  ;;  %v9241_v6 = vld [vmem:[%s11813_s11 + $0x5c] sm:$0x1]  ;;  %v9140_v22 = vld [vmem:[%s11813_s11 + $0x48] sm:$0xc] }
  0x41   : > { %v887_v23 = vsel %vm11816_vm5, %v885_v1, %v886_v59  ;;  %v893_v31 = vrot.slane %v9139_v10, 6  ;;  %v9257_v27 = vrot.slane %v9239_v4, 9  ;;  %v1549_v32 = vrot.slane %v12078_v5, 5  ;;  %v9141_v34 = vld [vmem:[%s11813_s11 + $0x50] sm:$0x3] }
  0x42   : > { %v9159_v35 = vcombine.low %v884_v0, %v887_v23  ;;  %v1546_v36 = vsel %vm12016_vm9, %v1544_v20, %v1545_v62  ;;  %v891_v37 = vsel %vm11816_vm5, %v9151_v3, %v890_v21  ;;  %v892_v38 = vrot.slane %v890_v21, 4  ;;  %v9242_v39 = vld [vmem:[%s11813_s11 + $0x60] sm:$0xe]  ;;  %v12095_v41 = vld [vmem:[%s11813_s11 + $0x64] sm:$0xf] }
  0x43   : > { %v9265_v42 = vcombine.low %v1543_v19, %v1546_v36  ;;  %v12099_v43 = vsel %vm12016_vm9, %v9257_v27, %v1549_v32  ;;  %v1551_v45 = vrot.slane %v1549_v32, 4  ;;  %v1552_v46 = vrot.slane %v9241_v6, 5  ;;  %v9244_v47 = vld [vmem:[%s11813_s11 + $0x68] sm:$0x1]  ;;  %v9142_v52 = vld [vmem:[%s11813_s11 + $0x54] sm:$0xc] }
  0x44   : > { %10528 = vmatmul.mubr.msk.bf16.vlgmr.msra.gmra.mrb[16].mxu0 %vm564_vm2, %v9158_v51  ;;  %v894_v11 = vsel %vm11816_vm5, %v892_v38, %v893_v31  ;;  %v9152_v49 = vrot.slane %v9140_v22, 10  ;;  %v897_v53 = vrot.slane %v11933_v60, 6  ;;  %v900_v7 = vrot.slane %v9141_v34, 6  ;;  %v9143_v59 = vld [vmem:[%s11813_s11 + $0x5c] sm:$0x3] }
  0x45   : > { %10531 = vmatprep.mubr.msk.bf16.mxu0 %vm564_vm2, %v9159_v35  ;;  %v9160_v55 = vcombine.low %v891_v37, %v894_v11  ;;  %v1553_v61 = vsel %vm12016_vm9, %v1551_v45, %v1552_v46  ;;  %v9258_v62 = vrot.slane %v9242_v39, 9  ;;  %v1556_v10 = vrot.slane %v12095_v41, 5  ;;  %v9245_v63 = vld [vmem:[%s11813_s11 + $0x6c] sm:$0xe]  ;;  %v12114_v51 = vld [vmem:[%s11813_s11 + $0x70] sm:$0xf]  ;;  %10544 = vmatpush3.bf16.msra.mxu0 %v11826_v15 }
  0x46   : > { %10582 = vmatmul.mubr.msk.bf16.vlgmr.msra.gmra.mrb[0].mxu1 %vm564_vm2, %v9264_v18  ;;  %v9266_v0 = vcombine.low %v12099_v43, %v1553_v61  ;;  %v898_v1 = vsel %vm11816_vm5, %v9152_v49, %v897_v53  ;;  %v899_v3 = vrot.slane %v897_v53, 4  ;;  %v1559_v4 = vrot.slane %v9244_v47, 5  ;;  %v9247_v19 = vld [vmem:[%s11813_s11 + $0x74] sm:$0x1]  ;;  %11541 = vmatprep.subr.msk.bf16.mxu0 %vm480_vm0, %v11797_v9  ;;  %v9144_v6 = vld [vmem:[%s11813_s11 + $0x60] sm:$0xc] }
  0x47   : > { %10598 = vmatpush3.bf16.msra.mxu1 %v11822_v14  ;;  %10585 = vmatprep.mubr.msk.bf16.mxu1 %vm564_vm2, %v9265_v42  ;;  %v1557_v15 = vsel %vm12016_vm9, %v9258_v62, %v1556_v10  ;;  %v1558_v18 = vrot.slane %v1556_v10, 4  ;;  %v9153_v20 = vrot.slane %v9142_v52, 10  ;;  %v904_v21 = vrot.slane %v11955_v33, 6  ;;  %v9145_v31 = vld [vmem:[%s11813_s11 + $0x68] sm:$0x3] }
  0x48   : > { %v901_v22 = vsel %vm11816_vm5, %v899_v3, %v900_v7  ;;  %v907_v23 = vrot.slane %v9143_v59, 6  ;;  %v9259_v9 = vrot.slane %v9245_v63, 9  ;;  %v1563_v14 = vrot.slane %v12114_v51, 5  ;;  %11537 = vmatprep.subr.msk.bf16.mxu1 %vm480_vm0, %v11792_v8  ;;  %v9248_v36 = vld [vmem:[%s11813_s11 + $0x78] sm:$0xe] }
  0x49   : > { %v9161_v27 = vcombine.low %v898_v1, %v901_v22  ;;  %v1560_v32 = vsel %vm12016_vm9, %v1558_v18, %v1559_v4  ;;  %v12140_v34 = vsel %vm11816_vm5, %v9153_v20, %v904_v21  ;;  %v906_v35 = vrot.slane %v904_v21, 4  ;;  %v12144_v37 = vld [vmem:[%s11813_s11 + $0x7c] sm:$0xf]  ;;  %v9250_v43 = vld [vmem:[%s11813_s11 + $0x80] sm:$0x1] }
  0x4a   : > { %v9267_v38 = vcombine.low %v1557_v15, %v1560_v32  ;;  %v12148_v39 = vsel %vm12016_vm9, %v9259_v9, %v1563_v14  ;;  %v1565_v8 = vrot.slane %v1563_v14, 4  ;;  %v1566_v42 = vrot.slane %v9247_v19, 5  ;;  %v9146_v45 = vld [vmem:[%s11813_s11 + $0x6c] sm:$0xc]  ;;  %v9147_v49 = vld [vmem:[%s11813_s11 + $0x74] sm:$0x3] }
  0x4b   : > { %v908_v46 = vsel %vm11816_vm5, %v906_v35, %v907_v23  ;;  %v9154_v47 = vrot.slane %v9144_v6, 10  ;;  %v911_v52 = vrot.slane %v11972_v54, 6  ;;  %v914_v11 = vrot.slane %v9145_v31, 6  ;;  %v9251_v62 = vld [vmem:[%s11813_s11 + $0x84] sm:$0xe] }
  0x4c   : > { %10532 = vmatmul.mubr.msk.bf16.gmra.mrb[20].mxu0 %vm564_vm2, %v9160_v55  ;;  %v9162_v53 = vcombine.low %v12140_v34, %v908_v46  ;;  %v1567_v7 = vsel %vm12016_vm9, %v1565_v8, %v1566_v42  ;;  %v9260_v59 = vrot.slane %v9248_v36, 9  ;;  %v1570_v61 = vrot.slane %v12144_v37, 5  ;;  %v12163_v10 = vld [vmem:[%s11813_s11 + $0x88] sm:$0xf]  ;;  %v9253_v4 = vld [vmem:[%s11813_s11 + $0x8c] sm:$0x1] }
  0x4d   : > { %10535 = vmatprep.mubr.msk.bf16.mxu0 %vm564_vm2, %v9161_v27  ;;  %v9268_v63 = vcombine.low %v12148_v39, %v1567_v7  ;;  %v912_v55 = vsel %vm11816_vm5, %v9154_v47, %v911_v52  ;;  %v913_v1 = vrot.slane %v911_v52, 4  ;;  %v1573_v3 = vrot.slane %v9250_v43, 5  ;;  %v9100_v21 = vld [vmem:[%s11813_s11 + $0x18] sm:$0xe]  ;;  %v9102_v9 = vld [vmem:[%s11813_s11 + $0x20] sm:$0x1] }
  0x4e   : > { %10586 = vmatmul.mubr.msk.bf16.gmra.mrb[4].mxu1 %vm564_vm2, %v9266_v0  ;;  %v1571_v19 = vsel %vm12016_vm9, %v9260_v59, %v1570_v61  ;;  %v1572_v15 = vrot.slane %v1570_v61, 4  ;;  %v9155_v18 = vrot.slane %v9146_v45, 10  ;;  %v918_v20 = vrot.slane %v11993_v29, 6  ;;  %v9279_v34 = vld [vmem:[%s11813_s11 + $0x30] sm:$0xc] }
  0x4f   : > { %10589 = vmatprep.mubr.msk.bf16.mxu1 %vm564_vm2, %v9267_v38  ;;  %v915_v6 = vsel %vm11816_vm5, %v913_v1, %v914_v11  ;;  %v921_v22 = vrot.slane %v9147_v49, 6  ;;  %v9261_v23 = vrot.slane %v9251_v62, 9  ;;  %v1577_v0 = vrot.slane %v12163_v10, 5  ;;  %v9280_v8 = vld [vmem:[%s11813_s11 + $0x38] sm:$0x3] }
  0x50   : > { %v9163_v14 = vcombine.low %v912_v55, %v915_v6  ;;  %v1574_v31 = vsel %vm12016_vm9, %v1572_v15, %v1573_v3  ;;  %v12184_v27 = vsel %vm11816_vm5, %v9155_v18, %v918_v20  ;;  %v920_v32 = vrot.slane %v918_v20, 4  ;;  %v9103_v42 = vld [vmem:[%s11813_s11 + $0x24] sm:$0xe]  ;;  %v9105_v52 = vld [vmem:[%s11813_s11 + $0x2c] sm:$0x1] }
  0x51   : > { %v9269_v35 = vcombine.low %v1571_v19, %v1574_v31  ;;  %v12189_v36 = vsel %vm12016_vm9, %v9261_v23, %v1577_v0  ;;  %v1579_v38 = vrot.slane %v1577_v0, 4  ;;  %v1580_v39 = vrot.slane %v9253_v4, 5  ;;  %v9281_v61 = vld [vmem:[%s11813_s11 + $0x3c] sm:$0xc]  ;;  %v9282_v62 = vld [vmem:[%s11813_s11 + $0x44] sm:$0x3] }
  0x52   : > { %v922_v43 = vsel %vm11816_vm5, %v920_v32, %v921_v22  ;;  %v9124_v45 = vrot.slane %v9100_v21, 9  ;;  %v782_v46 = vrot.slane %v780_v26, 4  ;;  %v783_v47 = vrot.slane %v9102_v9, 5  ;;  %v9106_v19 = vld [vmem:[%s11813_s11 + $0x30] sm:$0xe] }
  0x53   : > { %v9164_v11 = vcombine.low %v12184_v27, %v922_v43  ;;  %v12201_v49 = vsel %vm12016_vm9, %v1579_v38, %v1580_v39  ;;  %v9295_v7 = vrot.slane %v9279_v34, 10  ;;  %v1782_v59 = vrot.slane %v12021_v57, 6  ;;  %v9108_v22 = vld [vmem:[%s11813_s11 + $0x38] sm:$0x1]  ;;  %v9284_v31 = vld [vmem:[%s11813_s11 + $0x50] sm:$0x3] }
  0x54   : > { %10536 = vmatmul.mubr.msk.bf16.gmra.mrb[24].mxu0 %vm564_vm2, %v9162_v53  ;;  %v9270_v55 = vcombine.low %v12189_v36, %v12201_v49  ;;  %v781_v1 = vsel %vm12016_vm9, %v9124_v45, %v780_v26  ;;  %v784_v3 = vsel %vm12016_vm9, %v782_v46, %v783_v47  ;;  %v1785_v4 = vrot.slane %v9280_v8, 6  ;;  %v9111_v39 = vld [vmem:[%s11813_s11 + $0x44] sm:$0x1]  ;;  %v9285_v45 = vld [vmem:[%s11813_s11 + $0x54] sm:$0xc] }
  0x55   : > { %10539 = vmatprep.mubr.msk.bf16.mxu0 %vm564_vm2, %v9163_v14  ;;  %v9173_v15 = vcombine.low %v781_v1, %v784_v3  ;;  %v1783_v53 = vsel %vm11816_vm5, %v9295_v7, %v1782_v59  ;;  %v1784_v18 = vrot.slane %v1782_v59, 4  ;;  %v9125_v20 = vrot.slane %v9103_v42, 9  ;;  %v9283_v14 = vld [vmem:[%s11813_s11 + $0x48] sm:$0xc]  ;;  %v9286_v7 = vld [vmem:[%s11813_s11 + $0x5c] sm:$0x3] }
  0x56   : > { %10590 = vmatmul.mubr.msk.bf16.gmra.mrb[8].mxu1 %vm564_vm2, %v9268_v63  ;;  %v790_v24 = vrot.slane %v9105_v52, 5  ;;  %v9296_v26 = vrot.slane %v9281_v61, 10  ;;  %v1789_v21 = vrot.slane %v12042_v28, 6  ;;  %v1792_v6 = vrot.slane %v9282_v62, 6  ;;  %v9112_v59 = vld [vmem:[%s11813_s11 + $0x48] sm:$0xe] }
  0x57   : > { %10593 = vmatprep.mubr.msk.bf16.mxu1 %vm564_vm2, %v9269_v35  ;;  %v1786_v23 = vsel %vm11816_vm5, %v1784_v18, %v1785_v4  ;;  %v12229_v0 = vsel %vm12016_vm9, %v9125_v20, %v787_v48  ;;  %v9126_v63 = vrot.slane %v9106_v19, 9  ;;  %v794_v9 = vrot.slane %v11893_v2, 5  ;;  %v9109_v48 = vld [vmem:[%s11813_s11 + $0x3c] sm:$0xe]  ;;  %v9114_v4 = vld [vmem:[%s11813_s11 + $0x50] sm:$0x1] }
  0x58   : > { %v9304_v27 = vcombine.low %v1783_v53, %v1786_v23  ;;  %v12237_v32 = vsel %vm12016_vm9, %v11882_v58, %v790_v24  ;;  %v12241_v34 = vsel %vm11816_vm5, %v9296_v26, %v1789_v21  ;;  %v1791_v44 = vrot.slane %v1789_v21, 4  ;;  %v9287_v18 = vld [vmem:[%s11813_s11 + $0x60] sm:$0xc]  ;;  %v9288_v21 = vld [vmem:[%s11813_s11 + $0x68] sm:$0x3] }
  0x59   : > { %v9174_v2 = vcombine.low %v12229_v0, %v12237_v32  ;;  %v12248_v35 = vsel %vm12016_vm9, %v9126_v63, %v794_v9  ;;  %v796_v36 = vrot.slane %v794_v9, 4  ;;  %v797_v38 = vrot.slane %v9108_v22, 5  ;;  %v9115_v0 = vld [vmem:[%s11813_s11 + $0x54] sm:$0xe]  ;;  %v10122_v13 = vld [vmem:[%s11813_s11 + $0x8c] sm:$0xf] }
  0x5a   : > { %v12253_v58 = vsel %vm11816_vm5, %v1791_v44, %v1792_v6  ;;  %v9297_v8 = vrot.slane %v9283_v14, 10  ;;  %v1796_v42 = vrot.slane %v12060_v50, 6  ;;  %v1799_v43 = vrot.slane %v9284_v31, 6  ;;  %v9117_v31 = vld [vmem:[%s11813_s11 + $0x5c] sm:$0x1] }
  0x5b   : > { %v9305_v46 = vcombine.low %v12241_v34, %v12253_v58  ;;  %v798_v47 = vsel %vm12016_vm9, %v796_v36, %v797_v38  ;;  %v9127_v52 = vrot.slane %v9109_v48, 9  ;;  %v801_v49 = vrot.slane %v11914_v40, 5 }
  0x5c   : > { %10540 = vmatmul.mubr.msk.bf16.gmra.mrb[28].mxu0 %vm564_vm2, %v9164_v11  ;;  %v9175_v61 = vcombine.low %v12248_v35, %v798_v47  ;;  %v12268_v62 = vsel %vm11816_vm5, %v9297_v8, %v1796_v42  ;;  %v1798_v1 = vrot.slane %v1796_v42, 4  ;;  %v804_v3 = vrot.slane %v9111_v39, 5  ;;  %v9289_v35 = vld [vmem:[%s11813_s11 + $0x6c] sm:$0xc]  ;;  %v9290_v42 = vld [vmem:[%s11813_s11 + $0x74] sm:$0x3] }
  0x5d   : > { %10545 = vmatprep.mubr.msk.bf16.mxu0 %vm564_vm2, %v9173_v15  ;;  %v12274_v19 = vsel %vm12016_vm9, %v9127_v52, %v801_v49  ;;  %v803_v40 = vrot.slane %v801_v49, 4  ;;  %v9298_v53 = vrot.slane %v9285_v45, 10  ;;  %v1803_v11 = vrot.slane %v12078_v5, 6 }
  0x5e   : > { %10594 = vmatmul.mubr.msk.bf16.gmra.mrb[12].mxu1 %vm564_vm2, %v9270_v55  ;;  %v1800_v20 = vsel %vm11816_vm5, %v1798_v1, %v1799_v43  ;;  %v1806_v24 = vrot.slane %v9286_v7, 6  ;;  %v9128_v26 = vrot.slane %v9112_v59, 9  ;;  %v808_v15 = vrot.slane %v11933_v60, 5  ;;  %v9118_v43 = vld [vmem:[%s11813_s11 + $0x60] sm:$0xe] }
  0x5f   : > { %10599 = vmatprep.mubr.msk.bf16.mxu1 %vm564_vm2, %v9304_v27  ;;  %v9306_v6 = vcombine.low %v12268_v62, %v1800_v20  ;;  %v12287_v22 = vsel %vm12016_vm9, %v803_v40, %v804_v3  ;;  %v12291_v55 = vsel %vm11816_vm5, %v9298_v53, %v1803_v11  ;;  %v1805_v23 = vrot.slane %v1803_v11, 4  ;;  %v9120_v7 = vld [vmem:[%s11813_s11 + $0x68] sm:$0x1]  ;;  %v9291_v3 = vld [vmem:[%s11813_s11 + $0x78] sm:$0xc] }
  0x60   : > { %v9176_v60 = vcombine.low %v12274_v19, %v12287_v22  ;;  %v12298_v63 = vsel %vm12016_vm9, %v9128_v26, %v808_v15  ;;  %v810_v9 = vrot.slane %v808_v15, 4  ;;  %v811_v14 = vrot.slane %v9114_v4, 5  ;;  %v9292_v11 = vld [vmem:[%s11813_s11 + $0x80] sm:$0x3]  ;;  %v9123_v26 = vld [vmem:[%s11813_s11 + $0x74] sm:$0x1] }
  0x61   : > { %v12303_v27 = vsel %vm11816_vm5, %v1805_v23, %v1806_v24  ;;  %v9299_v32 = vrot.slane %v9287_v18, 10  ;;  %v1810_v44 = vrot.slane %v12095_v41, 6  ;;  %v1813_v48 = vrot.slane %v9288_v21, 6  ;;  %v9121_v24 = vld [vmem:[%s11813_s11 + $0x6c] sm:$0xe] }
  0x62   : > { %v9307_v36 = vcombine.low %v12291_v55, %v12303_v27  ;;  %v12311_v38 = vsel %vm12016_vm9, %v810_v9, %v811_v14  ;;  %v9129_v39 = vrot.slane %v9115_v0, 9  ;;  %v815_v8 = vrot.slane %v11955_v33, 5  ;;  %v9293_v23 = vld [vmem:[%s11813_s11 + $0x84] sm:$0xc] }
  0x63   : > { %v9177_v45 = vcombine.low %v12298_v63, %v12311_v38  ;;  %v12320_v47 = vsel %vm11816_vm5, %v9299_v32, %v1810_v44  ;;  %v1812_v52 = vrot.slane %v1810_v44, 4  ;;  %v818_v49 = vrot.slane %v9117_v31, 5  ;;  %v9294_v31 = vld [vmem:[%s11813_s11 + $0x8c] sm:$0x3]  ;;  %v9320_v32 = vld [vmem:[%s11813_s11 + $0x30] sm:$0x8] }
  0x64   : > { %10546 = vmatmul.mubr.msk.bf16.vlgmr.msra.gmra.mrb[16].mxu0 %vm564_vm2, %v9174_v2  ;;  %v12326_v59 = vsel %vm12016_vm9, %v9129_v39, %v815_v8  ;;  %v817_v33 = vrot.slane %v815_v8, 4  ;;  %v9300_v62 = vrot.slane %v9289_v35, 10  ;;  %v1817_v1 = vrot.slane %v12114_v51, 6  ;;  %v9321_v38 = vld [vmem:[%s11813_s11 + $0x38] sm:$0x7] }
  0x65   : > { %10549 = vmatprep.mubr.msk.bf16.mxu0 %vm564_vm2, %v9175_v61  ;;  %v1814_v4 = vsel %vm11816_vm5, %v1812_v52, %v1813_v48  ;;  %v1820_v40 = vrot.slane %v9290_v42, 6  ;;  %v9130_v53 = vrot.slane %v9118_v43, 9  ;;  %v822_v2 = vrot.slane %v11972_v54, 5  ;;  %10688 = vmatpush3.bf16.msra.mxu0 %v11834_v17  ;;  %v12384_v39 = vld [vmem:[%s11813_s11 + $0x10] sm:$0xf] }
  0x66   : > { %10600 = vmatmul.mubr.msk.bf16.vlgmr.msra.gmra.mrb[0].mxu1 %vm564_vm2, %v9305_v46  ;;  %v9308_v18 = vcombine.low %v12320_v47, %v1814_v4  ;;  %v12343_v61 = vsel %vm12016_vm9, %v817_v33, %v818_v49  ;;  %v12347_v20 = vsel %vm11816_vm5, %v9300_v62, %v1817_v1  ;;  %v1819_v54 = vrot.slane %v1817_v1, 4  ;;  %v9521_v47 = vld [vmem:[%s11813_s11 + $0xc] sm:$0xc]  ;;  %v9522_v62 = vld [vmem:[%s11813_s11 + $0x14] sm:$0x3] }
  0x67   : > { %10616 = vmatpush3.bf16.msra.mxu1 %v11830_v16  ;;  %10603 = vmatprep.mubr.msk.bf16.mxu1 %vm564_vm2, %v9306_v6  ;;  %v9178_v17 = vcombine.low %v12326_v59, %v12343_v61  ;;  %v12356_v34 = vsel %vm12016_vm9, %v9130_v53, %v822_v2  ;;  %v824_v58 = vrot.slane %v822_v2, 4  ;;  %v825_v46 = vrot.slane %v9120_v7, 5  ;;  %v9323_v53 = vld [vmem:[%s11813_s11 + $0x44] sm:$0x7]  ;;  %v12426_v2 = vld [vmem:[%s11813_s11 + $0x1c] sm:$0xf] }
  0x68   : > { %v12361_v15 = vsel %vm11816_vm5, %v1819_v54, %v1820_v40  ;;  %v9301_v16 = vrot.slane %v9291_v3, 10  ;;  %v1824_v21 = vrot.slane %v12144_v37, 6  ;;  %v1827_v6 = vrot.slane %v9292_v11, 6  ;;  %11538 = vmatprep.subr.msk.bf16.mxu1 %vm480_vm0, %v11811_v12  ;;  %v9322_v3 = vld [vmem:[%s11813_s11 + $0x3c] sm:$0x8] }
  0x69   : > { %v9309_v0 = vcombine.low %v12347_v20, %v12361_v15  ;;  %v12371_v63 = vsel %vm12016_vm9, %v824_v58, %v825_v46  ;;  %v9131_v9 = vrot.slane %v9121_v24, 9  ;;  %v829_v14 = vrot.slane %v11993_v29, 5  ;;  %v9523_v54 = vld [vmem:[%s11813_s11 + $0x18] sm:$0xc] }
  0x6a   : > { %v9179_v44 = vcombine.low %v12356_v34, %v12371_v63  ;;  %v12380_v12 = vsel %vm11816_vm5, %v9301_v16, %v1824_v21  ;;  %v1826_v48 = vrot.slane %v1824_v21, 4  ;;  %v832_v35 = vrot.slane %v9123_v26, 5  ;;  %v9524_v26 = vld [vmem:[%s11813_s11 + $0x20] sm:$0x3]  ;;  %v9324_v16 = vld [vmem:[%s11813_s11 + $0x48] sm:$0x8] }
  0x6b   : > { %v12388_v8 = vsel %vm12016_vm9, %v9131_v9, %v829_v14  ;;  %v831_v29 = vrot.slane %v829_v14, 4  ;;  %v9302_v42 = vrot.slane %v9293_v23, 10  ;;  %v1831_v43 = vrot.slane %v12163_v10, 6  ;;  %v9325_v14 = vld [vmem:[%s11813_s11 + $0x50] sm:$0x7] }
  0x6c   : > { %10550 = vmatmul.mubr.msk.bf16.gmra.mrb[20].mxu0 %vm564_vm2, %v9176_v60  ;;  %v12398_v52 = vsel %vm11816_vm5, %v1826_v48, %v1827_v6  ;;  %v1834_v49 = vrot.slane %v9294_v31, 6  ;;  %v9336_v7 = vrot.slane %v9320_v32, 11  ;;  %v2036_v33 = vrot.slane %v12021_v57, 7  ;;  %v12452_v31 = vld [vmem:[%s11813_s11 + $0x28] sm:$0xf] }
  0x6d   : > { %10553 = vmatprep.mubr.msk.bf16.mxu0 %vm564_vm2, %v9177_v45  ;;  %v9310_v1 = vcombine.low %v12380_v12, %v12398_v52  ;;  %v12407_v19 = vsel %vm12016_vm9, %v831_v29, %v832_v35  ;;  %v12411_v22 = vsel %vm11816_vm5, %v9302_v42, %v1831_v43  ;;  %v1833_v60 = vrot.slane %v1831_v43, 4  ;;  %v9525_v35 = vld [vmem:[%s11813_s11 + $0x24] sm:$0xc] }
  0x6e   : > { %10604 = vmatmul.mubr.msk.bf16.gmra.mrb[4].mxu1 %vm564_vm2, %v9307_v36  ;;  %v9180_v57 = vcombine.low %v12388_v8, %v12407_v19  ;;  %v12422_v45 = vsel %vm11852_vm6, %v9336_v7, %v2036_v33  ;;  %v2038_v4 = vrot.slane %v2036_v33, 4  ;;  %v2039_v40 = vrot.slane %v9321_v38, 7 }
  0x6f   : > { %10607 = vmatprep.mubr.msk.bf16.mxu1 %vm564_vm2, %v9308_v18  ;;  %v12431_v55 = vsel %vm11816_vm5, %v1833_v60, %v1834_v49  ;;  %v9537_v27 = vrot.slane %v9521_v47, 10  ;;  %v3354_v36 = vrot.slane %v12384_v39, 6  ;;  %v3357_v11 = vrot.slane %v9522_v62, 6  ;;  %v9526_v47 = vld [vmem:[%s11813_s11 + $0x2c] sm:$0x3] }
  0x70   : > { %v9311_v24 = vcombine.low %v12411_v22, %v12431_v55  ;;  %v12439_v58 = vsel %vm11852_vm6, %v2038_v4, %v2039_v40  ;;  %v9337_v18 = vrot.slane %v9322_v3, 11  ;;  %v2043_v46 = vrot.slane %v12042_v28, 7  ;;  %v9326_v62 = vld [vmem:[%s11813_s11 + $0x54] sm:$0x8]  ;;  %v9527_v4 = vld [vmem:[%s11813_s11 + $0x30] sm:$0xc] }
  0x71   : > { %v9345_v21 = vcombine.low %v12422_v45, %v12439_v58  ;;  %v12448_v6 = vsel %vm11816_vm5, %v9537_v27, %v3354_v36  ;;  %v3356_v23 = vrot.slane %v3354_v36, 4  ;;  %v2046_v9 = vrot.slane %v9323_v53, 7  ;;  %v12490_v3 = vld [vmem:[%s11813_s11 + $0x34] sm:$0xf]  ;;  %v9528_v53 = vld [vmem:[%s11813_s11 + $0x38] sm:$0x3] }
  0x72   : > { %v12456_v32 = vsel %vm11852_vm6, %v9337_v18, %v2043_v46  ;;  %v2045_v28 = vrot.slane %v2043_v46, 4  ;;  %v9538_v12 = vrot.slane %v9523_v54, 10  ;;  %v3361_v48 = vrot.slane %v12426_v2, 6  ;;  %v9328_v36 = vld [vmem:[%s11813_s11 + $0x60] sm:$0x8] }
  0x73   : > { %v3358_v38 = vsel %vm11816_vm5, %v3356_v23, %v3357_v11  ;;  %v3364_v29 = vrot.slane %v9524_v26, 6  ;;  %v9338_v42 = vrot.slane %v9324_v16, 11  ;;  %v2050_v43 = vrot.slane %v12060_v50, 7  ;;  %v9327_v50 = vld [vmem:[%s11813_s11 + $0x5c] sm:$0x7] }
  0x74   : > { %10554 = vmatmul.mubr.msk.bf16.gmra.mrb[24].mxu0 %vm564_vm2, %v9178_v17  ;;  %v9546_v52 = vcombine.low %v12448_v6, %v3358_v38  ;;  %v12471_v49 = vsel %vm11852_vm6, %v2045_v28, %v2046_v9  ;;  %v12475_v7 = vsel %vm11816_vm5, %v9538_v12, %v3361_v48  ;;  %v3363_v33 = vrot.slane %v3361_v48, 4  ;;  %v9329_v11 = vld [vmem:[%s11813_s11 + $0x68] sm:$0x7]  ;;  %v12520_v26 = vld [vmem:[%s11813_s11 + $0x40] sm:$0xf] }
  0x75   : > { %10557 = vmatprep.mubr.msk.bf16.mxu0 %vm564_vm2, %v9179_v44  ;;  %v9346_v59 = vcombine.low %v12456_v32, %v12471_v49  ;;  %v12487_v61 = vsel %vm11852_vm6, %v9338_v42, %v2050_v43  ;;  %v2052_v17 = vrot.slane %v2050_v43, 4  ;;  %v2053_v60 = vrot.slane %v9325_v14, 7  ;;  %v9529_v16 = vld [vmem:[%s11813_s11 + $0x3c] sm:$0xc]  ;;  %v9530_v14 = vld [vmem:[%s11813_s11 + $0x44] sm:$0x3] }
  0x76   : > { %10608 = vmatmul.mubr.msk.bf16.gmra.mrb[8].mxu1 %vm564_vm2, %v9309_v0  ;;  %v12499_v34 = vsel %vm11816_vm5, %v3363_v33, %v3364_v29  ;;  %v9539_v63 = vrot.slane %v9525_v35, 10  ;;  %v3368_v44 = vrot.slane %v12452_v31, 6  ;;  %v3371_v40 = vrot.slane %v9526_v47, 6  ;;  %v12537_v38 = vld [vmem:[%s15017_s2 + $0x12] sm:$0x3] }
  0x77   : > { %10611 = vmatprep.mubr.msk.bf16.mxu1 %vm564_vm2, %v9310_v1  ;;  %v9547_v27 = vcombine.low %v12475_v7, %v12499_v34  ;;  %v12508_v20 = vsel %vm11852_vm6, %v2052_v17, %v2053_v60  ;;  %v9339_v15 = vrot.slane %v9326_v62, 11  ;;  %v2057_v0 = vrot.slane %v12078_v5, 7  ;;  %v9330_v33 = vld [vmem:[%s11813_s11 + $0x6c] sm:$0x8]  ;;  %11542 = vmatprep.subr.msk.bf16.mxu0 %vm480_vm0, %v12537_v38  ;;  %v9331_v60 = vld [vmem:[%s11813_s11 + $0x74] sm:$0x7] }
  0x78   : > { %v9347_v54 = vcombine.low %v12487_v61, %v12508_v20  ;;  %v12517_v18 = vsel %vm11816_vm5, %v9539_v63, %v3368_v44  ;;  %v3370_v1 = vrot.slane %v3368_v44, 4  ;;  %v2060_v46 = vrot.slane %v9327_v50, 7  ;;  %v9531_v44 = vld [vmem:[%s11813_s11 + $0x48] sm:$0xc] }
  0x79   : > { %v12525_v6 = vsel %vm11852_vm6, %v9339_v15, %v2057_v0  ;;  %v2059_v5 = vrot.slane %v2057_v0, 4  ;;  %v9540_v23 = vrot.slane %v9527_v4, 10  ;;  %v3375_v9 = vrot.slane %v12490_v3, 6  ;;  %v12564_v4 = vld [vmem:[%s11813_s11 + $0x4c] sm:$0xf] }
  0x7a   : > { %v12531_v28 = vsel %vm11816_vm5, %v3370_v1, %v3371_v40  ;;  %v3378_v12 = vrot.slane %v9528_v53, 6  ;;  %v9340_v48 = vrot.slane %v9328_v36, 11  ;;  %v2064_v35 = vrot.slane %v12095_v41, 7  ;;  %v9532_v0 = vld [vmem:[%s11813_s11 + $0x50] sm:$0x3] }
  0x7b   : > { %v9548_v29 = vcombine.low %v12517_v18, %v12531_v28  ;;  %v12543_v42 = vsel %vm11852_vm6, %v2059_v5, %v2060_v46  ;;  %v12547_v43 = vsel %vm11816_vm5, %v9540_v23, %v3375_v9  ;;  %v3377_v47 = vrot.slane %v3375_v9, 4  ;;  %v9332_v36 = vld [vmem:[%s11813_s11 + $0x78] sm:$0x8]  ;;  %v9333_v18 = vld [vmem:[%s11813_s11 + $0x80] sm:$0x7] }
  0x7c   : > { %10558 = vmatmul.mubr.msk.bf16.gmra.mrb[28].mxu0 %vm564_vm2, %v9180_v57  ;;  %v9348_v41 = vcombine.low %v12525_v6, %v12543_v42  ;;  %v12560_v62 = vsel %vm11852_vm6, %v9340_v48, %v2064_v35  ;;  %v2066_v50 = vrot.slane %v2064_v35, 4  ;;  %v2067_v17 = vrot.slane %v9329_v11, 7  ;;  %v9533_v46 = vld [vmem:[%s11813_s11 + $0x54] sm:$0xc] }
  0x7d   : > { %10689 = vmatprep.mubr.msk.bf16.mxu0 %vm564_vm2, %v9546_v52  ;;  %v12569_v8 = vsel %vm11816_vm5, %v3377_v47, %v3378_v12  ;;  %v9541_v19 = vrot.slane %v9529_v16, 10  ;;  %v3382_v57 = vrot.slane %v12520_v26, 6  ;;  %v3385_v63 = vrot.slane %v9530_v14, 6  ;;  %v9534_v14 = vld [vmem:[%s11813_s11 + $0x5c] sm:$0x3] }
  0x7e   : > { %10612 = vmatmul.mubr.msk.bf16.gmra.mrb[12].mxu1 %vm564_vm2, %v9311_v24  ;;  %v9549_v40 = vcombine.low %v12547_v43, %v12569_v8  ;;  %v12581_v52 = vsel %vm11852_vm6, %v2066_v50, %v2067_v17  ;;  %v9341_v53 = vrot.slane %v9330_v33, 11  ;;  %v2071_v15 = vrot.slane %v12114_v51, 7  ;;  %v12598_v51 = vld [vmem:[%s11813_s11 + $0x58] sm:$0xf]  ;;  %v9334_v47 = vld [vmem:[%s11813_s11 + $0x84] sm:$0x8] }
  0x7f   : > { %10617 = vmatprep.mubr.msk.bf16.mxu1 %vm564_vm2, %v9345_v21  ;;  %v9349_v22 = vcombine.low %v12560_v62, %v12581_v52  ;;  %v12594_v55 = vsel %vm11816_vm5, %v9541_v19, %v3382_v57  ;;  %v3384_v24 = vrot.slane %v3382_v57, 4  ;;  %v2074_v11 = vrot.slane %v9331_v60, 7  ;;  %v9335_v33 = vld [vmem:[%s11813_s11 + $0x8c] sm:$0x7]  ;;  %v12631_v19 = vld [vmem:[%s11813_s11 + $0x64] sm:$0xf] }
  0x80   : > { %v12602_v45 = vsel %vm11852_vm6, %v9341_v53, %v2071_v15  ;;  %v2073_v58 = vrot.slane %v2071_v15, 4  ;;  %v9542_v21 = vrot.slane %v9531_v44, 10  ;;  %v3389_v1 = vrot.slane %v12564_v4, 6  ;;  %v9535_v57 = vld [vmem:[%s11813_s11 + $0x60] sm:$0xc] }
  0x81   : > { %v12608_v16 = vsel %vm11816_vm5, %v3384_v24, %v3385_v63  ;;  %v3392_v5 = vrot.slane %v9532_v0, 6  ;;  %v9342_v23 = vrot.slane %v9332_v36, 11  ;;  %v2078_v9 = vrot.slane %v12144_v37, 7  ;;  %v9536_v0 = vld [vmem:[%s11813_s11 + $0x68] sm:$0x3] }
  0x82   : > { %v9550_v28 = vcombine.low %v12594_v55, %v12608_v16  ;;  %v12616_v12 = vsel %vm11852_vm6, %v2073_v58, %v2074_v11  ;;  %v12620_v48 = vsel %vm11816_vm5, %v9542_v21, %v3389_v1  ;;  %v3391_v35 = vrot.slane %v3389_v1, 4  ;;  %v9363_v24 = vld [vmem:[%s11813_s11 + $0x48] sm:$0xe]  ;;  %v12656_v11 = vld [vmem:[%s15017_s2 + $0xe] sm:$0x3] }
  0x83   : > { %v9350_v50 = vcombine.low %v12602_v45, %v12616_v12  ;;  %v12628_v37 = vsel %vm11852_vm6, %v9342_v23, %v2078_v9  ;;  %v2080_v17 = vrot.slane %v2078_v9, 4  ;;  %v2081_v60 = vrot.slane %v9333_v18, 7  ;;  %v12669_v21 = vld [vmem:[%s11813_s11 + $0x4c] sm:$0xf] }
  0x84   : > { %10690 = vmatmul.mubr.msk.bf16.vlgmr.msra.gmra.mrb[32].mxu0 %vm564_vm2, %v9547_v27  ;;  %v12640_v63 = vsel %vm11816_vm5, %v3391_v35, %v3392_v5  ;;  %v9543_v44 = vrot.slane %v9533_v46, 10  ;;  %v3396_v53 = vrot.slane %v12598_v51, 6  ;;  %v3399_v15 = vrot.slane %v9534_v14, 6  ;;  %v9365_v46 = vld [vmem:[%s11813_s11 + $0x50] sm:$0x1] }
  0x85   : > { %10693 = vmatprep.mubr.msk.bf16.mxu0 %vm564_vm2, %v9548_v29  ;;  %v9551_v36 = vcombine.low %v12620_v48, %v12640_v63  ;;  %v12649_v7 = vsel %vm11852_vm6, %v2080_v17, %v2081_v60  ;;  %v9343_v34 = vrot.slane %v9334_v47, 11  ;;  %v2085_v27 = vrot.slane %v12163_v10, 7  ;;  %v9366_v60 = vld [vmem:[%s11813_s11 + $0x54] sm:$0xe] }
  0x86   : > { %10618 = vmatmul.mubr.msk.bf16.vlgmr.msra.gmra.mrb[0].mxu1 %vm564_vm2, %v9346_v59  ;;  %v9351_v29 = vcombine.low %v12628_v37, %v12649_v7  ;;  %v12666_v18 = vsel %vm11816_vm5, %v9543_v44, %v3396_v53  ;;  %v3398_v10 = vrot.slane %v3396_v53, 4  ;;  %v2088_v58 = vrot.slane %v9335_v33, 7 }
  0x87   : > { %10634 = vmatpush3.bf16.msra.mxu1 %v11844_v25  ;;  %10621 = vmatprep.mubr.msk.bf16.mxu1 %vm564_vm2, %v9347_v54  ;;  %v12678_v32 = vsel %vm11852_vm6, %v9343_v34, %v2085_v27  ;;  %v2087_v49 = vrot.slane %v2085_v27, 4  ;;  %v9544_v59 = vrot.slane %v9535_v57, 10  ;;  %v3403_v1 = vrot.slane %v12631_v19, 6  ;;  %v9496_v54 = vld [vmem:[%s11813_s11 + $0xc] sm:$0xf] }
  0x88   : > { %v12684_v5 = vsel %vm11816_vm5, %v3398_v10, %v3399_v15  ;;  %v3406_v25 = vrot.slane %v9536_v0, 6  ;;  %v3607_v61 = vsel %vm480_vm0, %v12537_v38, 0  ;;  %v9387_v20 = vrot.slane %v9363_v24, 9  ;;  %11539 = vmatprep.subr.msk.bf16.mxu1 %vm480_vm0, %v12656_v11  ;;  %v9498_v38 = vld [vmem:[%s11813_s11 + $0x14] sm:$0x1] }
  0x89   : > { %v9552_v23 = vcombine.low %v12666_v18, %v12684_v5  ;;  %v12695_v9 = vsel %vm11852_vm6, %v2087_v49, %v2088_v58  ;;  %v12699_v14 = vsel %vm11816_vm5, %v9544_v59, %v3403_v1  ;;  %v3405_v35 = vrot.slane %v3403_v1, 4  ;;  %10706 = vmatpush3.bf16.msra.mxu0 %v3607_v61  ;;  %v12711_v15 = vld [vmem:[%s11813_s11 + $0x58] sm:$0xf]  ;;  %v9368_v58 = vld [vmem:[%s11813_s11 + $0x5c] sm:$0x1] }
  0x8a   : > { %v9352_v47 = vcombine.low %v12678_v32, %v12695_v9  ;;  %v2310_v33 = vrot.slane %v12669_v21, 5  ;;  %v2313_v17 = vrot.slane %v9365_v46, 5  ;;  %v3119_v44 = vshrl.u32 %v9496_v54, 16  ;;  %v9499_v59 = vld [vmem:[%s11813_s11 + $0x18] sm:$0xf] }
  0x8b   : > { %v12708_v57 = vsel %vm11816_vm5, %v3405_v35, %v3406_v25  ;;  %v3122_v53 = vshll.u32 %v9496_v54, 16  ;;  %v3128_v24 = vshll.u32 %v12384_v39, 16  ;;  %v3132_v8 = vshrl.u32 %v12384_v39, 16  ;;  %v9501_v46 = vld [vmem:[%s11813_s11 + $0x20] sm:$0x1] }
  0x8c   : > { %10694 = vmatmul.mubr.msk.bf16.gmra.mrb[36].mxu0 %vm564_vm2, %v9549_v40  ;;  %v9553_v0 = vcombine.low %v12699_v14, %v12708_v57  ;;  %v12721_v34 = vsel %vm12016_vm9, %v9387_v20, %v2310_v33  ;;  %v2312_v27 = vrot.slane %v2310_v33, 4  ;;  %v3121_v10 = vrot.slane %v3119_v44, 4  ;;  %v9369_v20 = vld [vmem:[%s11813_s11 + $0x60] sm:$0xe]  ;;  %v9504_v18 = vld [vmem:[%s11813_s11 + $0x2c] sm:$0x1] }
  0x8d   : > { %10697 = vmatprep.mubr.msk.bf16.mxu0 %vm564_vm2, %v9550_v28  ;;  %v3124_v43 = vrot.slane %v3122_v53, 5  ;;  %v3138_v40 = vshll.u32 %v9498_v38, 16  ;;  %v3130_v55 = vrot.slane %v3128_v24, 5  ;;  %v9388_v16 = vrot.slane %v9366_v60, 9 }
  0x8e   : > { %10622 = vmatmul.mubr.msk.bf16.gmra.mrb[4].mxu1 %vm564_vm2, %v9348_v41  ;;  %v12736_v49 = vsel %vm12016_vm9, %v2312_v27, %v2313_v17  ;;  %v2317_v28 = vrot.slane %v12711_v15, 5  ;;  %v3134_v41 = vrot.slane %v3132_v8, 4  ;;  %v12763_v61 = vsel %vm480_vm0, %v12656_v11, 0  ;;  %v12767_v17 = vld [vmem:[%s11813_s11 + $0x64] sm:$0xf] }
  0x8f   : > { %10625 = vmatprep.mubr.msk.bf16.mxu1 %vm564_vm2, %v9349_v22  ;;  %v9396_v6 = vcombine.low %v12721_v34, %v12736_v49  ;;  %v3125_v42 = vor.u32 %v3124_v43, %v3121_v10  ;;  %v3140_v1 = vrot.slane %v3138_v40, 5  ;;  %v2320_v22 = vrot.slane %v9368_v58, 5  ;;  %v9371_v10 = vld [vmem:[%s11813_s11 + $0x68] sm:$0x1] }
  0x90   : > { %v12759_v62 = vsel %vm12016_vm9, %v9388_v16, %v2317_v28  ;;  %v2319_v52 = vrot.slane %v2317_v28, 4  ;;  %v3135_v35 = vor.u32 %v3134_v41, %v3130_v55  ;;  %v3143_v38 = vshrl.u32 %v9499_v59, 16  ;;  %v9502_v16 = vld [vmem:[%s11813_s11 + $0x24] sm:$0xf] }
  0x91   : > { %v3126_v54 = vrot.slane %v3125_v42, 4  ;;  %v3146_v33 = vshll.u32 %v9499_v59, 16  ;;  %v3152_v44 = vshll.u32 %v12426_v2, 16  ;;  %v3156_v53 = vshrl.u32 %v12426_v2, 16 }
  0x92   : > { %v12771_v60 = vsel %vm12016_vm9, %v2319_v52, %v2320_v22  ;;  %v3162_v27 = vshll.u32 %v9501_v46, 16  ;;  %v3136_v43 = vrot.slane %v3135_v35, 4  ;;  %v3145_v58 = vrot.slane %v3143_v38, 4  ;;  %v9374_v38 = vld [vmem:[%s11813_s11 + $0x74] sm:$0x1] }
  0x93   : > { %v3131_v11 = vsel %vm12753_vm12, %v3126_v54, %v3130_v55  ;;  %v9397_v40 = vcombine.low %v12759_v62, %v12771_v60  ;;  %v3148_v28 = vrot.slane %v3146_v33, 5  ;;  %v3154_v59 = vrot.slane %v3152_v44, 5  ;;  %v12817_v54 = vld [vmem:[%s15017_s2 + $0x16] sm:$0x3] }
  0x94   : > { %10698 = vmatmul.mubr.msk.bf16.gmra.mrb[40].mxu0 %vm564_vm2, %v9551_v36  ;;  %v3158_v55 = vrot.slane %v3156_v53, 4  ;;  %v3164_v42 = vrot.slane %v3162_v27, 5  ;;  %v3141_v41 = vsel %vm12753_vm12, %v3136_v43, %v3140_v1  ;;  %v9389_v48 = vrot.slane %v9369_v20, 9  ;;  %v12812_v20 = vld [vmem:[%s11813_s11 + $0x70] sm:$0xf]  ;;  %11543 = vmatprep.subr.msk.bf16.mxu0 %vm480_vm0, %v12817_v54 }
  0x95   : > { %10701 = vmatprep.mubr.msk.bf16.mxu0 %vm564_vm2, %v9552_v23  ;;  %v2324_v63 = vrot.slane %v12767_v17, 5  ;;  %v2327_v36 = vrot.slane %v9371_v10, 5  ;;  %v9562_v46 = vcombine.low %v3131_v11, %v3141_v41  ;;  %v3149_v52 = vor.u32 %v3148_v28, %v3145_v58  ;;  %v9372_v23 = vld [vmem:[%s11813_s11 + $0x6c] sm:$0xe]  ;;  %v9505_v43 = vld [vmem:[%s11813_s11 + $0x30] sm:$0xf] }
  0x96   : > { %10626 = vmatmul.mubr.msk.bf16.gmra.mrb[8].mxu1 %vm564_vm2, %v9350_v50  ;;  %v3159_v22 = vor.u32 %v3158_v55, %v3154_v59  ;;  %v3167_v5 = vshrl.u32 %v9502_v16, 16  ;;  %v3170_v12 = vshll.u32 %v9502_v16, 16  ;;  %v3176_v50 = vshll.u32 %v12452_v31, 16 }
  0x97   : > { %10629 = vmatprep.mubr.msk.bf16.mxu1 %vm564_vm2, %v9351_v29  ;;  %v12808_v1 = vsel %vm12016_vm9, %v9389_v48, %v2324_v63  ;;  %v2326_v45 = vrot.slane %v2324_v63, 4  ;;  %v3150_v35 = vrot.slane %v3149_v52, 4  ;;  %v3180_v29 = vshrl.u32 %v12452_v31, 16  ;;  %v9507_v52 = vld [vmem:[%s11813_s11 + $0x38] sm:$0x1] }
  0x98   : > { %v3160_v37 = vrot.slane %v3159_v22, 4  ;;  %v3169_v7 = vrot.slane %v3167_v5, 4  ;;  %v3172_v27 = vrot.slane %v3170_v12, 5  ;;  %v3178_v10 = vrot.slane %v3176_v50, 5  ;;  %v9375_v5 = vld [vmem:[%s11813_s11 + $0x78] sm:$0xe] }
  0x99   : > { %v12825_v33 = vsel %vm12016_vm9, %v2326_v45, %v2327_v36  ;;  %v3186_v11 = vshll.u32 %v9504_v18, 16  ;;  %v3155_v58 = vsel %vm12753_vm12, %v3150_v35, %v3154_v59  ;;  %v3182_v55 = vrot.slane %v3180_v29, 4 }
  0x9a   : > { %v3165_v16 = vsel %vm12753_vm12, %v3160_v37, %v3164_v42  ;;  %v9398_v28 = vcombine.low %v12808_v1, %v12825_v33  ;;  %v3173_v48 = vor.u32 %v3172_v27, %v3169_v7  ;;  %v9390_v36 = vrot.slane %v9372_v23, 9  ;;  %v12849_v37 = vld [vmem:[%s11813_s11 + $0x7c] sm:$0xf]  ;;  %v9377_v7 = vld [vmem:[%s11813_s11 + $0x80] sm:$0x1] }
  0x9b   : > { %v9563_v41 = vcombine.low %v3155_v58, %v3165_v16  ;;  %v3188_v63 = vrot.slane %v3186_v11, 5  ;;  %v3183_v59 = vor.u32 %v3182_v55, %v3178_v10  ;;  %v2331_v42 = vrot.slane %v12812_v20, 5  ;;  %v9508_v27 = vld [vmem:[%s11813_s11 + $0x3c] sm:$0xf]  ;;  %v9510_v55 = vld [vmem:[%s11813_s11 + $0x44] sm:$0x1] }
  0x9c   : > { %10702 = vmatmul.mubr.msk.bf16.gmra.mrb[44].mxu0 %vm564_vm2, %v9553_v0  ;;  %v2334_v22 = vrot.slane %v9374_v38, 5  ;;  %v3191_v18 = vshrl.u32 %v9505_v43, 16  ;;  %v3174_v45 = vrot.slane %v3173_v48, 4  ;;  %v3194_v12 = vshll.u32 %v9505_v43, 16 }
  0x9d   : > { %10707 = vmatprep.mubr.msk.bf16.mxu0 %vm564_vm2, %v9562_v46  ;;  %v3200_v23 = vshll.u32 %v12490_v3, 16  ;;  %v3204_v35 = vshrl.u32 %v12490_v3, 16  ;;  %v3184_v14 = vrot.slane %v3183_v59, 4  ;;  %v12857_v57 = vsel %vm12016_vm9, %v9390_v36, %v2331_v42 }
  0x9e   : > { %10630 = vmatmul.mubr.msk.bf16.gmra.mrb[12].mxu1 %vm564_vm2, %v9352_v47  ;;  %v2333_v0 = vrot.slane %v2331_v42, 4  ;;  %v3193_v46 = vrot.slane %v3191_v18, 4  ;;  %v3179_v38 = vsel %vm12753_vm12, %v3174_v45, %v3178_v10  ;;  %v3196_v32 = vrot.slane %v3194_v12, 5  ;;  %v9378_v42 = vld [vmem:[%s11813_s11 + $0x84] sm:$0xe] }
  0x9f   : > { %10635 = vmatprep.mubr.msk.bf16.mxu1 %vm564_vm2, %v9396_v6  ;;  %v3202_v9 = vrot.slane %v3200_v23, 5  ;;  %v3206_v47 = vrot.slane %v3204_v35, 4  ;;  %v3189_v11 = vsel %vm12753_vm12, %v3184_v14, %v3188_v63  ;;  %v3210_v49 = vshll.u32 %v9507_v52, 16  ;;  %v12884_v45 = vld [vmem:[%s11813_s11 + $0x88] sm:$0xf] }
  0xa0   : > { %v12875_v34 = vsel %vm12016_vm9, %v2333_v0, %v2334_v22  ;;  %v9391_v6 = vrot.slane %v9375_v5, 9  ;;  %v9564_v10 = vcombine.low %v3179_v38, %v3189_v11  ;;  %v3197_v58 = vor.u32 %v3196_v32, %v3193_v46  ;;  %v12902_v11 = vld [vmem:[%s15017_s2 + $0x10] sm:$0x3] }
  0xa1   : > { %v9399_v43 = vcombine.low %v12857_v57, %v12875_v34  ;;  %v3207_v16 = vor.u32 %v3206_v47, %v3202_v9  ;;  %v3212_v48 = vrot.slane %v3210_v49, 5  ;;  %v2338_v36 = vrot.slane %v12849_v37, 5  ;;  %v12957_v34 = vld [vmem:[%s11813_s11 + $0xa0] sm:$0xf] }
  0xa2   : > { %v2341_v59 = vrot.slane %v9377_v7, 5  ;;  %v3215_v63 = vshrl.u32 %v9508_v27, 16  ;;  %v3198_v18 = vrot.slane %v3197_v58, 4  ;;  %v3218_v52 = vshll.u32 %v9508_v27, 16  ;;  %v9380_v7 = vld [vmem:[%s11813_s11 + $0x8c] sm:$0x1] }
  0xa3   : > { %v3208_v22 = vrot.slane %v3207_v16, 4  ;;  %v3224_v5 = vshll.u32 %v12520_v26, 16  ;;  %v2339_v12 = vsel %vm12016_vm9, %v9391_v6, %v2338_v36  ;;  %v2340_v14 = vrot.slane %v2338_v36, 4  ;;  %v9511_v27 = vld [vmem:[%s11813_s11 + $0x48] sm:$0xf] }
  0xa4   : > { %10708 = vmatmul.mubr.msk.bf16.vlgmr.msra.gmra.mrb[32].mxu0 %vm564_vm2, %v9563_v41  ;;  %v3217_v0 = vrot.slane %v3215_v63, 4  ;;  %v3228_v46 = vshrl.u32 %v12520_v26, 16  ;;  %v3203_v38 = vsel %vm12753_vm12, %v3198_v18, %v3202_v9  ;;  %v3220_v47 = vrot.slane %v3218_v52, 5 }
  0xa5   : > { %10711 = vmatprep.mubr.msk.bf16.mxu0 %vm564_vm2, %v9564_v10  ;;  %v3213_v32 = vsel %vm12753_vm12, %v3208_v22, %v3212_v48  ;;  %v3226_v41 = vrot.slane %v3224_v5, 5  ;;  %v2342_v49 = vsel %vm12016_vm9, %v2340_v14, %v2341_v59  ;;  %v3234_v10 = vshll.u32 %v9510_v55, 16  ;;  %v9513_v59 = vld [vmem:[%s11813_s11 + $0x50] sm:$0x1]  ;;  %v9381_v55 = vld [vmem:[%s11813_s11 + $0x90] sm:$0xe] }
  0xa6   : > { %10636 = vmatmul.mubr.msk.bf16.vlgmr.msra.gmra.mrb[0].mxu1 %vm564_vm2, %v9397_v40  ;;  %v9565_v9 = vcombine.low %v3203_v38, %v3213_v32  ;;  %v3230_v6 = vrot.slane %v3228_v46, 4  ;;  %v9400_v58 = vcombine.low %v2339_v12, %v2342_v49  ;;  %v3221_v62 = vor.u32 %v3220_v47, %v3217_v0  ;;  %v12929_v12 = vld [vmem:[%s11813_s11 + $0x94] sm:$0xf]  ;;  %v9383_v32 = vld [vmem:[%s11813_s11 + $0x98] sm:$0x1] }
  0xa7   : > { %10652 = vmatpush3.bf16.msra.mxu1 %v12763_v61  ;;  %10639 = vmatprep.mubr.msk.bf16.mxu1 %vm564_vm2, %v9398_v28  ;;  %v9392_v60 = vrot.slane %v9378_v42, 9  ;;  %v2345_v40 = vrot.slane %v12884_v45, 5  ;;  %v3236_v48 = vrot.slane %v3234_v10, 5  ;;  %v2348_v36 = vrot.slane %v9380_v7, 5  ;;  %v9514_v47 = vld [vmem:[%s11813_s11 + $0x54] sm:$0xf] }
  0xa8   : > { %v3231_v16 = vor.u32 %v3230_v6, %v3226_v41  ;;  %v3239_v63 = vshrl.u32 %v9511_v27, 16  ;;  %11540 = vmatprep.subr.msk.bf16.mxu1 %vm480_vm0, %v12902_v11  ;;  %v3222_v61 = vrot.slane %v3221_v62, 4  ;;  %v3242_v28 = vshll.u32 %v9511_v27, 16 }
  0xa9   : > { %v12923_v1 = vsel %vm12016_vm9, %v9392_v60, %v2345_v40  ;;  %v2347_v33 = vrot.slane %v2345_v40, 4  ;;  %v3248_v22 = vshll.u32 %v12564_v4, 16  ;;  %v3252_v52 = vshrl.u32 %v12564_v4, 16 }
  0xaa   : > { %v3232_v42 = vrot.slane %v3231_v16, 4  ;;  %v3241_v18 = vrot.slane %v3239_v63, 4  ;;  %v3227_v14 = vsel %vm12753_vm12, %v3222_v61, %v3226_v41  ;;  %v3244_v7 = vrot.slane %v3242_v28, 5  ;;  %v9516_v16 = vld [vmem:[%s11813_s11 + $0x5c] sm:$0x1] }
  0xab   : > { %v2349_v0 = vsel %vm12016_vm9, %v2347_v33, %v2348_v36  ;;  %v3258_v38 = vshll.u32 %v9513_v59, 16  ;;  %v3250_v6 = vrot.slane %v3248_v22, 5  ;;  %v3254_v41 = vrot.slane %v3252_v52, 4  ;;  %v9384_v63 = vld [vmem:[%s11813_s11 + $0x9c] sm:$0xe] }
  0xac   : > { %10712 = vmatmul.mubr.msk.bf16.gmra.mrb[36].mxu0 %vm564_vm2, %v9565_v9  ;;  %v3237_v27 = vsel %vm12753_vm12, %v3232_v42, %v3236_v48  ;;  %v9401_v49 = vcombine.low %v12923_v1, %v2349_v0  ;;  %v3245_v62 = vor.u32 %v3244_v7, %v3241_v18  ;;  %v9393_v40 = vrot.slane %v9381_v55, 9  ;;  %v9386_v18 = vld [vmem:[%s11813_s11 + $0xa4] sm:$0x1] }
  0xad   : > { %v9566_v10 = vcombine.low %v3227_v14, %v3237_v27  ;;  %v3260_v60 = vrot.slane %v3258_v38, 5  ;;  %v3255_v9 = vor.u32 %v3254_v41, %v3250_v6  ;;  %v2352_v48 = vrot.slane %v12929_v12, 5  ;;  %v9517_v38 = vld [vmem:[%s11813_s11 + $0x60] sm:$0xf] }
  0xae   : > { %10640 = vmatmul.mubr.msk.bf16.gmra.mrb[4].mxu1 %vm564_vm2, %v9399_v43  ;;  %v2355_v36 = vrot.slane %v9383_v32, 5  ;;  %v3263_v59 = vshrl.u32 %v9514_v47, 16  ;;  %v3246_v61 = vrot.slane %v3245_v62, 4  ;;  %v3266_v1 = vshll.u32 %v9514_v47, 16 }
  0xaf   : > { %10643 = vmatprep.mubr.msk.bf16.mxu1 %vm564_vm2, %v9400_v58  ;;  %10715 = vmatprep.mubr.msk.bf16.mxu0 %vm564_vm2, %v9566_v10  ;;  %v15022_v33 = vshll.u32 %v12598_v51, 16  ;;  %v3276_v57 = vshrl.u32 %v12598_v51, 16  ;;  %v3256_v43 = vrot.slane %v3255_v9, 4  ;;  %v2353_v28 = vsel %vm12016_vm9, %v9393_v40, %v2352_v48 }
  0xb0   : > { %v2354_v55 = vrot.slane %v2352_v48, 4  ;;  %v3265_v42 = vrot.slane %v3263_v59, 4  ;;  %v3251_v58 = vsel %vm12753_vm12, %v3246_v61, %v3250_v6  ;;  %v3268_v14 = vrot.slane %v3266_v1, 5 }
  0xb1   : > { %v3274_v0 = vrot.slane %v15022_v33, 5  ;;  %v3278_v7 = vrot.slane %v3276_v57, 4  ;;  %v3261_v32 = vsel %vm12753_vm12, %v3256_v43, %v3260_v60  ;;  %v3282_v27 = vshll.u32 %v9516_v16, 16  ;;  %v9519_v43 = vld [vmem:[%s11813_s11 + $0x68] sm:$0x1] }
  0xb2   : > { %v2356_v47 = vsel %vm12016_vm9, %v2354_v55, %v2355_v36  ;;  %v9394_v41 = vrot.slane %v9384_v63, 9  ;;  %v9567_v10 = vcombine.low %v3251_v58, %v3261_v32  ;;  %v3269_v6 = vor.u32 %v3268_v14, %v3265_v42  ;;  %v9412_v42 = vld [vmem:[%s11813_s11 + $0x48] sm:$0xc] }
  0xb3   : > { %v9402_v62 = vcombine.low %v2353_v28, %v2356_v47  ;;  %v3279_v40 = vor.u32 %v3278_v7, %v3274_v0  ;;  %v3284_v9 = vrot.slane %v3282_v27, 5  ;;  %v2359_v48 = vrot.slane %v12957_v34, 5  ;;  %v9413_v7 = vld [vmem:[%s11813_s11 + $0x50] sm:$0x3] }
  0xb4   : > { %v2362_v59 = vrot.slane %v9386_v18, 5  ;;  %v3287_v61 = vshrl.u32 %v9517_v38, 16  ;;  %10716 = vmatmul.mubr.msk.bf16.gmra.mrb[40].mxu0 %vm564_vm2, %v9567_v10  ;;  %v3270_v1 = vrot.slane %v3269_v6, 4  ;;  %v3290_v33 = vshll.u32 %v9517_v38, 16 }
  0xb5   : > { %v3280_v60 = vrot.slane %v3279_v40, 4  ;;  %v3296_v16 = vshll.u32 %v12631_v19, 16  ;;  %v2360_v36 = vsel %vm12016_vm9, %v9394_v41, %v2359_v48  ;;  %v2361_v63 = vrot.slane %v2359_v48, 4  ;;  %v9578_v41 = vld [vmem:[%s11813_s11 + $0xc] sm:$0x8] }
  0xb6   : > { %10644 = vmatmul.mubr.msk.bf16.gmra.mrb[8].mxu1 %vm564_vm2, %v9401_v49  ;;  %v3289_v28 = vrot.slane %v3287_v61, 4  ;;  %v3300_v55 = vshrl.u32 %v12631_v19, 16  ;;  %v3275_v18 = vsel %vm12753_vm12, %v3270_v1, %v3274_v0  ;;  %v3292_v14 = vrot.slane %v3290_v33, 5  ;;  %v12998_v0 = vld [vmem:[%s15017_s2 + $0x18] sm:$0x3] }
  0xb7   : > { %10647 = vmatprep.mubr.msk.bf16.mxu1 %vm564_vm2, %v9402_v62  ;;  %v3285_v58 = vsel %vm12753_vm12, %v3280_v60, %v3284_v9  ;;  %v3298_v49 = vrot.slane %v3296_v16, 5  ;;  %v2363_v32 = vsel %vm12016_vm9, %v2361_v63, %v2362_v59  ;;  %v3306_v27 = vshll.u32 %v9519_v43, 16  ;;  %v9579_v59 = vld [vmem:[%s11813_s11 + $0x14] sm:$0xf]  ;;  %v9621_v19 = vld [vmem:[%s11813_s11 + $0x38] sm:$0x1] }
  0xb8   : > { %v9568_v38 = vcombine.low %v3275_v18, %v3285_v58  ;;  %v3302_v47 = vrot.slane %v3300_v55, 4  ;;  %v9403_v33 = vcombine.low %v2360_v36, %v2363_v32  ;;  %v3293_v10 = vor.u32 %v3292_v14, %v3289_v28  ;;  %v9414_v63 = vld [vmem:[%s11813_s11 + $0x54] sm:$0xc] }
  0xb9   : > { %v3912_v62 = vsel %vm480_vm0, %v12817_v54, 0  ;;  %v9428_v6 = vrot.slane %v9412_v42, 10  ;;  %v3308_v40 = vrot.slane %v3306_v27, 5  ;;  %v2564_v9 = vrot.slane %v12669_v21, 6  ;;  %v9581_v27 = vld [vmem:[%s11813_s11 + $0x20] sm:$0xf] }
  0xba   : > { %10719 = vmatprep.mubr.msk.bf16.mxu0 %vm564_vm2, %v9568_v38  ;;  %v3303_v56 = vor.u32 %v3302_v47, %v3298_v49  ;;  %10724 = vmatpush3.bf16.msra.mxu0 %v3912_v62  ;;  %v2567_v48 = vrot.slane %v9413_v7, 6  ;;  %v3294_v61 = vrot.slane %v3293_v10, 4  ;;  %vm3722_vm13 = vsmask.f32 256  ;;  %v9415_v7 = vld [vmem:[%s11813_s11 + $0x5c] sm:$0x3] }
  0xbb   : > { %vm3723_vm14 = vsmask.f32 4368  ;;  %v3726_v1 = vshrl.u32 %v9578_v41, 16  ;;  %11544 = vmatprep.subr.msk.bf16.mxu0 %vm480_vm0, %v12998_v0  ;;  %v2565_v60 = vsel %vm11816_vm5, %v9428_v6, %v2564_v9  ;;  %v2566_v43 = vrot.slane %v2564_v9, 4  ;;  %v9580_v47 = vld [vmem:[%s11813_s11 + $0x18] sm:$0x8] }
  0xbc   : > { %v3304_v54 = vrot.slane %v3303_v56, 4  ;;  %v3730_v36 = vrot.slane %v3132_v8, 7  ;;  %v3299_v28 = vsel %vm12753_vm12, %v3294_v61, %v3298_v49  ;;  %vm13014_vm15 = vmor %vm3722_vm13, %vm3723_vm14  ;;  %v3735_v58 = vshrl.u32 %v9579_v59, 16  ;;  %v9416_v56 = vld [vmem:[%s11813_s11 + $0x60] sm:$0xc] }
  0xbd   : > { %v9594_v18 = vrot.slane %v3726_v1, 11  ;;  %v3738_v14 = vshll.u32 %v9579_v59, 16  ;;  %v2568_v8 = vsel %vm11816_vm5, %v2566_v43, %v2567_v48  ;;  %v9429_v6 = vrot.slane %v9414_v63, 10  ;;  %v9417_v1 = vld [vmem:[%s11813_s11 + $0x68] sm:$0x3] }
  0xbe   : > { %10648 = vmatmul.mubr.msk.bf16.gmra.mrb[12].mxu1 %vm564_vm2, %v9403_v33  ;;  %v3309_v38 = vsel %vm12753_vm12, %v3304_v54, %v3308_v40  ;;  %v3731_v49 = vor.u32 %v3730_v36, %v3128_v24  ;;  %v3733_v32 = vrot.slane %v3730_v36, 4  ;;  %v9437_v10 = vcombine.low %v2565_v60, %v2568_v8  ;;  %v9583_v8 = vld [vmem:[%s11813_s11 + $0x2c] sm:$0xf] }
  0xbf   : > { %v9569_v41 = vcombine.low %v3299_v28, %v3309_v38  ;;  %v3737_v62 = vrot.slane %v3735_v58, 7  ;;  %v2571_v40 = vrot.slane %v12711_v15, 6  ;;  %v2574_v9 = vrot.slane %v9415_v7, 6 }
  0xc0   : > { %v3732_v33 = vsel %vm13014_vm15, %v9594_v18, %v3731_v49  ;;  %v2923_v39 = vsel %vm480_vm0, %v12902_v11, 0  ;;  %10653 = vmatprep.mubr.msk.bf16.mxu1 %vm564_vm2, %v9437_v10  ;;  %v3743_v48 = vshrl.u32 %v9580_v47, 16  ;;  %v3747_v59 = vrot.slane %v3156_v53, 7  ;;  %v9582_v11 = vld [vmem:[%s11813_s11 + $0x24] sm:$0x8] }
  0xc1   : > { %10720 = vmatmul.mubr.msk.bf16.gmra.mrb[44].mxu0 %vm564_vm2, %v9569_v41  ;;  %v3740_v24 = vor.u32 %v3738_v14, %v3737_v62  ;;  %v3752_v61 = vshrl.u32 %v9581_v27, 16  ;;  %v2572_v54 = vsel %vm11816_vm5, %v9429_v6, %v2571_v40  ;;  %v2573_v60 = vrot.slane %v2571_v40, 4  ;;  %v9418_v49 = vld [vmem:[%s11813_s11 + $0x6c] sm:$0xc]  ;;  %v9419_v6 = vld [vmem:[%s11813_s11 + $0x74] sm:$0x3] }
  0xc2   : > { %v3755_v43 = vshll.u32 %v9581_v27, 16  ;;  %v9430_v36 = vrot.slane %v9416_v56, 10  ;;  %v9595_v28 = vrot.slane %v3743_v48, 11  ;;  %v3748_v18 = vor.u32 %v3747_v59, %v3152_v44  ;;  %v13062_v56 = vld [vmem:[%s15017_s2 + $0x26] sm:$0x3] }
  0xc3   : > { %v3741_v63 = vsel %vm13014_vm15, %v3733_v32, %v3740_v24  ;;  %v3750_v58 = vrot.slane %v3747_v59, 4  ;;  %v2575_v14 = vsel %vm11816_vm5, %v2573_v60, %v2574_v9  ;;  %v3754_v7 = vrot.slane %v3752_v61, 7  ;;  %v9584_v48 = vld [vmem:[%s11813_s11 + $0x30] sm:$0x8] }
  0xc4   : > { %v9603_v53 = vcombine.low %v3732_v33, %v3741_v63  ;;  %v2578_v38 = vrot.slane %v12767_v17, 6  ;;  %v9438_v47 = vcombine.low %v2572_v54, %v2575_v14  ;;  %v3749_v32 = vsel %vm13014_vm15, %v9595_v28, %v3748_v18  ;;  %v9585_v54 = vld [vmem:[%s11813_s11 + $0x38] sm:$0xf] }
  0xc5   : > { %v2581_v27 = vrot.slane %v9417_v1, 6  ;;  %v3760_v41 = vshrl.u32 %v9582_v11, 16  ;;  %v3757_v2 = vor.u32 %v3755_v43, %v3754_v7  ;;  %v3764_v62 = vrot.slane %v3180_v29, 7  ;;  %v9421_v7 = vld [vmem:[%s11813_s11 + $0x80] sm:$0x3] }
  0xc6   : > { %10725 = vmatprep.mubr.msk.bf16.mxu0 %vm564_vm2, %v9603_v53  ;;  %v2579_v44 = vsel %vm11816_vm5, %v9430_v36, %v2578_v38  ;;  %v2580_v10 = vrot.slane %v2578_v38, 4  ;;  %10654 = vmatmul.mubr.msk.bf16.vlgmr.msra.gmra.mrb[0].mxu1 %vm564_vm2, %v9438_v47  ;;  %v3769_v40 = vshrl.u32 %v9583_v8, 16  ;;  %v3772_v9 = vshll.u32 %v9583_v8, 16  ;;  %v9586_v47 = vld [vmem:[%s11813_s11 + $0x3c] sm:$0x8] }
  0xc7   : > { %v9596_v33 = vrot.slane %v3760_v41, 11  ;;  %v9431_v24 = vrot.slane %v9418_v49, 10  ;;  %10670 = vmatpush3.bf16.msra.mxu1 %v2923_v39  ;;  %v3758_v59 = vsel %vm13014_vm15, %v3750_v58, %v3757_v2  ;;  %v3765_v61 = vor.u32 %v3764_v62, %v3176_v50  ;;  %v9420_v50 = vld [vmem:[%s11813_s11 + $0x78] sm:$0xc] }
  0xc8   : > { %v2582_v29 = vsel %vm11816_vm5, %v2580_v10, %v2581_v27  ;;  %v3767_v1 = vrot.slane %v3764_v62, 4  ;;  %v9604_v60 = vcombine.low %v3749_v32, %v3758_v59  ;;  %v3771_v36 = vrot.slane %v3769_v40, 7  ;;  %11550 = vmatprep.subr.msk.bf16.mxu1 %vm480_vm0, %v13062_v56 }
  0xc9   : > { %v9439_v43 = vcombine.low %v2579_v44, %v2582_v29  ;;  %v2585_v11 = vrot.slane %v12812_v20, 6  ;;  %v3766_v39 = vsel %vm13014_vm15, %v9596_v33, %v3765_v61  ;;  %v2588_v63 = vrot.slane %v9419_v6, 6  ;;  %v9587_v44 = vld [vmem:[%s11813_s11 + $0x44] sm:$0xf] }
  0xca   : > { %v3777_v28 = vshrl.u32 %v9584_v48, 16  ;;  %v3781_v31 = vrot.slane %v3204_v35, 7  ;;  %10726 = vmatmul.mubr.msk.bf16.vlgmr.msra.gmra.mrb[32].mxu0 %vm564_vm2, %v9604_v60  ;;  %v3774_v18 = vor.u32 %v3772_v9, %v3771_v36  ;;  %v3786_v14 = vshrl.u32 %v9585_v54, 16  ;;  %v9588_v36 = vld [vmem:[%s11813_s11 + $0x48] sm:$0x8] }
  0xcb   : > { %10657 = vmatprep.mubr.msk.bf16.mxu1 %vm564_vm2, %v9439_v43  ;;  %v2586_v58 = vsel %vm11816_vm5, %v9431_v24, %v2585_v11  ;;  %v2587_v53 = vrot.slane %v2585_v11, 4  ;;  %v3789_v35 = vshll.u32 %v9585_v54, 16  ;;  %v9432_v2 = vrot.slane %v9420_v50, 10  ;;  %v9422_v24 = vld [vmem:[%s11813_s11 + $0x84] sm:$0xc] }
  0xcc   : > { %v9597_v38 = vrot.slane %v3777_v28, 11  ;;  %v3782_v8 = vor.u32 %v3781_v31, %v3200_v23  ;;  %v3784_v49 = vrot.slane %v3781_v31, 4  ;;  %v3775_v32 = vsel %vm13014_vm15, %v3767_v1, %v3774_v18  ;;  %v9423_v1 = vld [vmem:[%s11813_s11 + $0x8c] sm:$0x3]  ;;  %v9589_v11 = vld [vmem:[%s11813_s11 + $0x50] sm:$0xf] }
  0xcd   : > { %v2589_v27 = vsel %vm11816_vm5, %v2587_v53, %v2588_v63  ;;  %v3788_v41 = vrot.slane %v3786_v14, 7  ;;  %v9605_v10 = vcombine.low %v3766_v39, %v3775_v32  ;;  %v2592_v23 = vrot.slane %v12849_v37, 6  ;;  %v9424_v50 = vld [vmem:[%s11813_s11 + $0x90] sm:$0xc] }
  0xce   : > { %v9440_v62 = vcombine.low %v2586_v58, %v2589_v27  ;;  %v3783_v3 = vsel %vm13014_vm15, %v9597_v38, %v3782_v8  ;;  %v2595_v33 = vrot.slane %v9421_v7, 6  ;;  %v3794_v40 = vshrl.u32 %v9586_v47, 16  ;;  %v9425_v8 = vld [vmem:[%s11813_s11 + $0x98] sm:$0x3]  ;;  %v9590_v27 = vld [vmem:[%s11813_s11 + $0x54] sm:$0x8] }
  0xcf   : > { %v3791_v6 = vor.u32 %v3789_v35, %v3788_v41  ;;  %v3798_v9 = vrot.slane %v3228_v46, 7  ;;  %10729 = vmatprep.mubr.msk.bf16.mxu0 %vm564_vm2, %v9605_v10  ;;  %v2593_v48 = vsel %vm11816_vm5, %v9432_v2, %v2592_v23  ;;  %v2594_v59 = vrot.slane %v2592_v23, 4 }
  0xd0   : > { %10658 = vmatmul.mubr.msk.bf16.gmra.mrb[4].mxu1 %vm564_vm2, %v9440_v62  ;;  %v3803_v29 = vshrl.u32 %v9587_v44, 16  ;;  %v3806_v61 = vshll.u32 %v9587_v44, 16  ;;  %v9598_v60 = vrot.slane %v3794_v40, 11  ;;  %v9433_v31 = vrot.slane %v9422_v24, 10 }
  0xd1   : > { %v3792_v54 = vsel %vm13014_vm15, %v3784_v49, %v3791_v6  ;;  %v3799_v46 = vor.u32 %v3798_v9, %v3224_v5  ;;  %v3801_v43 = vrot.slane %v3798_v9, 4  ;;  %v2596_v63 = vsel %vm11816_vm5, %v2594_v59, %v2595_v33  ;;  %v9591_v6 = vld [vmem:[%s11813_s11 + $0x5c] sm:$0xf] }
  0xd2   : > { %v9606_v39 = vcombine.low %v3783_v3, %v3792_v54  ;;  %v3805_v28 = vrot.slane %v3803_v29, 7  ;;  %v9441_v18 = vcombine.low %v2593_v48, %v2596_v63  ;;  %v2599_v53 = vrot.slane %v12884_v45, 6  ;;  %v9426_v33 = vld [vmem:[%s11813_s11 + $0x9c] sm:$0xc] }
  0xd3   : > { %v3800_v58 = vsel %vm13014_vm15, %v9598_v60, %v3799_v46  ;;  %v2602_v26 = vrot.slane %v9423_v1, 6  ;;  %v3811_v14 = vshrl.u32 %v9588_v36, 16  ;;  %v3815_v7 = vrot.slane %v3252_v52, 7 }
  0xd4   : > { %10730 = vmatmul.mubr.msk.bf16.gmra.mrb[36].mxu0 %vm564_vm2, %v9606_v39  ;;  %v3808_v5 = vor.u32 %v3806_v61, %v3805_v28  ;;  %v3820_v38 = vshrl.u32 %v9589_v11, 16  ;;  %10661 = vmatprep.mubr.msk.bf16.mxu1 %vm564_vm2, %v9441_v18  ;;  %v2600_v49 = vsel %vm11816_vm5, %v9433_v31, %v2599_v53  ;;  %v2601_v35 = vrot.slane %v2599_v53, 4  ;;  %v9427_v61 = vld [vmem:[%s11813_s11 + $0xa4] sm:$0x3] }
  0xd5   : > { %v3823_v47 = vshll.u32 %v9589_v11, 16  ;;  %v9434_v32 = vrot.slane %v9424_v50, 10  ;;  %v9599_v2 = vrot.slane %v3811_v14, 11  ;;  %v3816_v52 = vor.u32 %v3815_v7, %v3248_v22 }
  0xd6   : > { %v3809_v41 = vsel %vm13014_vm15, %v3801_v43, %v3808_v5  ;;  %v3818_v44 = vrot.slane %v3815_v7, 4  ;;  %v2603_v62 = vsel %vm11816_vm5, %v2601_v35, %v2602_v26  ;;  %v3822_v3 = vrot.slane %v3820_v38, 7  ;;  %v9592_v43 = vld [vmem:[%s11813_s11 + $0x60] sm:$0x8]  ;;  %v9453_v7 = vld [vmem:[%s11813_s11 + $0x48] sm:$0x8] }
  0xd7   : > { %v9607_v10 = vcombine.low %v3800_v58, %v3809_v41  ;;  %v2606_v23 = vrot.slane %v12929_v12, 6  ;;  %v9442_v40 = vcombine.low %v2600_v49, %v2603_v62  ;;  %v3817_v9 = vsel %vm13014_vm15, %v9599_v2, %v3816_v52  ;;  %v9454_v35 = vld [vmem:[%s11813_s11 + $0x50] sm:$0x7]  ;;  %v13168_v2 = vld [vmem:[%s15017_s2 + $0x1a] sm:$0x3] }
  0xd8   : > { %v2609_v24 = vrot.slane %v9425_v8, 6  ;;  %v3828_v48 = vshrl.u32 %v9590_v27, 16  ;;  %v3825_v4 = vor.u32 %v3823_v47, %v3822_v3  ;;  %v3832_v29 = vrot.slane %v3276_v57, 7  ;;  %v9593_v57 = vld [vmem:[%s11813_s11 + $0x68] sm:$0xf] }
  0xd9   : > { %10733 = vmatprep.mubr.msk.bf16.mxu0 %vm564_vm2, %v9607_v10  ;;  %v2607_v22 = vsel %vm11816_vm5, %v9434_v32, %v2606_v23  ;;  %v2608_v59 = vrot.slane %v2606_v23, 4  ;;  %10662 = vmatmul.mubr.msk.bf16.gmra.mrb[8].mxu1 %vm564_vm2, %v9442_v40  ;;  %v3837_v54 = vshrl.u32 %v9591_v6, 16  ;;  %v3840_v60 = vshll.u32 %v9591_v6, 16  ;;  %v9619_v47 = vld [vmem:[%s11813_s11 + $0x30] sm:$0xf] }
  0xda   : > { %v9600_v1 = vrot.slane %v3828_v48, 11  ;;  %v9435_v46 = vrot.slane %v9426_v33, 10  ;;  %v3826_v36 = vsel %vm13014_vm15, %v3818_v44, %v3825_v4  ;;  %v15059_v39 = vshll.u32 %v12598_v51, 16  ;;  %v13177_v3 = vld [vmem:[%s11813_s11 + $0x34] sm:$0xf] }
  0xdb   : > { %v2610_v11 = vsel %vm11816_vm5, %v2608_v59, %v2609_v24  ;;  %v3835_v28 = vrot.slane %v3832_v29, 4  ;;  %v9608_v31 = vcombine.low %v3817_v9, %v3826_v36  ;;  %v3839_v18 = vrot.slane %v3837_v54, 7 }
  0xdc   : > { %v3833_v63 = vor.u32 %v3832_v29, %v15059_v39  ;;  %v9443_v50 = vcombine.low %v2607_v22, %v2610_v11  ;;  %v2613_v58 = vrot.slane %v12957_v34, 6  ;;  %v2616_v26 = vrot.slane %v9427_v61, 6  ;;  %v9455_v29 = vld [vmem:[%s11813_s11 + $0x54] sm:$0x8]  ;;  %v9622_v39 = vld [vmem:[%s11813_s11 + $0x3c] sm:$0xf] }
  0xdd   : > { %v3845_v5 = vshrl.u32 %v9592_v43, 16  ;;  %v3849_v14 = vrot.slane %v3300_v55, 7  ;;  %10734 = vmatmul.mubr.msk.bf16.gmra.mrb[40].mxu0 %vm564_vm2, %v9608_v31  ;;  %v3842_v51 = vor.u32 %v3840_v60, %v3839_v18  ;;  %v3854_v49 = vshrl.u32 %v9593_v57, 16  ;;  %v9456_v60 = vld [vmem:[%s11813_s11 + $0x5c] sm:$0x7] }
  0xde   : > { %v3834_v53 = vsel %vm13014_vm15, %v9600_v1, %v3833_v63  ;;  %10665 = vmatprep.mubr.msk.bf16.mxu1 %vm564_vm2, %v9443_v50  ;;  %v2614_v38 = vsel %vm11816_vm5, %v9435_v46, %v2613_v58  ;;  %v2615_v8 = vrot.slane %v2613_v58, 4  ;;  %v3857_v41 = vshll.u32 %v9593_v57, 16  ;;  %v13204_v50 = vld [vmem:[%s11813_s11 + $0x40] sm:$0xf] }
  0xdf   : > { %v9601_v32 = vrot.slane %v3845_v5, 11  ;;  %v3850_v27 = vor.u32 %v3849_v14, %v3296_v16  ;;  %v3852_v55 = vrot.slane %v3849_v14, 4  ;;  %v3843_v52 = vsel %vm13014_vm15, %v3835_v28, %v3842_v51  ;;  %v9624_v5 = vld [vmem:[%s11813_s11 + $0x44] sm:$0x1] }
  0xe0   : > { %v2617_v44 = vsel %vm11816_vm5, %v2615_v8, %v2616_v26  ;;  %v3856_v10 = vrot.slane %v3854_v49, 7  ;;  %v4294_v62 = vsel %vm480_vm0, %v12998_v0, 0  ;;  %v9609_v16 = vcombine.low %v3834_v53, %v3843_v52  ;;  %v9458_v52 = vld [vmem:[%s11813_s11 + $0x68] sm:$0x7] }
  0xe1   : > { %v9444_v23 = vcombine.low %v2614_v38, %v2617_v44  ;;  %v3851_v6 = vsel %vm13014_vm15, %v9601_v32, %v3850_v27  ;;  %10742 = vmatpush3.bf16.msra.mxu0 %v4294_v62  ;;  %v9469_v33 = vrot.slane %v9453_v7, 11  ;;  %v2818_v9 = vrot.slane %v12669_v21, 7 }
  0xe2   : > { %v3859_v40 = vor.u32 %v3857_v41, %v3856_v10  ;;  %v2821_v24 = vrot.slane %v9454_v35, 7  ;;  %v4052_v48 = vshrl.u32 %v9619_v47, 16  ;;  %11545 = vmatprep.subr.msk.bf16.mxu0 %vm480_vm0, %v13168_v2  ;;  %10737 = vmatprep.mubr.msk.bf16.mxu0 %vm564_vm2, %v9609_v16  ;;  %v4055_v0 = vshll.u32 %v9619_v47, 16  ;;  %v9457_v47 = vld [vmem:[%s11813_s11 + $0x60] sm:$0x8] }
  0xe3   : > { %10666 = vmatmul.mubr.msk.bf16.gmra.mrb[12].mxu1 %vm564_vm2, %v9444_v23  ;;  %v15036_v4 = vshll.u32 %v13177_v3, 16  ;;  %v15038_v22 = vshrl.u32 %v13177_v3, 16  ;;  %v4071_v59 = vshll.u32 %v9621_v19, 16  ;;  %v2819_v61 = vsel %vm11852_vm6, %v9469_v33, %v2818_v9  ;;  %v9625_v16 = vld [vmem:[%s11813_s11 + $0x48] sm:$0xf] }
  0xe4   : > { %v3860_v21 = vsel %vm13014_vm15, %v3852_v55, %v3859_v40  ;;  %v2820_v1 = vrot.slane %v2818_v9, 4  ;;  %v4054_v54 = vrot.slane %v4052_v48, 4  ;;  %v4057_v43 = vrot.slane %v4055_v0, 5  ;;  %v13227_v9 = vld [vmem:[%s11813_s11 + $0x4c] sm:$0xf] }
  0xe5   : > { %v9610_v46 = vcombine.low %v3851_v6, %v3860_v21  ;;  %v4063_v36 = vrot.slane %v15036_v4, 5  ;;  %v4067_v11 = vrot.slane %v15038_v22, 4  ;;  %v4073_v28 = vrot.slane %v4071_v59, 5  ;;  %v9671_v4 = vld [vmem:[%s11813_s11 + $0x74] sm:$0x3] }
  0xe6   : > { %v2822_v63 = vsel %vm11852_vm6, %v2820_v1, %v2821_v24  ;;  %v9470_v57 = vrot.slane %v9455_v29, 11  ;;  %v2825_v31 = vrot.slane %v12711_v15, 7  ;;  %v4058_v58 = vor.u32 %v4057_v43, %v4054_v54  ;;  %v13232_v24 = vld [vmem:[%s15017_s2 + $0x24] sm:$0x3]  ;;  %v9627_v1 = vld [vmem:[%s11813_s11 + $0x50] sm:$0x1] }
  0xe7   : > { %10738 = vmatmul.mubr.msk.bf16.gmra.mrb[44].mxu0 %vm564_vm2, %v9610_v46  ;;  %v9478_v18 = vcombine.low %v2819_v61, %v2822_v63  ;;  %v4068_v53 = vor.u32 %v4067_v11, %v4063_v36  ;;  %v2828_v26 = vrot.slane %v9456_v60, 7  ;;  %v4076_v51 = vshrl.u32 %v9622_v39, 16  ;;  %v9674_v22 = vld [vmem:[%s11813_s11 + $0x84] sm:$0xc] }
  0xe8   : > { %v2826_v14 = vsel %vm11852_vm6, %v9470_v57, %v2825_v31  ;;  %v2827_v7 = vrot.slane %v2825_v31, 4  ;;  %v4079_v38 = vshll.u32 %v9622_v39, 16  ;;  %v4059_v15 = vrot.slane %v4058_v58, 4  ;;  %v9460_v57 = vld [vmem:[%s11813_s11 + $0x74] sm:$0x7] }
  0xe9   : > { %10671 = vmatprep.mubr.msk.bf16.mxu1 %vm564_vm2, %v9478_v18  ;;  %v4069_v8 = vrot.slane %v4068_v53, 4  ;;  %v15035_v49 = vshll.u32 %v13204_v50, 16  ;;  %v15037_v35 = vshrl.u32 %v13204_v50, 16  ;;  %v4078_v27 = vrot.slane %v4076_v51, 4 }
  0xea   : > { %v2829_v32 = vsel %vm11852_vm6, %v2827_v7, %v2828_v26  ;;  %v4081_v55 = vrot.slane %v4079_v38, 5  ;;  %v4095_v41 = vshll.u32 %v9624_v5, 16  ;;  %v4064_v44 = vsel %vm12753_vm12, %v4059_v15, %v4063_v36  ;;  %v9628_v26 = vld [vmem:[%s11813_s11 + $0x54] sm:$0xf]  ;;  %v13260_v38 = vld [vmem:[%s11813_s11 + $0x58] sm:$0xf] }
  0xeb   : > { %v4074_v10 = vsel %vm12753_vm12, %v4069_v8, %v4073_v28  ;;  %v9479_v62 = vcombine.low %v2826_v14, %v2829_v32  ;;  %v4087_v19 = vrot.slane %v15035_v49, 5  ;;  %v4091_v33 = vrot.slane %v15037_v35, 4  ;;  %v9670_v49 = vld [vmem:[%s11813_s11 + $0x6c] sm:$0xc] }
  0xec   : > { %v9644_v23 = vcombine.low %v4064_v44, %v4074_v10  ;;  %v4082_v6 = vor.u32 %v4081_v55, %v4078_v27  ;;  %v4097_v40 = vrot.slane %v4095_v41, 5  ;;  %v6172_v48 = vsel %vm480_vm0, %v13062_v56, 0  ;;  %v9630_v41 = vld [vmem:[%s11813_s11 + $0x5c] sm:$0x1] }
  0xed   : > { %10672 = vmatmul.mubr.msk.bf16.vlgmr.msra.gmra.mrb[0].mxu1 %vm564_vm2, %v9479_v62  ;;  %v9471_v0 = vrot.slane %v9457_v47, 11  ;;  %v2832_v59 = vrot.slane %v12767_v17, 7  ;;  %v2835_v29 = vrot.slane %v9458_v52, 7  ;;  %v4092_v61 = vor.u32 %v4091_v33, %v4087_v19  ;;  %v9459_v17 = vld [vmem:[%s11813_s11 + $0x6c] sm:$0x8] }
  0xee   : > { %10743 = vmatprep.mubr.msk.bf16.mxu0 %vm564_vm2, %v9644_v23  ;;  %v4083_v21 = vrot.slane %v4082_v6, 4  ;;  %10850 = vmatpush3.bf16.msra.mxu1 %v6172_v48  ;;  %v4100_v54 = vshrl.u32 %v9625_v16, 16  ;;  %v4103_v60 = vshll.u32 %v9625_v16, 16  ;;  %v15033_v56 = vshll.u32 %v13227_v9, 16  ;;  %v9461_v23 = vld [vmem:[%s11813_s11 + $0x78] sm:$0x8] }
  0xef   : > { %v2833_v46 = vsel %vm11852_vm6, %v9471_v0, %v2832_v59  ;;  %v2834_v43 = vrot.slane %v2832_v59, 4  ;;  %v15034_v36 = vshrl.u32 %v13227_v9, 16  ;;  %11551 = vmatprep.subr.msk.bf16.mxu1 %vm480_vm0, %v13232_v24  ;;  %v4093_v39 = vrot.slane %v4092_v61, 4  ;;  %v9462_v48 = vld [vmem:[%s11813_s11 + $0x80] sm:$0x7] }
  0xf0   : > { %v4088_v11 = vsel %vm12753_vm12, %v4083_v21, %v4087_v19  ;;  %v4102_v63 = vrot.slane %v4100_v54, 4  ;;  %v4105_v28 = vrot.slane %v4103_v60, 5  ;;  %v4111_v18 = vrot.slane %v15033_v56, 5 }
  0xf1   : > { %v2836_v31 = vsel %vm11852_vm6, %v2834_v43, %v2835_v29  ;;  %v4115_v58 = vrot.slane %v15034_v36, 4  ;;  %v4119_v53 = vshll.u32 %v9627_v1, 16  ;;  %v4098_v5 = vsel %vm12753_vm12, %v4093_v39, %v4097_v40  ;;  %v9631_v1 = vld [vmem:[%s11813_s11 + $0x60] sm:$0xf]  ;;  %v6033_v36 = vld [vmem:[%s11813_s11 + $0x30] sm:$0xc] }
  0xf2   : > { %v9480_v14 = vcombine.low %v2833_v46, %v2836_v31  ;;  %v4106_v7 = vor.u32 %v4105_v28, %v4102_v63  ;;  %v9472_v51 = vrot.slane %v9459_v17, 11  ;;  %v9645_v15 = vcombine.low %v4088_v11, %v4098_v5  ;;  %v13286_v17 = vld [vmem:[%s11813_s11 + $0x64] sm:$0xf] }
  0xf3   : > { %v4116_v8 = vor.u32 %v4115_v58, %v4111_v18  ;;  %v4121_v47 = vrot.slane %v4119_v53, 5  ;;  %v2839_v32 = vrot.slane %v12812_v20, 7  ;;  %v2842_v55 = vrot.slane %v9460_v57, 7  ;;  %v9633_v58 = vld [vmem:[%s11813_s11 + $0x68] sm:$0x1] }
  0xf4   : > { %10675 = vmatprep.mubr.msk.bf16.mxu1 %vm564_vm2, %v9480_v14  ;;  %v4107_v27 = vrot.slane %v4106_v7, 4  ;;  %v4124_v52 = vshrl.u32 %v9628_v26, 16  ;;  %v4127_v44 = vshll.u32 %v9628_v26, 16  ;;  %10744 = vmatmul.mubr.msk.bf16.vlgmr.msra.gmra.mrb[32].mxu0 %vm564_vm2, %v9645_v15  ;;  %v15031_v16 = vshll.u32 %v13260_v38, 16  ;;  %v9463_v15 = vld [vmem:[%s11813_s11 + $0x84] sm:$0x8] }
  0xf5   : > { %v4117_v10 = vrot.slane %v4116_v8, 4  ;;  %v2840_v62 = vsel %vm11852_vm6, %v9472_v51, %v2839_v32  ;;  %v2841_v19 = vrot.slane %v2839_v32, 4  ;;  %v15032_v40 = vshrl.u32 %v13260_v38, 16 }
  0xf6   : > { %v4112_v20 = vsel %vm12753_vm12, %v4107_v27, %v4111_v18  ;;  %v4126_v6 = vrot.slane %v4124_v52, 4  ;;  %v4129_v33 = vrot.slane %v4127_v44, 5  ;;  %v13274_v0 = vpop.f32.mrb[0].mxu0  ;;  %v4135_v21 = vrot.slane %v15031_v16, 5 }
  0xf7   : > { %v4122_v59 = vsel %vm12753_vm12, %v4117_v10, %v4121_v47  ;;  %v2843_v29 = vsel %vm11852_vm6, %v2841_v19, %v2842_v55  ;;  %v4143_v61 = vshll.u32 %v9630_v41, 16  ;;  %v4139_v43 = vrot.slane %v15032_v40, 4  ;;  %v13288_v11 = vpop.f32.mrb[1].mxu0  ;;  %v9464_v41 = vld [vmem:[%s11813_s11 + $0x8c] sm:$0x7] }
  0xf8   : > { %v9646_v54 = vcombine.low %v4112_v20, %v4122_v59  ;;  %v9481_v60 = vcombine.low %v2840_v62, %v2843_v29  ;;  %v4130_v46 = vor.u32 %v4129_v33, %v4126_v6  ;;  %v9473_v63 = vrot.slane %v9461_v23, 11  ;;  %v13294_v5 = vpop.f32.mrb[2].mxu0  ;;  %v9634_v19 = vld [vmem:[%s11813_s11 + $0x6c] sm:$0xf] }
  0xf9   : > { %v4145_v39 = vrot.slane %v4143_v61, 5  ;;  %v2846_v28 = vrot.slane %v12849_v37, 7  ;;  %v2849_v57 = vrot.slane %v9462_v48, 7  ;;  %v4140_v18 = vor.u32 %v4139_v43, %v4135_v21  ;;  %v13301_v8 = vpop.f32.mrb[3].mxu0  ;;  %v13316_v48 = vld [vmem:[%s11813_s11 + $0x70] sm:$0xf] }
  0xfa   : > { %10747 = vmatprep.mubr.msk.bf16.mxu0 %vm564_vm2, %v9646_v54  ;;  %10676 = vmatmul.mubr.msk.bf16.gmra.mrb[4].mxu1 %vm564_vm2, %v9481_v60  ;;  %v4131_v31 = vrot.slane %v4130_v46, 4  ;;  %v4148_v53 = vshrl.u32 %v9631_v1, 16  ;;  %v4151_v26 = vshll.u32 %v9631_v1, 16  ;;  %v15029_v37 = vshll.u32 %v13286_v17, 16  ;;  %v9636_v60 = vld [vmem:[%s11813_s11 + $0x74] sm:$0x1] }
  0xfb   : > { %v2847_v14 = vsel %vm11852_vm6, %v9473_v63, %v2846_v28  ;;  %v2848_v7 = vrot.slane %v2846_v28, 4  ;;  %v15030_v51 = vshrl.u32 %v13286_v17, 16  ;;  %v4141_v32 = vrot.slane %v4140_v18, 4 }
  0xfc   : > { %v4136_v47 = vsel %vm12753_vm12, %v4131_v31, %v4135_v21  ;;  %v4150_v27 = vrot.slane %v4148_v53, 4  ;;  %v4153_v55 = vrot.slane %v4151_v26, 5  ;;  %v4159_v44 = vrot.slane %v15029_v37, 5  ;;  %v9465_v31 = vld [vmem:[%s11813_s11 + $0x90] sm:$0x8] }
  0xfd   : > { %v2850_v52 = vsel %vm11852_vm6, %v2848_v7, %v2849_v57  ;;  %v4163_v10 = vrot.slane %v15030_v51, 4  ;;  %v4167_v62 = vshll.u32 %v9633_v58, 16  ;;  %v4146_v23 = vsel %vm12753_vm12, %v4141_v32, %v4145_v39  ;;  %v6029_v37 = vld [vmem:[%s11813_s11 + $0x18] sm:$0xc]  ;;  %v6030_v51 = vld [vmem:[%s11813_s11 + $0x20] sm:$0x3] }
  0xfe   : > { %v9482_v20 = vcombine.low %v2847_v14, %v2850_v52  ;;  %v4154_v6 = vor.u32 %v4153_v55, %v4150_v27  ;;  %v9474_v33 = vrot.slane %v9463_v15, 11  ;;  %v9647_v59 = vcombine.low %v4136_v47, %v4146_v23  ;;  %v9466_v14 = vld [vmem:[%s11813_s11 + $0x98] sm:$0x7] }
  0xff   : > { %v4164_v29 = vor.u32 %v4163_v10, %v4159_v44  ;;  %v4169_v21 = vrot.slane %v4167_v62, 5  ;;  %v2853_v61 = vrot.slane %v12884_v45, 7  ;;  %v2856_v54 = vrot.slane %v9464_v41, 7  ;;  %v13326_v45 = vpop.f32.mrb[4].mxu0  ;;  %v9637_v55 = vld [vmem:[%s11813_s11 + $0x78] sm:$0xf] }
 0x100   : > { %10679 = vmatprep.mubr.msk.bf16.mxu1 %vm564_vm2, %v9482_v20  ;;  %v4155_v1 = vrot.slane %v4154_v6, 4  ;;  %v4172_v46 = vshrl.u32 %v9634_v19, 16  ;;  %v4175_v43 = vshll.u32 %v9634_v19, 16  ;;  %10748 = vmatmul.mubr.msk.bf16.gmra.mrb[36].mxu0 %vm564_vm2, %v9647_v59  ;;  %v15027_v57 = vshll.u32 %v13316_v48, 16  ;;  %v13332_v7 = vpop.f32.mrb[5].mxu0 }
 0x101   : > { %v4165_v39 = vrot.slane %v4164_v29, 4  ;;  %v2854_v63 = vsel %vm11852_vm6, %v9474_v33, %v2853_v61  ;;  %v2855_v28 = vrot.slane %v2853_v61, 4  ;;  %v15028_v26 = vshrl.u32 %v13316_v48, 16  ;;  %v13344_v62 = vld [vmem:[%s11813_s11 + $0x7c] sm:$0xf]  ;;  %v13346_v19 = vpop.f32.mrb[6].mxu0 }
 0x102   : > { %v4160_v18 = vsel %vm12753_vm12, %v4155_v1, %v4159_v44  ;;  %v4174_v58 = vrot.slane %v4172_v46, 4  ;;  %v4177_v53 = vrot.slane %v4175_v43, 5  ;;  %v4183_v32 = vrot.slane %v15027_v57, 5 }
 0x103   : > { %v4170_v15 = vsel %vm12753_vm12, %v4165_v39, %v4169_v21  ;;  %v2857_v47 = vsel %vm11852_vm6, %v2855_v28, %v2856_v54  ;;  %v4191_v27 = vshll.u32 %v9636_v60, 16  ;;  %v4187_v10 = vrot.slane %v15028_v26, 4  ;;  %v9639_v21 = vld [vmem:[%s11813_s11 + $0x80] sm:$0x1]  ;;  %v13352_v54 = vpop.f32.mrb[7].mxu0 }
 0x104   : > { %v9648_v41 = vcombine.low %v4160_v18, %v4170_v15  ;;  %v9483_v52 = vcombine.low %v2854_v63, %v2857_v47  ;;  %v4178_v44 = vor.u32 %v4177_v53, %v4174_v58  ;;  %v9475_v20 = vrot.slane %v9465_v31, 11  ;;  %v9467_v39 = vld [vmem:[%s11813_s11 + $0x9c] sm:$0x8]  ;;  %v9468_v53 = vld [vmem:[%s11813_s11 + $0xa4] sm:$0x7] }
 0x105   : > { %v4193_v23 = vrot.slane %v4191_v27, 5  ;;  %v2860_v6 = vrot.slane %v12929_v12, 7  ;;  %v2863_v33 = vrot.slane %v9466_v14, 7  ;;  %v4188_v29 = vor.u32 %v4187_v10, %v4183_v32 }
 0x106   : > { %10751 = vmatprep.mubr.msk.bf16.mxu0 %vm564_vm2, %v9648_v41  ;;  %10680 = vmatmul.mubr.msk.bf16.gmra.mrb[8].mxu1 %vm564_vm2, %v9483_v52  ;;  %v4179_v59 = vrot.slane %v4178_v44, 4  ;;  %v4196_v61 = vshrl.u32 %v9637_v55, 16  ;;  %v4199_v1 = vshll.u32 %v9637_v55, 16  ;;  %v15023_v12 = vshll.u32 %v13344_v62, 16  ;;  %v9640_v55 = vld [vmem:[%s11813_s11 + $0x84] sm:$0xf] }
 0x107   : > { %v2861_v60 = vsel %vm11852_vm6, %v9475_v20, %v2860_v6  ;;  %v2862_v46 = vrot.slane %v2860_v6, 4  ;;  %v15024_v43 = vshrl.u32 %v13344_v62, 16  ;;  %v13359_v63 = vpop.f32.mrb[8].mxu0  ;;  %v4189_v31 = vrot.slane %v4188_v29, 4  ;;  %v13376_v20 = vld [vmem:[%s11813_s11 + $0x88] sm:$0xf] }
 0x108   : > { %v4184_v28 = vsel %vm12753_vm12, %v4179_v59, %v4183_v32  ;;  %v4198_v18 = vrot.slane %v4196_v61, 4  ;;  %v4201_v58 = vrot.slane %v4199_v1, 5  ;;  %v4207_v15 = vrot.slane %v15023_v12, 5  ;;  %v13371_v41 = vpop.f32.mrb[9].mxu0  ;;  %v9642_v61 = vld [vmem:[%s11813_s11 + $0x8c] sm:$0x1] }
 0x109   : > { %v2864_v14 = vsel %vm11852_vm6, %v2862_v46, %v2863_v33  ;;  %v4211_v47 = vrot.slane %v15024_v43, 4  ;;  %v4215_v27 = vshll.u32 %v9639_v21, 16  ;;  %v4194_v32 = vsel %vm12753_vm12, %v4189_v31, %v4193_v23  ;;  %v13378_v6 = vpop.f32.mrb[10].mxu0  ;;  %v9660_v31 = vld [vmem:[%s11813_s11 + $0x30] sm:$0xc] }
 0x10a   : > { %v9484_v52 = vcombine.low %v2861_v60, %v2864_v14  ;;  %v4202_v44 = vor.u32 %v4201_v58, %v4198_v18  ;;  %v9476_v10 = vrot.slane %v9467_v39, 11  ;;  %v9649_v33 = vcombine.low %v4184_v28, %v4194_v32  ;;  %v9661_v58 = vld [vmem:[%s11813_s11 + $0x38] sm:$0x3]  ;;  %v13389_v14 = vpop.f32.mrb[11].mxu0  ;;  %v13395_v32 = vld [vmem:[%s11813_s11 + $0x4] sm:$0xf] }
 0x10b   : > { %v4212_v59 = vor.u32 %v4211_v47, %v4207_v15  ;;  %v4217_v29 = vrot.slane %v4215_v27, 5  ;;  %v2867_v21 = vrot.slane %v12957_v34, 7  ;;  %v2870_v23 = vrot.slane %v9468_v53, 7  ;;  %v9662_v12 = vld [vmem:[%s11813_s11 + $0x3c] sm:$0xc] }
 0x10c   : > { %10683 = vmatprep.mubr.msk.bf16.mxu1 %vm564_vm2, %v9484_v52  ;;  %v4203_v1 = vrot.slane %v4202_v44, 4  ;;  %v4220_v46 = vshrl.u32 %v9640_v55, 16  ;;  %v4223_v60 = vshll.u32 %v9640_v55, 16  ;;  %10752 = vmatmul.mubr.msk.bf16.gmra.mrb[40].mxu0 %vm564_vm2, %v9649_v33  ;;  %v15025_v34 = vshll.u32 %v13376_v20, 16  ;;  %v9663_v43 = vld [vmem:[%s11813_s11 + $0x44] sm:$0x3] }
 0x10d   : > { %v4213_v39 = vrot.slane %v4212_v59, 4  ;;  %v2868_v28 = vsel %vm11852_vm6, %v9476_v10, %v2867_v21  ;;  %v2869_v18 = vrot.slane %v2867_v21, 4  ;;  %v15026_v55 = vshrl.u32 %v13376_v20, 16  ;;  %v6025_v59 = vld [vmem:[%s11813_s11] sm:$0xc] }
 0x10e   : > { %v4208_v53 = vsel %vm12753_vm12, %v4203_v1, %v4207_v15  ;;  %v4222_v47 = vrot.slane %v4220_v46, 4  ;;  %v4225_v27 = vrot.slane %v4223_v60, 5  ;;  %v4231_v10 = vrot.slane %v15025_v34, 5  ;;  %v6026_v21 = vld [vmem:[%s11813_s11 + $0x8] sm:$0x3] }
 0x10f   : > { %v4218_v52 = vsel %vm12753_vm12, %v4213_v39, %v4217_v29  ;;  %v2871_v44 = vsel %vm11852_vm6, %v2869_v18, %v2870_v23  ;;  %v4239_v33 = vshll.u32 %v9642_v61, 16  ;;  %v4235_v60 = vrot.slane %v15026_v55, 4  ;;  %v13409_v29 = vpop.f32.mrb[12].mxu0  ;;  %v6028_v34 = vld [vmem:[%s11813_s11 + $0x14] sm:$0x3] }
 0x110   : > { %v9650_v15 = vcombine.low %v4208_v53, %v4218_v52  ;;  %v9485_v1 = vcombine.low %v2868_v28, %v2871_v44  ;;  %v4226_v46 = vor.u32 %v4225_v27, %v4222_v47  ;;  %v4556_v23 = vsel %vm480_vm0, %v13168_v2, 0  ;;  %v13417_v28 = vld [vmem:[%s15017_s2 + $0x1c] sm:$0x3]  ;;  %v13422_v52 = vld [vmem:[%s11813_s11 + $0x10] sm:$0xf] }
 0x111   : > { %v4241_v30 = vrot.slane %v4239_v33, 5  ;;  %v9676_v39 = vrot.slane %v9660_v31, 10  ;;  %v4451_v61 = vrot.slane %v13177_v3, 6  ;;  %v4236_v53 = vor.u32 %v4235_v60, %v4231_v10  ;;  %v6027_v2 = vld [vmem:[%s11813_s11 + $0xc] sm:$0xc]  ;;  %10760 = vmatpush3.bf16.msra.mxu0 %v4556_v23 }
 0x112   : > { %10755 = vmatprep.mubr.msk.bf16.mxu0 %vm564_vm2, %v9650_v15  ;;  %10684 = vmatmul.mubr.msk.bf16.gmra.mrb[12].mxu1 %vm564_vm2, %v9485_v1  ;;  %v4227_v18 = vrot.slane %v4226_v46, 4  ;;  %v4454_v47 = vrot.slane %v9661_v58, 6  ;;  %v9870_v27 = vrot.slane %v6025_v59, 10  ;;  %v6067_v33 = vrot.slane %v13395_v32, 6  ;;  %v13429_v1 = vpop.f32.mrb[13].mxu0 }
 0x113   : > { %v4452_v31 = vsel %vm11816_vm5, %v9676_v39, %v4451_v61  ;;  %v4453_v44 = vrot.slane %v4451_v61, 4  ;;  %v6070_v15 = vrot.slane %v6026_v21, 6  ;;  %15060 = vst [vmem:[#allocation3_spill] sm:$0xff] %v13429_v1  ;;  %v4237_v59 = vrot.slane %v4236_v53, 4  ;;  %v9664_v23 = vld [vmem:[%s11813_s11 + $0x48] sm:$0xc]  ;;  %11546 = vmatprep.subr.msk.bf16.mxu0 %vm480_vm0, %v13417_v28 }
 0x114   : > { %v4232_v58 = vsel %vm12753_vm12, %v4227_v18, %v4231_v10  ;;  %v9677_v46 = vrot.slane %v9662_v12, 10  ;;  %v4458_v60 = vrot.slane %v13204_v50, 6  ;;  %v13437_v39 = vpop.f32.mrb[14].mxu0  ;;  %v6068_v61 = vsel %vm11816_vm5, %v9870_v27, %v6067_v33  ;;  %v9665_v53 = vld [vmem:[%s11813_s11 + $0x50] sm:$0x3] }
 0x115   : > { %15061 = vst [vmem:[#allocation4_spill] sm:$0xff] %v13437_v39  ;;  %v4455_v21 = vsel %vm11816_vm5, %v4453_v44, %v4454_v47  ;;  %v6069_v10 = vrot.slane %v6067_v33, 4  ;;  %v4461_v18 = vrot.slane %v9663_v43, 6  ;;  %v13445_v55 = vld [vmem:[%s11813_s11 + $0x1c] sm:$0xf]  ;;  %v4242_v12 = vsel %vm12753_vm12, %v4237_v59, %v4241_v30  ;;  %v13451_v16 = vpop.f32.mrb[15].mxu0 }
 0x116   : > { %v9685_v57 = vcombine.low %v4452_v31, %v4455_v21  ;;  %v4460_v26 = vrot.slane %v4458_v60, 4  ;;  %15062 = vst [vmem:[#allocation5_spill] sm:$0xff] %v13451_v16  ;;  %v9651_v47 = vcombine.low %v4232_v58, %v4242_v12  ;;  %v9871_v43 = vrot.slane %v6027_v2, 10  ;;  %v9666_v33 = vld [vmem:[%s11813_s11 + $0x54] sm:$0xc] }
 0x117   : > { %v6071_v27 = vsel %vm11816_vm5, %v6069_v10, %v6070_v15  ;;  %v6074_v44 = vrot.slane %v13422_v52, 6  ;;  %v4459_v30 = vsel %vm11816_vm5, %v9677_v46, %v4458_v60  ;;  %v6077_v59 = vrot.slane %v6028_v34, 6  ;;  %v9667_v21 = vld [vmem:[%s11813_s11 + $0x5c] sm:$0x3]  ;;  %v6031_v12 = vld [vmem:[%s11813_s11 + $0x24] sm:$0xc] }
 0x118   : > { %v9879_v40 = vcombine.low %v6068_v61, %v6071_v27  ;;  %v4462_v31 = vsel %vm11816_vm5, %v4460_v26, %v4461_v18  ;;  %10756 = vmatmul.mubr.msk.bf16.gmra.mrb[44].mxu0 %vm564_vm2, %v9651_v47  ;;  %v6328_v2 = vsel %vm480_vm0, %v13232_v24, 0  ;;  %v9678_v10 = vrot.slane %v9664_v23, 10  ;;  %v13468_v61 = vld [vmem:[%s11813_s11 + $0x28] sm:$0xf]  ;;  %v6032_v46 = vld [vmem:[%s11813_s11 + $0x2c] sm:$0x3] }
 0x119   : > { %v6075_v58 = vsel %vm11816_vm5, %v9871_v43, %v6074_v44  ;;  %v6076_v15 = vrot.slane %v6074_v44, 4  ;;  %10761 = vmatprep.mubr.msk.bf16.mxu0 %vm564_vm2, %v9685_v57  ;;  %v4465_v26 = vrot.slane %v13227_v9, 6  ;;  %v4468_v34 = vrot.slane %v9665_v53, 6  ;;  %v9668_v43 = vld [vmem:[%s11813_s11 + $0x60] sm:$0xc] }
 0x11a   : > { %10851 = vmatprep.mubr.msk.bf16.mxu1 %vm564_vm2, %v9879_v40  ;;  %v9872_v60 = vrot.slane %v6029_v37, 10  ;;  %v6081_v18 = vrot.slane %v13445_v55, 6  ;;  %v6084_v23 = vrot.slane %v6030_v51, 6  ;;  %v9679_v47 = vrot.slane %v9666_v33, 10  ;;  %v9669_v53 = vld [vmem:[%s11813_s11 + $0x68] sm:$0x3] }
 0x11b   : > { %v6078_v24 = vsel %vm11816_vm5, %v6076_v15, %v6077_v59  ;;  %v4472_v27 = vrot.slane %v13260_v38, 6  ;;  %v9686_v57 = vcombine.low %v4459_v30, %v4462_v31  ;;  %v4466_v40 = vsel %vm11816_vm5, %v9678_v10, %v4465_v26  ;;  %v13484_v37 = vld [vmem:[%s11813_s11 + $0x34] sm:$0xf]  ;;  %v13490_v51 = vld [vmem:[%s15017_s2 + $0x28] sm:$0x3] }
 0x11c   : > { %v9880_v44 = vcombine.low %v6075_v58, %v6078_v24  ;;  %v4467_v56 = vrot.slane %v4465_v26, 4  ;;  %v6082_v33 = vsel %vm11816_vm5, %v9872_v60, %v6081_v18  ;;  %v6083_v30 = vrot.slane %v6081_v18, 4  ;;  %v6034_v58 = vld [vmem:[%s11813_s11 + $0x38] sm:$0x3] }
 0x11d   : > { %v4474_v31 = vrot.slane %v4472_v27, 4  ;;  %v4475_v59 = vrot.slane %v9667_v21, 6  ;;  %v9873_v10 = vrot.slane %v6031_v12, 10  ;;  %v6088_v26 = vrot.slane %v13468_v61, 6 }
 0x11e   : > { %10852 = vmatmul.mubr.msk.bf16.vlgmr.msra.gmra.mrb[16].mxu1 %vm564_vm2, %v9880_v44  ;;  %v4469_v15 = vsel %vm11816_vm5, %v4467_v56, %v4468_v34  ;;  %v6091_v24 = vrot.slane %v6032_v46, 6  ;;  %v6085_v18 = vsel %vm11816_vm5, %v6083_v30, %v6084_v23  ;;  %v4473_v21 = vsel %vm11816_vm5, %v9679_v47, %v4472_v27  ;;  %v13510_v34 = vld [vmem:[%s11813_s11 + $0x40] sm:$0xf] }
 0x11f   : > { %10868 = vmatpush3.bf16.msra.mxu1 %v6328_v2  ;;  %v9687_v60 = vcombine.low %v4466_v40, %v4469_v15  ;;  %v9680_v44 = vrot.slane %v9668_v43, 10  ;;  %v9881_v35 = vcombine.low %v6082_v33, %v6085_v18  ;;  %v4476_v56 = vsel %vm11816_vm5, %v4474_v31, %v4475_v59  ;;  %v6035_v2 = vld [vmem:[%s11813_s11 + $0x3c] sm:$0xc]  ;;  %v6036_v40 = vld [vmem:[%s11813_s11 + $0x44] sm:$0x3] }
 0x120   : > { %v6089_v12 = vsel %vm11816_vm5, %v9873_v10, %v6088_v26  ;;  %v6090_v46 = vrot.slane %v6088_v26, 4  ;;  %11552 = vmatprep.subr.msk.bf16.mxu1 %vm480_vm0, %v13490_v51  ;;  %10762 = vmatmul.mubr.msk.bf16.vlgmr.msra.gmra.mrb[32].mxu0 %vm564_vm2, %v9686_v57  ;;  %v4479_v23 = vrot.slane %v13286_v17, 6  ;;  %v4482_v47 = vrot.slane %v9669_v53, 6  ;;  %v9672_v33 = vld [vmem:[%s11813_s11 + $0x78] sm:$0xc] }
 0x121   : > { %v9874_v27 = vrot.slane %v6033_v36, 10  ;;  %v6095_v43 = vrot.slane %v13484_v37, 6  ;;  %10765 = vmatprep.mubr.msk.bf16.mxu0 %vm564_vm2, %v9687_v60  ;;  %10855 = vmatprep.mubr.msk.bf16.mxu1 %vm564_vm2, %v9881_v35  ;;  %v6098_v57 = vrot.slane %v6034_v58, 6  ;;  %v9681_v31 = vrot.slane %v9670_v49, 10  ;;  %v9673_v26 = vld [vmem:[%s11813_s11 + $0x80] sm:$0x3] }
 0x122   : > { %v6092_v30 = vsel %vm11816_vm5, %v6090_v46, %v6091_v24  ;;  %v4486_v59 = vrot.slane %v13316_v48, 6  ;;  %v9688_v15 = vcombine.low %v4473_v21, %v4476_v56  ;;  %v4480_v36 = vsel %vm11816_vm5, %v9680_v44, %v4479_v23  ;;  %v13529_v18 = vld [vmem:[%s11813_s11 + $0x4c] sm:$0xf]  ;;  %v6037_v60 = vld [vmem:[%s11813_s11 + $0x48] sm:$0xc] }
 0x123   : > { %v9882_v53 = vcombine.low %v6089_v12, %v6092_v30  ;;  %v4481_v10 = vrot.slane %v4479_v23, 4  ;;  %v6096_v35 = vsel %vm11816_vm5, %v9874_v27, %v6095_v43  ;;  %v6097_v24 = vrot.slane %v6095_v43, 4  ;;  %v6038_v49 = vld [vmem:[%s11813_s11 + $0x50] sm:$0x3]  ;;  %v9675_v30 = vld [vmem:[%s11813_s11 + $0x8c] sm:$0x3] }
 0x124   : > { %v4488_v46 = vrot.slane %v4486_v59, 4  ;;  %v4489_v58 = vrot.slane %v9671_v4, 6  ;;  %v9875_v44 = vrot.slane %v6035_v2, 10  ;;  %v6102_v56 = vrot.slane %v13510_v34, 6 }
 0x125   : > { %v4483_v21 = vsel %vm11816_vm5, %v4481_v10, %v4482_v47  ;;  %v6105_v12 = vrot.slane %v6036_v40, 6  ;;  %v6099_v27 = vsel %vm11816_vm5, %v6097_v24, %v6098_v57  ;;  %v4487_v4 = vsel %vm11816_vm5, %v9681_v31, %v4486_v59  ;;  %v13550_v10 = vld [vmem:[%s11813_s11 + $0x58] sm:$0xf] }
 0x126   : > { %10856 = vmatmul.mubr.msk.bf16.gmra.mrb[20].mxu1 %vm564_vm2, %v9882_v53  ;;  %v9689_v23 = vcombine.low %v4480_v36, %v4483_v21  ;;  %v9682_v43 = vrot.slane %v9672_v33, 10  ;;  %v9883_v16 = vcombine.low %v6096_v35, %v6099_v27  ;;  %v4490_v47 = vsel %vm11816_vm5, %v4488_v46, %v4489_v58  ;;  %v6039_v53 = vld [vmem:[%s11813_s11 + $0x54] sm:$0xc]  ;;  %v6040_v58 = vld [vmem:[%s11813_s11 + $0x5c] sm:$0x3] }
 0x127   : > { %v6103_v2 = vsel %vm11816_vm5, %v9875_v44, %v6102_v56  ;;  %v6104_v40 = vrot.slane %v6102_v56, 4  ;;  %v4493_v36 = vrot.slane %v13344_v62, 6  ;;  %v4496_v57 = vrot.slane %v9673_v26, 6 }
 0x128   : > { %v9876_v24 = vrot.slane %v6037_v60, 10  ;;  %v6109_v33 = vrot.slane %v13529_v18, 6  ;;  %10766 = vmatmul.mubr.msk.bf16.gmra.mrb[36].mxu0 %vm564_vm2, %v9688_v15  ;;  %10859 = vmatprep.mubr.msk.bf16.mxu1 %vm564_vm2, %v9883_v16  ;;  %v6112_v59 = vrot.slane %v6038_v49, 6  ;;  %v9683_v35 = vrot.slane %v9674_v22, 10  ;;  %v9701_v16 = vld [vmem:[%s11813_s11 + $0x30] sm:$0x8] }
 0x129   : > { %v6106_v31 = vsel %vm11816_vm5, %v6104_v40, %v6105_v12  ;;  %v4500_v46 = vrot.slane %v13376_v20, 6  ;;  %10769 = vmatprep.mubr.msk.bf16.mxu0 %vm564_vm2, %v9689_v23  ;;  %v4494_v26 = vsel %vm11816_vm5, %v9682_v43, %v4493_v36  ;;  %v4495_v60 = vrot.slane %v4493_v36, 4  ;;  %v9702_v12 = vld [vmem:[%s11813_s11 + $0x38] sm:$0xf]  ;;  %v13578_v40 = vld [vmem:[%s15017_s2 + $0x1e] sm:$0x3] }
 0x12a   : > { %v9884_v21 = vcombine.low %v6103_v2, %v6106_v31  ;;  %v6110_v15 = vsel %vm11816_vm5, %v9876_v24, %v6109_v33  ;;  %v6111_v44 = vrot.slane %v6109_v33, 4  ;;  %v4503_v56 = vrot.slane %v9675_v30, 6 }
 0x12b   : > { %v13569_v49 = vsel %vm11816_vm5, %v9683_v35, %v4500_v46  ;;  %v4502_v22 = vrot.slane %v4500_v46, 4  ;;  %v4497_v23 = vsel %vm11816_vm5, %v4495_v60, %v4496_v57  ;;  %v9877_v27 = vrot.slane %v6039_v53, 10  ;;  %v9703_v53 = vld [vmem:[%s11813_s11 + $0x3c] sm:$0x8] }
 0x12c   : > { %v6116_v43 = vrot.slane %v13550_v10, 6  ;;  %v6119_v2 = vrot.slane %v6040_v58, 6  ;;  %v9690_v36 = vcombine.low %v4487_v4, %v4490_v47  ;;  %v6113_v24 = vsel %vm11816_vm5, %v6111_v44, %v6112_v59  ;;  %v6007_v47 = vld [vmem:[%s11813_s11] sm:$0xf] }
 0x12d   : > { %v13584_v30 = vsel %vm11816_vm5, %v4502_v22, %v4503_v56  ;;  %v4874_v57 = vsel %vm480_vm0, %v13417_v28, 0  ;;  %v9691_v33 = vcombine.low %v4494_v26, %v4497_v23  ;;  %v9885_v31 = vcombine.low %v6110_v15, %v6113_v24  ;;  %v9704_v15 = vld [vmem:[%s11813_s11 + $0x44] sm:$0xf]  ;;  %v13610_v24 = vld [vmem:[%s11813_s11 + $0xc] sm:$0xf] }
 0x12e   : > { %10860 = vmatmul.mubr.msk.bf16.gmra.mrb[24].mxu1 %vm564_vm2, %v9884_v21  ;;  %v6117_v35 = vsel %vm11816_vm5, %v9877_v27, %v6116_v43  ;;  %v6118_v4 = vrot.slane %v6116_v43, 4  ;;  %10778 = vmatpush3.bf16.msra.mxu0 %v4874_v57  ;;  %v9692_v59 = vcombine.low %v13569_v49, %v13584_v30  ;;  %v4688_v46 = vshrl.u32 %v9701_v16, 16 }
 0x12f   : > { %v15063_v58 = vshrl.u32 %v13177_v3, 16  ;;  %v4697_v60 = vshrl.u32 %v9702_v12, 16  ;;  %11547 = vmatprep.subr.msk.bf16.mxu0 %vm480_vm0, %v13578_v40  ;;  %10863 = vmatprep.mubr.msk.bf16.mxu1 %vm564_vm2, %v9885_v31  ;;  %v4700_v26 = vshll.u32 %v9702_v12, 16  ;;  %v4705_v44 = vshrl.u32 %v9703_v53, 16  ;;  %v9706_v31 = vld [vmem:[%s11813_s11 + $0x50] sm:$0xf] }
 0x130   : > { %v6120_v21 = vsel %vm11816_vm5, %v6118_v4, %v6119_v2  ;;  %v15064_v49 = vshrl.u32 %v13204_v50, 16  ;;  %10770 = vmatmul.mubr.msk.bf16.gmra.mrb[40].mxu0 %vm564_vm2, %v9690_v36  ;;  %v9717_v56 = vrot.slane %v4688_v46, 11  ;;  %v15065_v23 = vshll.u32 %v13177_v3, 16  ;;  %v9705_v2 = vld [vmem:[%s11813_s11 + $0x48] sm:$0x8] }
 0x131   : > { %v4692_v28 = vrot.slane %v15063_v58, 7  ;;  %v9886_v22 = vcombine.low %v6117_v35, %v6120_v21  ;;  %v9895_v43 = vcombine.low %v6007_v47, %v13395_v32  ;;  %10773 = vmatprep.mubr.msk.bf16.mxu0 %vm564_vm2, %v9691_v33  ;;  %v4699_v30 = vrot.slane %v4697_v60, 7  ;;  %v9707_v46 = vld [vmem:[%s11813_s11 + $0x54] sm:$0x8] }
 0x132   : > { %v4709_v16 = vrot.slane %v15064_v49, 7  ;;  %v9718_v57 = vrot.slane %v4705_v44, 11  ;;  %v15066_v53 = vshll.u32 %v13204_v50, 16  ;;  %v4714_v4 = vshrl.u32 %v9704_v15, 16  ;;  %v6011_v50 = vld [vmem:[%s11813_s11 + $0x18] sm:$0xf] }
 0x133   : > { %v4693_v27 = vor.u32 %v4692_v28, %v15065_v23  ;;  %v4695_v12 = vrot.slane %v4692_v28, 4  ;;  %v4717_v47 = vshll.u32 %v9704_v15, 16  ;;  %v4702_v58 = vor.u32 %v4700_v26, %v4699_v30 }
 0x134   : > { %v4710_v36 = vor.u32 %v4709_v16, %v15066_v53  ;;  %v4712_v35 = vrot.slane %v4709_v16, 4  ;;  %v9896_v28 = vcombine.low %v13610_v24, %v13422_v52  ;;  %v4722_v60 = vshrl.u32 %v9705_v2, 16  ;;  %v13634_v2 = vld [vmem:[%s11813_s11 + $0x24] sm:$0xf] }
 0x135   : > { %v4694_v3 = vsel %vm13014_vm15, %v9717_v56, %v4693_v27  ;;  %v4716_v21 = vrot.slane %v4714_v4, 7  ;;  %v6486_v44 = vsel %vm480_vm0, %v13490_v51, 0  ;;  %v15067_v49 = vshrl.u32 %v13227_v9, 16  ;;  %v9708_v56 = vld [vmem:[%s11813_s11 + $0x5c] sm:$0xf] }
 0x136   : > { %v4711_v33 = vsel %vm13014_vm15, %v9718_v57, %v4710_v36  ;;  %v4731_v16 = vshrl.u32 %v9706_v31, 16  ;;  %10864 = vmatmul.mubr.msk.bf16.gmra.mrb[28].mxu1 %vm564_vm2, %v9886_v22  ;;  %v4703_v26 = vsel %vm13014_vm15, %v4695_v12, %v4702_v58  ;;  %v9719_v23 = vrot.slane %v4722_v60, 11  ;;  %v9709_v4 = vld [vmem:[%s11813_s11 + $0x60] sm:$0x8] }
 0x137   : > { %v4726_v15 = vrot.slane %v15067_v49, 7  ;;  %v4734_v27 = vshll.u32 %v9706_v31, 16  ;;  %v4739_v24 = vshrl.u32 %v9707_v46, 16  ;;  %v9726_v30 = vcombine.low %v4694_v3, %v4703_v26  ;;  %10869 = vmatprep.mubr.msk.bf16.mxu1 %vm564_vm2, %v9895_v43  ;;  %v9710_v49 = vld [vmem:[%s11813_s11 + $0x68] sm:$0xf]  ;;  %v13641_v39 = vpop.f32.mrb[16].mxu0 }
 0x138   : > { %v4719_v51 = vor.u32 %v4717_v47, %v4716_v21  ;;  %v15068_v57 = vshll.u32 %v13227_v9, 16  ;;  %v4733_v22 = vrot.slane %v4731_v16, 7  ;;  %v15069_v12 = vshrl.u32 %v13260_v38, 16  ;;  %v13645_v58 = vpop.f32.mrb[17].mxu0  ;;  %10774 = vmatmul.mubr.msk.bf16.gmra.mrb[44].mxu0 %vm564_vm2, %v9692_v59 }
 0x139   : > { %v4729_v36 = vrot.slane %v4726_v15, 4  ;;  %v9720_v1 = vrot.slane %v4739_v24, 11  ;;  %v4748_v46 = vshrl.u32 %v9708_v56, 16  ;;  %v9897_v3 = vcombine.low %v6011_v50, %v13445_v55  ;;  %v13653_v60 = vpop.f32.mrb[18].mxu0  ;;  %10779 = vmatprep.mubr.msk.bf16.mxu0 %vm564_vm2, %v9726_v30 }
 0x13a   : > { %v4727_v53 = vor.u32 %v4726_v15, %v15068_v57  ;;  %v4743_v31 = vrot.slane %v15069_v12, 7  ;;  %v4720_v9 = vsel %vm13014_vm15, %v4712_v35, %v4719_v51  ;;  %v4751_v47 = vshll.u32 %v9708_v56, 16  ;;  %v13660_v26 = vpop.f32.mrb[19].mxu0  ;;  %v9711_v57 = vld [vmem:[%s11813_s11 + $0x6c] sm:$0x8] }
 0x13b   : > { %v4736_v21 = vor.u32 %v4734_v27, %v4733_v22  ;;  %v15070_v15 = vshll.u32 %v13260_v38, 16  ;;  %v9898_v35 = vcombine.low %v13634_v2, %v13468_v61  ;;  %v4756_v24 = vshrl.u32 %v9709_v4, 16  ;;  %v13670_v22 = vld [vmem:[%s11813_s11 + $0x30] sm:$0xf]  ;;  %v9712_v12 = vld [vmem:[%s11813_s11 + $0x74] sm:$0xf] }
 0x13c   : > { %v4728_v43 = vsel %vm13014_vm15, %v9719_v23, %v4727_v53  ;;  %v4746_v16 = vrot.slane %v4743_v31, 4  ;;  %v4750_v23 = vrot.slane %v4748_v46, 7  ;;  %v15071_v50 = vshrl.u32 %v13286_v17, 16 }
 0x13d   : > { %v4744_v59 = vor.u32 %v4743_v31, %v15070_v15  ;;  %v4765_v51 = vshrl.u32 %v9710_v49, 16  ;;  %v9727_v53 = vcombine.low %v4711_v33, %v4720_v9  ;;  %v4737_v27 = vsel %vm13014_vm15, %v4729_v36, %v4736_v21  ;;  %v13678_v33 = vld [vmem:[%s15017_s2 + $0x2a] sm:$0x3] }
 0x13e   : > { %v4760_v56 = vrot.slane %v15071_v50, 7  ;;  %v4768_v30 = vshll.u32 %v9710_v49, 16  ;;  %v9728_v31 = vcombine.low %v4728_v43, %v4737_v27  ;;  %v4753_v46 = vor.u32 %v4751_v47, %v4750_v23  ;;  %10870 = vmatmul.mubr.msk.bf16.vlgmr.msra.gmra.mrb[16].mxu1 %vm564_vm2, %v9896_v28  ;;  %v9713_v47 = vld [vmem:[%s11813_s11 + $0x78] sm:$0x8]  ;;  %v9714_v23 = vld [vmem:[%s11813_s11 + $0x80] sm:$0xf] }
 0x13f   : > { %v4745_v38 = vsel %vm13014_vm15, %v9720_v1, %v4744_v59  ;;  %v9721_v4 = vrot.slane %v4756_v24, 11  ;;  %v15072_v15 = vshll.u32 %v13286_v17, 16  ;;  %v4767_v1 = vrot.slane %v4765_v51, 7  ;;  %10886 = vmatpush3.bf16.msra.mxu1 %v6486_v44  ;;  %10873 = vmatprep.mubr.msk.bf16.mxu1 %vm564_vm2, %v9897_v3  ;;  %v13690_v24 = vpop.f32.mrb[20].mxu0  ;;  %v13697_v27 = vld [vmem:[%s11813_s11 + $0x3c] sm:$0xf] }
 0x140   : > { %v4763_v36 = vrot.slane %v4760_v56, 4  ;;  %v4773_v49 = vshrl.u32 %v9711_v57, 16  ;;  %v15073_v9 = vshrl.u32 %v13316_v48, 16  ;;  %v4754_v17 = vsel %vm13014_vm15, %v4746_v16, %v4753_v46  ;;  %11553 = vmatprep.subr.msk.bf16.mxu1 %vm480_vm0, %v13678_v33  ;;  %v13701_v16 = vpop.f32.mrb[21].mxu0  ;;  %10780 = vmatmul.mubr.msk.bf16.vlgmr.msra.gmra.mrb[32].mxu0 %vm564_vm2, %v9727_v53 }
 0x141   : > { %v4761_v50 = vor.u32 %v4760_v56, %v15072_v15  ;;  %v9899_v21 = vcombine.low %v13670_v22, %v13484_v37  ;;  %v4782_v59 = vshrl.u32 %v9712_v12, 16  ;;  %v4785_v28 = vshll.u32 %v9712_v12, 16  ;;  %10783 = vmatprep.mubr.msk.bf16.mxu0 %vm564_vm2, %v9728_v31 }
 0x142   : > { %v4777_v43 = vrot.slane %v15073_v9, 7  ;;  %v4770_v51 = vor.u32 %v4768_v30, %v4767_v1  ;;  %v9722_v57 = vrot.slane %v4773_v49, 11  ;;  %v15074_v44 = vshll.u32 %v13316_v48, 16  ;;  %v13705_v30 = vpop.f32.mrb[22].mxu0 }
 0x143   : > { %v4762_v56 = vsel %vm13014_vm15, %v9721_v4, %v4761_v50  ;;  %v9729_v22 = vcombine.low %v4745_v38, %v4754_v17  ;;  %v4784_v46 = vrot.slane %v4782_v59, 7  ;;  %v4790_v15 = vshrl.u32 %v9713_v47, 16  ;;  %v9715_v4 = vld [vmem:[%s11813_s11 + $0x84] sm:$0x8]  ;;  %15075 = vst [vmem:[#allocation6_spill] sm:$0xff] %v13705_v30  ;;  %v13715_v9 = vpop.f32.mrb[23].mxu0 }
 0x144   : > { %v4778_v3 = vor.u32 %v4777_v43, %v15074_v44  ;;  %v4780_v12 = vrot.slane %v4777_v43, 4  ;;  %v4771_v48 = vsel %vm13014_vm15, %v4763_v36, %v4770_v51  ;;  %v15076_v1 = vshrl.u32 %v13344_v62, 16  ;;  %v9716_v38 = vld [vmem:[%s11813_s11 + $0x8c] sm:$0xf]  ;;  %15077 = vst [vmem:[#allocation7_spill] sm:$0xff] %v13715_v9 }
 0x145   : > { %v4799_v53 = vshrl.u32 %v9714_v23, 16  ;;  %v9730_v43 = vcombine.low %v4762_v56, %v4771_v48  ;;  %v4787_v47 = vor.u32 %v4785_v28, %v4784_v46  ;;  %v9723_v17 = vrot.slane %v4790_v15, 11  ;;  %v9744_v15 = vld [vmem:[%s11813_s11 + $0x54] sm:$0xf] }
 0x146   : > { %v4779_v50 = vsel %vm13014_vm15, %v9722_v57, %v4778_v3  ;;  %v4794_v49 = vrot.slane %v15076_v1, 7  ;;  %v4802_v59 = vshll.u32 %v9714_v23, 16  ;;  %v15078_v36 = vshll.u32 %v13344_v62, 16  ;;  %v13722_v3 = vld [vmem:[%s11813_s11 + $0x48] sm:$0xf]  ;;  %10874 = vmatmul.mubr.msk.bf16.gmra.mrb[20].mxu1 %vm564_vm2, %v9898_v35 }
 0x147   : > { %v4801_v44 = vrot.slane %v4799_v53, 7  ;;  %v4788_v1 = vsel %vm13014_vm15, %v4780_v12, %v4787_v47  ;;  %v4807_v56 = vshrl.u32 %v9715_v4, 16  ;;  %v15079_v28 = vshrl.u32 %v13376_v20, 16  ;;  %v13738_v4 = vld [vmem:[%s11813_s11 + $0x54] sm:$0xf]  ;;  %10877 = vmatprep.mubr.msk.bf16.mxu1 %vm564_vm2, %v9899_v21 }
 0x148   : > { %v4795_v51 = vor.u32 %v4794_v49, %v15078_v36  ;;  %v4797_v57 = vrot.slane %v4794_v49, 4  ;;  %v4816_v46 = vshrl.u32 %v9716_v38, 16  ;;  %v13733_v62 = vcombine.low %v4779_v50, %v4788_v1  ;;  %v13741_v53 = vld [vmem:[%s11813_s11 + $0x58] sm:$0xf]  ;;  %v9746_v47 = vld [vmem:[%s11813_s11 + $0x5c] sm:$0x1]  ;;  %10784 = vmatmul.mubr.msk.bf16.gmra.mrb[36].mxu0 %vm564_vm2, %v9729_v22 }
 0x149   : > { %v4811_v23 = vrot.slane %v15079_v28, 7  ;;  %v4804_v49 = vor.u32 %v4802_v59, %v4801_v44  ;;  %v4819_v12 = vshll.u32 %v9716_v38, 16  ;;  %v9724_v36 = vrot.slane %v4807_v56, 11  ;;  %v9747_v1 = vld [vmem:[%s11813_s11 + $0x60] sm:$0xf]  ;;  %10787 = vmatprep.mubr.msk.bf16.mxu0 %vm564_vm2, %v9730_v43 }
 0x14a   : > { %v4796_v48 = vsel %vm13014_vm15, %v9723_v17, %v4795_v51  ;;  %v15080_v2 = vshll.u32 %v13376_v20, 16  ;;  %v4818_v50 = vrot.slane %v4816_v46, 7  ;;  %v13748_v17 = vpop.f32.mrb[24].mxu0  ;;  %v9901_v59 = vcombine.low %v13722_v3, %v13529_v18  ;;  %v13757_v44 = vld [vmem:[%s11813_s11 + $0x64] sm:$0xf] }
 0x14b   : > { %v4814_v35 = vrot.slane %v4811_v23, 4  ;;  %15081 = vst [vmem:[#allocation8_spill] sm:$0xff] %v13748_v17  ;;  %v4805_v38 = vsel %vm13014_vm15, %v4797_v57, %v4804_v49  ;;  %v5260_v21 = vsel %vm480_vm0, %v13578_v40, 0  ;;  %v5018_v51 = vshrl.u32 %v9744_v15, 16  ;;  %v13762_v20 = vld [vmem:[%s15017_s2 + $0x20] sm:$0x3] }
 0x14c   : > { %v4812_v28 = vor.u32 %v4811_v23, %v15080_v2  ;;  %v13764_v56 = vpop.f32.mrb[25].mxu0  ;;  %v9732_v23 = vcombine.low %v4796_v48, %v4805_v38  ;;  %v4821_v3 = vor.u32 %v4819_v12, %v4818_v50  ;;  %v5021_v46 = vshll.u32 %v9744_v15, 16  ;;  %v13770_v40 = vld [vmem:[%s11813_s11 + $0x8] sm:$0xf]  ;;  %10796 = vmatpush3.bf16.msra.mxu0 %v5260_v21  ;;  %v9750_v43 = vld [vmem:[%s11813_s11 + $0x6c] sm:$0xf] }
 0x14d   : > { %15082 = vst [vmem:[#allocation9_spill] sm:$0xff] %v13764_v56  ;;  %v9749_v49 = vld [vmem:[%s11813_s11 + $0x68] sm:$0x1]  ;;  %v13773_v2 = vpop.f32.mrb[26].mxu0  ;;  %v5020_v31 = vrot.slane %v5018_v51, 4  ;;  %v15039_v22 = vshll.u32 %v13741_v53, 16  ;;  %v9902_v12 = vcombine.low %v13738_v4, %v13550_v10  ;;  %11548 = vmatprep.subr.msk.bf16.mxu0 %vm480_vm0, %v13762_v20  ;;  %v15085_v56 = vcombine.low %v13697_v27, %v13510_v34 }
 0x14e   : > { %v4813_v57 = vsel %vm13014_vm15, %v9724_v36, %v4812_v28  ;;  %15083 = vst [vmem:[#allocation10_spill] sm:$0xff] %v13773_v2  ;;  %v15041_v48 = vshrl.u32 %v13741_v53, 16  ;;  %v5037_v38 = vshll.u32 %v9746_v47, 16  ;;  %v13778_v36 = vpop.f32.mrb[27].mxu0  ;;  %v4822_v15 = vsel %vm13014_vm15, %v4814_v35, %v4821_v3  ;;  %v13785_v2 = vld [vmem:[%s11813_s11 + $0x14] sm:$0xf] }
 0x14f   : > { %15084 = vst [vmem:[#allocation11_spill] sm:$0xff] %v13778_v36  ;;  %v5023_v28 = vrot.slane %v5021_v46, 5  ;;  %v5042_v50 = vshrl.u32 %v9747_v1, 16  ;;  %v13790_v21 = vcombine.low %v4813_v57, %v4822_v15  ;;  %v5029_v47 = vrot.slane %v15039_v22, 5  ;;  %v13797_v3 = vld [vmem:[%s11813_s11 + $0x70] sm:$0xf]  ;;  %10878 = vmatmul.mubr.msk.bf16.gmra.mrb[24].mxu1 %vm564_vm2, %v15085_v56 }
 0x150   : > { %v5033_v51 = vrot.slane %v15041_v48, 4  ;;  %v5039_v35 = vrot.slane %v5037_v38, 5  ;;  %v5045_v46 = vshll.u32 %v9747_v1, 16  ;;  %v15040_v36 = vshll.u32 %v13757_v44, 16  ;;  %10881 = vmatprep.mubr.msk.bf16.mxu1 %vm564_vm2, %v9901_v59  ;;  %v13813_v56 = vpop.f32.mrb[28].mxu0  ;;  %10788 = vmatmul.mubr.msk.bf16.gmra.mrb[40].mxu0 %vm564_vm2, %v13733_v62 }
 0x151   : > { %v5024_v10 = vor.u32 %v5023_v28, %v5020_v31  ;;  %v5044_v4 = vrot.slane %v5042_v50, 4  ;;  %v9912_v15 = vcombine.low %v13395_v32, %v13770_v40  ;;  %v15042_v38 = vshrl.u32 %v13757_v44, 16  ;;  %v9752_v50 = vld [vmem:[%s11813_s11 + $0x74] sm:$0x1]  ;;  %15086 = vst [vmem:[#allocation12_spill] sm:$0xff] %v13813_v56  ;;  %10791 = vmatprep.mubr.msk.bf16.mxu0 %vm564_vm2, %v9732_v23 }
 0x152   : > { %v5034_v57 = vor.u32 %v5033_v51, %v5029_v47  ;;  %v5061_v22 = vshll.u32 %v9749_v49, 16  ;;  %v5047_v28 = vrot.slane %v5045_v46, 5  ;;  %v5053_v1 = vrot.slane %v15040_v36, 5  ;;  %v9753_v59 = vld [vmem:[%s11813_s11 + $0x78] sm:$0xf] }
 0x153   : > { %v5025_v31 = vrot.slane %v5024_v10, 4  ;;  %v5057_v32 = vrot.slane %v15042_v38, 4  ;;  %v5066_v49 = vshrl.u32 %v9750_v43, 16  ;;  %v13818_v10 = vpop.f32.mrb[29].mxu0  ;;  %v5069_v48 = vshll.u32 %v9750_v43, 16 }
 0x154   : > { %v5035_v51 = vrot.slane %v5034_v57, 4  ;;  %v5063_v40 = vrot.slane %v5061_v22, 5  ;;  %15087 = vst [vmem:[#allocation13_spill] sm:$0xff] %v13818_v10  ;;  %v5048_v36 = vor.u32 %v5047_v28, %v5044_v4  ;;  %v5075_v57 = vshll.u32 %v13797_v3, 16  ;;  %v13825_v27 = vpop.f32.mrb[30].mxu0 }
 0x155   : > { %v5030_v46 = vsel %vm12753_vm12, %v5025_v31, %v5029_v47  ;;  %15088 = vst [vmem:[#allocation14_spill] sm:$0xff] %v13825_v27  ;;  %v5058_v38 = vor.u32 %v5057_v32, %v5053_v1  ;;  %v5068_v10 = vrot.slane %v5066_v49, 4  ;;  %v5079_v62 = vshrl.u32 %v13797_v3, 16  ;;  %v13832_v56 = vld [vmem:[%s11813_s11 + $0x20] sm:$0xf]  ;;  %v13837_v43 = vpop.f32.mrb[31].mxu0 }
 0x156   : > { %v5040_v22 = vsel %vm12753_vm12, %v5035_v51, %v5039_v35  ;;  %v13835_v47 = vld [vmem:[%s11813_s11 + $0x7c] sm:$0xf]  ;;  %15089 = vst [vmem:[#allocation15_spill] sm:$0xff] %v13837_v43  ;;  %v5049_v4 = vrot.slane %v5048_v36, 4  ;;  %v6684_v31 = vsel %vm480_vm0, %v13678_v33, 0  ;;  %v5071_v23 = vrot.slane %v5069_v48, 5 }
 0x157   : > { %v5077_v35 = vrot.slane %v5075_v57, 5  ;;  %v9755_v28 = vld [vmem:[%s11813_s11 + $0x80] sm:$0x1]  ;;  %v9769_v51 = vcombine.low %v5030_v46, %v5040_v22  ;;  %v5059_v32 = vrot.slane %v5058_v38, 4  ;;  %v5081_v49 = vrot.slane %v5079_v62, 4  ;;  %10882 = vmatmul.mubr.msk.bf16.gmra.mrb[28].mxu1 %vm564_vm2, %v9902_v12 }
 0x158   : > { %v5085_v27 = vshll.u32 %v9752_v50, 16  ;;  %v9756_v17 = vld [vmem:[%s11813_s11 + $0x84] sm:$0xf]  ;;  %v5054_v43 = vsel %vm12753_vm12, %v5049_v4, %v5053_v1  ;;  %v5072_v36 = vor.u32 %v5071_v23, %v5068_v10  ;;  %v5090_v9 = vshrl.u32 %v9753_v59, 16  ;;  %v13850_v33 = vld [vmem:[%s11813_s11 + $0x2c] sm:$0xf]  ;;  %10887 = vmatprep.mubr.msk.bf16.mxu1 %vm564_vm2, %v9912_v15  ;;  %10792 = vmatmul.mubr.msk.bf16.gmra.mrb[44].mxu0 %vm564_vm2, %v13790_v21 }
 0x159   : > { %v5093_v30 = vshll.u32 %v9753_v59, 16  ;;  %v5064_v48 = vsel %vm12753_vm12, %v5059_v32, %v5063_v40  ;;  %v5082_v46 = vor.u32 %v5081_v49, %v5077_v35  ;;  %v15045_v22 = vshll.u32 %v13835_v47, 16  ;;  %v13857_v50 = vld [vmem:[%s11813_s11 + $0x88] sm:$0xf]  ;;  %10797 = vmatprep.mubr.msk.bf16.mxu0 %vm564_vm2, %v9769_v51 }
 0x15a   : > { %v5087_v38 = vrot.slane %v5085_v27, 5  ;;  %v5073_v1 = vrot.slane %v5072_v36, 4  ;;  %v9914_v59 = vcombine.low %v13445_v55, %v13832_v56  ;;  %v5092_v10 = vrot.slane %v5090_v9, 4  ;;  %v13885_v36 = vld [vmem:[%s11813_s11 + $0x94] sm:$0xf] }
 0x15b   : > { %v5095_v4 = vrot.slane %v5093_v30, 5  ;;  %v5083_v12 = vrot.slane %v5082_v46, 4  ;;  %v13864_v40 = vrot.slane %v15045_v22, 5  ;;  %v15046_v27 = vshrl.u32 %v13835_v47, 16  ;;  %v9758_v30 = vld [vmem:[%s11813_s11 + $0x8c] sm:$0x1] }
 0x15c   : > { %v5109_v23 = vshll.u32 %v9755_v28, 16  ;;  %v13869_v15 = vcombine.low %v5054_v43, %v5064_v48  ;;  %v5078_v55 = vsel %vm12753_vm12, %v5073_v1, %v5077_v35  ;;  %v5114_v56 = vshrl.u32 %v9756_v17, 16  ;;  %v13882_v43 = vld [vmem:[%s11813_s11 + $0x90] sm:$0xf] }
 0x15d   : > { %v5096_v9 = vor.u32 %v5095_v4, %v5092_v10  ;;  %v5088_v32 = vsel %vm12753_vm12, %v5083_v12, %v5087_v38  ;;  %v5105_v49 = vrot.slane %v15046_v27, 4  ;;  %v9915_v28 = vcombine.low %v13468_v61, %v13850_v33  ;;  %v14082_v27 = vld [vmem:[%s11813_s11 + $0xa0] sm:$0xf] }
 0x15e   : > { %v5117_v21 = vshll.u32 %v9756_v17, 16  ;;  %v13889_v48 = vrot.slane %v5109_v23, 5  ;;  %v5116_v46 = vrot.slane %v5114_v56, 4  ;;  %v15043_v51 = vshll.u32 %v13857_v50, 16 }
 0x15f   : > { %v13887_v35 = vrot.slane %v5096_v9, 4  ;;  %v5106_v38 = vor.u32 %v5105_v49, %v13864_v40  ;;  %v15044_v10 = vshrl.u32 %v13857_v50, 16  ;;  %v5133_v4 = vshll.u32 %v9758_v30, 16  ;;  %v13907_v9 = vld [vmem:[%s15017_s2 + $0x2c] sm:$0x3] }
 0x160   : > { %v5119_v1 = vrot.slane %v5117_v21, 5  ;;  %v13894_v17 = vcombine.low %v5078_v55, %v5088_v32  ;;  %v13902_v23 = vrot.slane %v15043_v51, 5  ;;  %v15090_v30 = vcombine.low %v13422_v52, %v13785_v2  ;;  %v13922_v21 = vld [vmem:[%s11813_s11 + $0x38] sm:$0xf]  ;;  %10798 = vmatmul.mubr.msk.bf16.vlgmr.msra.gmra.mrb[32].mxu0 %vm564_vm2, %v13869_v15 }
 0x161   : > { %v5102_v12 = vsel %vm12753_vm12, %v13887_v35, %v13864_v40  ;;  %v13913_v55 = vrot.slane %v5106_v38, 4  ;;  %v13917_v32 = vrot.slane %v15044_v10, 4  ;;  %v13919_v49 = vrot.slane %v5133_v4, 5  ;;  %v13926_v51 = vld [vmem:[%s11813_s11 + $0x98] sm:$0x1] }
 0x162   : > { %10888 = vmatmul.mubr.msk.bf16.vlgmr.msra.gmra.mrb[16].mxu1 %vm564_vm2, %v15090_v30  ;;  %v5120_v56 = vor.u32 %v5119_v1, %v5116_v46  ;;  %v5138_v52 = vshrl.u32 %v13882_v43, 16  ;;  %v5141_v2 = vshll.u32 %v13882_v43, 16  ;;  %v15047_v38 = vshll.u32 %v13885_v36, 16  ;;  %v9762_v30 = vld [vmem:[%s11813_s11 + $0x9c] sm:$0xf]  ;;  %10801 = vmatprep.mubr.msk.bf16.mxu0 %vm564_vm2, %v13894_v17 }
 0x163   : > { %10904 = vmatpush3.bf16.msra.mxu1 %v6684_v31  ;;  %10891 = vmatprep.mubr.msk.bf16.mxu1 %vm564_vm2, %v9914_v59  ;;  %v5112_v46 = vsel %vm12753_vm12, %v13913_v55, %v13889_v48  ;;  %v5130_v31 = vor.u32 %v13917_v32, %v13902_v23  ;;  %v11689_v4 = vmov 0.0   ;;  %v15048_v59 = vshrl.u32 %v13885_v36, 16 }
 0x164   : > { %v13935_v1 = vrot.slane %v5120_v56, 4  ;;  %351 = vst.msk [vmem:[#allocation2 + $0x10] sm:$0xff] %vm348_vm1, %v11689_v4  ;;  %349 = vst.msk [vmem:[#allocation2] sm:$0xff] %vm348_vm1, %v11689_v4  ;;  %11554 = vmatprep.subr.msk.bf16.mxu1 %vm480_vm0, %v13907_v9  ;;  %v9916_v56 = vcombine.low %v13484_v37, %v13922_v21  ;;  %v5140_v10 = vrot.slane %v5138_v52, 4  ;;  %v5143_v22 = vrot.slane %v5141_v2, 5 }
 0x165   : > { %350 = vst.msk [vmem:[#allocation2 + $0x8] sm:$0xff] %vm348_vm1, %v11689_v4  ;;  %352 = vst.msk [vmem:[#allocation2 + $0x18] sm:$0xff] %vm348_vm1, %v11689_v4  ;;  %v9772_v37 = vcombine.low %v5102_v12, %v5112_v46  ;;  %v5131_v15 = vrot.slane %v5130_v31, 4  ;;  %v5153_v43 = vrot.slane %v15048_v59, 4  ;;  %v5157_v17 = vshll.u32 %v13926_v51, 16 }
 0x166   : > { %353 = vst.msk [vmem:[#allocation2 + $0x20] sm:$0xff] %vm348_vm1, %v11689_v4  ;;  %354 = vst.msk [vmem:[#allocation2 + $0x28] sm:$0xff] %vm348_vm1, %v11689_v4  ;;  %v14103_v21 = vld [vmem:[%s11813_s11 + $0x44] sm:$0xf]  ;;  %v5126_v48 = vsel %vm12753_vm12, %v13935_v1, %v13902_v23  ;;  %v5144_v55 = vor.u32 %v5143_v22, %v5140_v10  ;;  %v5162_v52 = vshrl.u32 %v9762_v30, 16  ;;  %v5165_v40 = vshll.u32 %v9762_v30, 16 }
 0x167   : > { %355 = vst.msk [vmem:[#allocation2 + $0x30] sm:$0xff] %vm348_vm1, %v11689_v4  ;;  %356 = vst.msk [vmem:[#allocation2 + $0x38] sm:$0xff] %vm348_vm1, %v11689_v4  ;;  %v5136_v35 = vsel %vm12753_vm12, %v5131_v15, %v13919_v49  ;;  %v5159_v32 = vrot.slane %v5157_v17, 5  ;;  %v9764_v2 = vld [vmem:[%s11813_s11 + $0xa4] sm:$0x1]  ;;  %v5171_v51 = vshll.u32 %v14082_v27, 16 }
 0x168   : > { %357 = vst.msk [vmem:[#allocation2 + $0x40] sm:$0xff] %vm348_vm1, %v11689_v4  ;;  %358 = vst.msk [vmem:[#allocation2 + $0x48] sm:$0xff] %vm348_vm1, %v11689_v4  ;;  %v9765_v46 = vld [vmem:[%s11813_s11 + $0xa8] sm:$0xf]  ;;  %v5145_v31 = vrot.slane %v5144_v55, 4  ;;  %v5164_v59 = vrot.slane %v5162_v52, 4  ;;  %v9773_v22 = vcombine.low %v5126_v48, %v5136_v35  ;;  %10802 = vmatmul.mubr.msk.bf16.gmra.mrb[36].mxu0 %vm564_vm2, %v9772_v37 }
 0x169   : > { %359 = vst.msk [vmem:[#allocation2 + $0x50] sm:$0xff] %vm348_vm1, %v11689_v4  ;;  %360 = vst.msk [vmem:[#allocation2 + $0x58] sm:$0xff] %vm348_vm1, %v11689_v4  ;;  %v5167_v23 = vrot.slane %v5165_v40, 5  ;;  %v14123_v49 = vrot.slane %v5171_v51, 5  ;;  %v5175_v1 = vshrl.u32 %v14082_v27, 16  ;;  %v5186_v17 = vshrl.u32 %v9765_v46, 16 }
 0x16a   : > { %361 = vst.msk [vmem:[#allocation2 + $0x60] sm:$0xff] %vm348_vm1, %v11689_v4  ;;  %362 = vst.msk [vmem:[#allocation2 + $0x68] sm:$0xff] %vm348_vm1, %v11689_v4  ;;  %10892 = vmatmul.mubr.msk.bf16.gmra.mrb[20].mxu1 %vm564_vm2, %v9915_v28  ;;  %v6433_v30 = vld [vmem:[%s11813_s11 + $0x50] sm:$0xf]  ;;  %v5181_v28 = vshll.u32 %v9764_v2, 16  ;;  %10805 = vmatprep.mubr.msk.bf16.mxu0 %vm564_vm2, %v9773_v22  ;;  %v5189_v37 = vshll.u32 %v9765_v46, 16 }
 0x16b   : > { %363 = vst.msk [vmem:[#allocation2 + $0x70] sm:$0xff] %vm348_vm1, %v11689_v4  ;;  %364 = vst.msk [vmem:[#allocation2 + $0x78] sm:$0xff] %vm348_vm1, %v11689_v4  ;;  %10895 = vmatprep.mubr.msk.bf16.mxu1 %vm564_vm2, %v9916_v56  ;;  %v5168_v33 = vor.u32 %v5167_v23, %v5164_v59  ;;  %v14136_v35 = vld [vmem:[%s11813_s11 + $0xac] sm:$0xf]  ;;  %v9767_v2 = vld [vmem:[%s11813_s11 + $0xb0] sm:$0x1] }
 0x16c   : > { %365 = vst.msk [vmem:[#allocation2 + $0x80] sm:$0xff] %vm348_vm1, %v11689_v4  ;;  %366 = vst.msk [vmem:[#allocation2 + $0x88] sm:$0xff] %vm348_vm1, %v11689_v4  ;;  %v416_v61 = vld [vmem:[#allocation2 + $0x18] sm:$0xff]  ;;  %v414_v56 = vld [vmem:[#allocation2 + $0x8] sm:$0xff]  ;;  %v5183_v23 = vrot.slane %v5181_v28, 5  ;;  %v5195_v22 = vshll.u32 %v14136_v35, 16 }
 0x16d   : > { %367 = vst.msk [vmem:[#allocation2 + $0x90] sm:$0xff] %vm348_vm1, %v11689_v4  ;;  %368 = vst.msk [vmem:[#allocation2 + $0x98] sm:$0xff] %vm348_vm1, %v11689_v4  ;;  %v693_v52 = vadd.f32 %v13294_v5, %v416_v61  ;;  %v5169_v59 = vrot.slane %v5168_v33, 4  ;;  %v5205_v46 = vshll.u32 %v9767_v2, 16  ;;  %v9786_v61 = vld [vmem:[%s11813_s11 + $0x5c] sm:$0x3] }
 0x16e   : > { %369 = vst.msk [vmem:[#allocation2 + $0xa0] sm:$0xff] %vm348_vm1, %v11689_v4  ;;  %370 = vst.msk [vmem:[#allocation2 + $0xa8] sm:$0xff] %vm348_vm1, %v11689_v4  ;;  %v419_v40 = vld [vmem:[#allocation2 + $0x30] sm:$0xff]  ;;  %v5197_v28 = vrot.slane %v5195_v22, 5  ;;  %v9788_v2 = vld [vmem:[%s11813_s11 + $0x68] sm:$0x3] }
 0x16f   : > { %371 = vst.msk [vmem:[#allocation2 + $0xb0] sm:$0xff] %vm348_vm1, %v11689_v4  ;;  %372 = vst.msk [vmem:[#allocation2 + $0xb8] sm:$0xff] %vm348_vm1, %v11689_v4  ;;  %v696_v5 = vadd.f32 %v13326_v45, %v419_v40  ;;  %v5191_v45 = vrot.slane %v5189_v37, 5  ;;  %vm8044_vm3 = vcmask 1043456  }
 0x170   : > { %373 = vst.msk [vmem:[#allocation2 + $0xc0] sm:$0xff] %vm348_vm1, %v11689_v4  ;;  %374 = vst.msk [vmem:[#allocation2 + $0xc8] sm:$0xff] %vm348_vm1, %v11689_v4  ;;  %v424_v37 = vld [vmem:[#allocation2 + $0x58] sm:$0xff] }
 0x171   : > { %375 = vst.msk [vmem:[#allocation2 + $0xd0] sm:$0xff] %vm348_vm1, %v11689_v4  ;;  %376 = vst.msk [vmem:[#allocation2 + $0xd8] sm:$0xff] %vm348_vm1, %v11689_v4 }
 0x172   : > { %377 = vst.msk [vmem:[#allocation2 + $0xe0] sm:$0xff] %vm348_vm1, %v11689_v4  ;;  %378 = vst.msk [vmem:[#allocation2 + $0xe8] sm:$0xff] %vm348_vm1, %v11689_v4 }
 0x173   : > { %379 = vst.msk [vmem:[#allocation2 + $0xf0] sm:$0xff] %vm348_vm1, %v11689_v4  ;;  %380 = vst.msk [vmem:[#allocation2 + $0xf8] sm:$0xff] %vm348_vm1, %v11689_v4 }
 0x174   : > { %381 = vst.msk [vmem:[#allocation2 + $0x100] sm:$0xff] %vm348_vm1, %v11689_v4  ;;  %382 = vst.msk [vmem:[#allocation2 + $0x108] sm:$0xff] %vm348_vm1, %v11689_v4 }
 0x175   : > { %383 = vst.msk [vmem:[#allocation2 + $0x110] sm:$0xff] %vm348_vm1, %v11689_v4  ;;  %384 = vst.msk [vmem:[#allocation2 + $0x118] sm:$0xff] %vm348_vm1, %v11689_v4 }
 0x176   : > { %385 = vst.msk [vmem:[#allocation2 + $0x120] sm:$0xff] %vm348_vm1, %v11689_v4  ;;  %386 = vst.msk [vmem:[#allocation2 + $0x128] sm:$0xff] %vm348_vm1, %v11689_v4 }
 0x177   : > { %387 = vst.msk [vmem:[#allocation2 + $0x130] sm:$0xff] %vm348_vm1, %v11689_v4  ;;  %388 = vst.msk [vmem:[#allocation2 + $0x138] sm:$0xff] %vm348_vm1, %v11689_v4 }
 0x178   : > { %389 = vst.msk [vmem:[#allocation2 + $0x140] sm:$0xff] %vm348_vm1, %v11689_v4  ;;  %390 = vst.msk [vmem:[#allocation2 + $0x148] sm:$0xff] %vm348_vm1, %v11689_v4 }
 0x179   : > { %391 = vst.msk [vmem:[#allocation2 + $0x150] sm:$0xff] %vm348_vm1, %v11689_v4  ;;  %392 = vst.msk [vmem:[#allocation2 + $0x158] sm:$0xff] %vm348_vm1, %v11689_v4 }
 0x17a   : > { %393 = vst.msk [vmem:[#allocation2 + $0x160] sm:$0xff] %vm348_vm1, %v11689_v4  ;;  %394 = vst.msk [vmem:[#allocation2 + $0x168] sm:$0xff] %vm348_vm1, %v11689_v4 }
 0x17b   : > { %395 = vst.msk [vmem:[#allocation2 + $0x170] sm:$0xff] %vm348_vm1, %v11689_v4  ;;  %396 = vst.msk [vmem:[#allocation2 + $0x178] sm:$0xff] %vm348_vm1, %v11689_v4 }
 0x17c   : > { %397 = vst.msk [vmem:[#allocation2 + $0x180] sm:$0xff] %vm348_vm1, %v11689_v4  ;;  %398 = vst.msk [vmem:[#allocation2 + $0x188] sm:$0xff] %vm348_vm1, %v11689_v4 }
 0x17d   : > { %399 = vst.msk [vmem:[#allocation2 + $0x190] sm:$0xff] %vm348_vm1, %v11689_v4  ;;  %400 = vst.msk [vmem:[#allocation2 + $0x198] sm:$0xff] %vm348_vm1, %v11689_v4 }
 0x17e   : > { %401 = vst.msk [vmem:[#allocation2 + $0x1a0] sm:$0xff] %vm348_vm1, %v11689_v4  ;;  %402 = vst.msk [vmem:[#allocation2 + $0x1a8] sm:$0xff] %vm348_vm1, %v11689_v4 }
 0x17f   : > { %403 = vst.msk [vmem:[#allocation2 + $0x1b0] sm:$0xff] %vm348_vm1, %v11689_v4  ;;  %404 = vst.msk [vmem:[#allocation2 + $0x1b8] sm:$0xff] %vm348_vm1, %v11689_v4 }
 0x180   : > { %405 = vst.msk [vmem:[#allocation2 + $0x1c0] sm:$0xff] %vm348_vm1, %v11689_v4  ;;  %406 = vst.msk [vmem:[#allocation2 + $0x1c8] sm:$0xff] %vm348_vm1, %v11689_v4 }
 0x181   : > { %407 = vst.msk [vmem:[#allocation2 + $0x1d0] sm:$0xff] %vm348_vm1, %v11689_v4  ;;  %408 = vst.msk [vmem:[#allocation2 + $0x1d8] sm:$0xff] %vm348_vm1, %v11689_v4 }
 0x182   : > { %409 = vst.msk [vmem:[#allocation2 + $0x1e0] sm:$0xff] %vm348_vm1, %v11689_v4  ;;  %410 = vst.msk [vmem:[#allocation2 + $0x1e8] sm:$0xff] %vm348_vm1, %v11689_v4 }
 0x183   : > { %411 = vst.msk [vmem:[#allocation2 + $0x1f0] sm:$0xff] %vm348_vm1, %v11689_v4  ;;  %412 = vst.msk [vmem:[#allocation2 + $0x1f8] sm:$0xff] %vm348_vm1, %v11689_v4  ;;  %v5149_v4 = vrot.slane %v15047_v38, 5  ;;  %v9917_v38 = vcombine.low %v13510_v34, %v14103_v21  ;;  %v415_v34 = vld [vmem:[#allocation2 + $0x10] sm:$0xff] }
 0x184   : > { %v692_v21 = vadd.f32 %v13274_v0, %v415_v34  ;;  %v9918_v0 = vcombine.low %v13529_v18, %v6433_v30  ;;  %710 = vst.msk [vmem:[#allocation2 + $0x18] sm:$0xff] %vm348_vm1, %v693_v52  ;;  %v418_v30 = vld [vmem:[#allocation2 + $0x28] sm:$0xff]  ;;  %v5174_v34 = vsel %vm12753_vm12, %v5169_v59, %v14123_v49  ;;  %713 = vst.msk [vmem:[#allocation2 + $0x30] sm:$0xff] %vm348_vm1, %v696_v5  ;;  %v6434_v52 = vld [vmem:[%s11813_s11 + $0x5c] sm:$0xf]  ;;  %v5417_v59 = vrot.slane %v13741_v53, 6 }
 0x185   : > { %v5154_v12 = vor.u32 %v5153_v43, %v5149_v4  ;;  %v5150_v15 = vsel %vm12753_vm12, %v5145_v31, %v5149_v4  ;;  %v413_v43 = vld [vmem:[#allocation2] sm:$0xff]  ;;  %v691_v4 = vadd.f32 %v13301_v8, %v414_v56  ;;  %v5188_v8 = vrot.slane %v5186_v17, 4  ;;  %v420_v31 = vld [vmem:[#allocation2 + $0x38] sm:$0xff]  ;;  %10896 = vmatmul.mubr.msk.bf16.gmra.mrb[24].mxu1 %vm564_vm2, %v9917_v38 }
 0x186   : > { %v690_v55 = vadd.f32 %v13288_v11, %v413_v43  ;;  %709 = vst.msk [vmem:[#allocation2 + $0x10] sm:$0xff] %vm348_vm1, %v692_v21  ;;  %v9785_v43 = vld [vmem:[%s11813_s11 + $0x54] sm:$0xc]  ;;  %v697_v21 = vadd.f32 %v13346_v19, %v420_v31  ;;  %v695_v56 = vadd.f32 %v13352_v54, %v418_v30  ;;  %v5522_v19 = vsel %vm480_vm0, %v13762_v20, 0  ;;  %10899 = vmatprep.mubr.msk.bf16.mxu1 %vm564_vm2, %v9918_v0  ;;  %v11648_v31 = vld [vmem:[%s11813_s11 + $0x58] sm:$0xf] }
 0x187   : > { %v5155_v10 = vrot.slane %v5154_v12, 4  ;;  %v5177_v12 = vrot.slane %v5175_v1, 4  ;;  %708 = vst.msk [vmem:[#allocation2 + $0x8] sm:$0xff] %vm348_vm1, %v691_v4  ;;  %10814 = vmatpush3.bf16.msra.mxu0 %v5522_v19  ;;  %v9801_v38 = vrot.slane %v9785_v43, 10  ;;  %v5420_v20 = vrot.slane %v9786_v61, 6  ;;  %v11618_v61 = vld [vmem:[%s11813_s11 + $0x30] sm:$0xff]  }
 0x188   : > { %707 = vst.msk [vmem:[#allocation2] sm:$0xff] %vm348_vm1, %v690_v55  ;;  %v5207_v55 = vrot.slane %v5205_v46, 5  ;;  %714 = vst.msk [vmem:[#allocation2 + $0x38] sm:$0xff] %vm348_vm1, %v697_v21  ;;  %v5419_v30 = vrot.slane %v5417_v59, 4  ;;  %v422_v46 = vld [vmem:[#allocation2 + $0x48] sm:$0xff]  ;;  %v427_v21 = vld [vmem:[#allocation2 + $0x70] sm:$0xff] }
 0x189   : > { %v5160_v48 = vsel %vm12753_vm12, %v5155_v10, %v5159_v32  ;;  %v417_v32 = vld [vmem:[#allocation2 + $0x20] sm:$0xff]  ;;  %v5178_v18 = vor.u32 %v5177_v12, %v14123_v49  ;;  %v5199_v10 = vshrl.u32 %v14136_v35, 16  ;;  %712 = vst.msk [vmem:[#allocation2 + $0x28] sm:$0xff] %vm348_vm1, %v695_v56  ;;  %v699_v25 = vadd.f32 %v13389_v14, %v422_v46  ;;  %v9797_v46 = vld [vmem:[%s11813_s11 + $0x9c] sm:$0xc] }
 0x18a   : > { %v9774_v11 = vcombine.low %v5150_v15, %v5160_v48  ;;  %v694_v15 = vadd.f32 %v13332_v7, %v417_v32  ;;  %v423_v48 = vld [vmem:[#allocation2 + $0x50] sm:$0xff]  ;;  %v14168_v49 = vld [vmem:[%s15017_s2 + $0x22] sm:$0x3]  ;;  %v5192_v7 = vor.u32 %v5191_v45, %v5188_v8  ;;  %v5427_v45 = vrot.slane %v9788_v2, 6  ;;  %v426_v2 = vld [vmem:[#allocation2 + $0x68] sm:$0xff] }
 0x18b   : > { %v5179_v33 = vrot.slane %v5178_v18, 4  ;;  %v5201_v17 = vrot.slane %v5199_v10, 4  ;;  %v9787_v12 = vld [vmem:[%s11813_s11 + $0x60] sm:$0xc]  ;;  %v700_v5 = vadd.f32 %v13359_v63, %v423_v48  ;;  %11549 = vmatprep.subr.msk.bf16.mxu0 %vm480_vm0, %v14168_v49  ;;  %v9919_v18 = vcombine.low %v11648_v31, %v6434_v52  ;;  %v9791_v52 = vld [vmem:[%s11813_s11 + $0x78] sm:$0xc] }
 0x18c   : > { %711 = vst.msk [vmem:[#allocation2 + $0x20] sm:$0xff] %vm348_vm1, %v694_v15  ;;  %v5193_v54 = vrot.slane %v5192_v7, 4  ;;  %v421_v8 = vld [vmem:[#allocation2 + $0x40] sm:$0xff]  ;;  %10806 = vmatmul.mubr.msk.bf16.gmra.mrb[40].mxu0 %vm564_vm2, %v9774_v11  ;;  %v5424_v11 = vrot.slane %v13757_v44, 6  ;;  %v5421_v43 = vsel %vm11816_vm5, %v5419_v30, %v5420_v20  ;;  %v9790_v7 = vld [vmem:[%s11813_s11 + $0x74] sm:$0x3] }
 0x18d   : > { %v5184_v40 = vsel %vm12753_vm12, %v5179_v33, %v5183_v23  ;;  %v5202_v4 = vor.u32 %v5201_v17, %v5197_v28  ;;  %v5418_v23 = vsel %vm11816_vm5, %v9801_v38, %v5417_v59  ;;  %717 = vst.msk [vmem:[#allocation2 + $0x50] sm:$0xff] %vm348_vm1, %v700_v5  ;;  %v698_v33 = vadd.f32 %v13371_v41, %v421_v8  ;;  %v425_v41 = vld [vmem:[#allocation2 + $0x60] sm:$0xff]  ;;  %v9794_v8 = vld [vmem:[%s11813_s11 + $0x8c] sm:$0x3]  ;;  %v15093_v30 = vld [vmem:[#allocation5_spill] sm:$0xff] }
 0x18e   : > { %v9775_v32 = vcombine.low %v5174_v34, %v5184_v40  ;;  %v5198_v63 = vsel %vm12753_vm12, %v5193_v54, %v5197_v28  ;;  %v9802_v34 = vrot.slane %v9787_v12, 10  ;;  %v701_v17 = vadd.f32 %v13378_v6, %v424_v37  ;;  %v9789_v28 = vld [vmem:[%s11813_s11 + $0x6c] sm:$0xc]  ;;  %v9792_v40 = vld [vmem:[%s11813_s11 + $0x80] sm:$0x3]  ;;  %v428_v6 = vld [vmem:[#allocation2 + $0x78] sm:$0xff]  ;;  %10900 = vmatmul.mubr.msk.bf16.gmra.mrb[28].mxu1 %vm564_vm2, %v9919_v18 }
 0x18f   : > { %v5203_v0 = vrot.slane %v5202_v4, 4  ;;  %v5426_v48 = vrot.slane %v5424_v11, 4  ;;  %v9810_v19 = vcombine.low %v5418_v23, %v5421_v43  ;;  %715 = vst.msk [vmem:[#allocation2 + $0x40] sm:$0xff] %vm348_vm1, %v698_v33  ;;  %v9803_v38 = vrot.slane %v9789_v28, 10  ;;  %10905 = vmatprep.mubr.msk.bf16.mxu1 %vm564_vm2, %v11618_v61  ;;  %716 = vst.msk [vmem:[#allocation2 + $0x48] sm:$0xff] %vm348_vm1, %v699_v25  ;;  %v15092_v18 = vld [vmem:[#allocation4_spill] sm:$0xff] }
 0x190   : > { %10809 = vmatprep.mubr.msk.bf16.mxu0 %vm564_vm2, %v9775_v32  ;;  %718 = vst.msk [vmem:[#allocation2 + $0x58] sm:$0xff] %vm348_vm1, %v701_v17  ;;  %v14214_v4 = vsel %vm11816_vm5, %v9802_v34, %v5424_v11  ;;  %v704_v59 = vadd.f32 %v13409_v29, %v427_v21  ;;  %v5438_v12 = vrot.slane %v13835_v47, 6  ;;  %v9793_v32 = vld [vmem:[%s11813_s11 + $0x84] sm:$0xc]  ;;  %v5434_v20 = vrot.slane %v9790_v7, 6  ;;  %v11619_v43 = vld [vmem:[%s11813_s11 + $0x3c] sm:$0xff]  }
 0x191   : > { %v5208_v15 = vsel %vm12753_vm12, %v5203_v0, %v5207_v55  ;;  %v5431_v55 = vrot.slane %v13797_v3, 6  ;;  %v14222_v14 = vsel %vm11816_vm5, %v5426_v48, %v5427_v45  ;;  %v9804_v5 = vrot.slane %v9791_v52, 10  ;;  %v15091_v0 = vld [vmem:[#allocation3_spill] sm:$0xff]  ;;  %v9795_v45 = vld [vmem:[%s11813_s11 + $0x90] sm:$0xc]  ;;  %v11620_v48 = vld [vmem:[%s11813_s11 + $0x48] sm:$0xff]  }
 0x192   : > { %v9776_v56 = vcombine.low %v5198_v63, %v5208_v15  ;;  %721 = vst.msk [vmem:[#allocation2 + $0x70] sm:$0xff] %vm348_vm1, %v704_v59  ;;  %v5440_v29 = vrot.slane %v5438_v12, 4  ;;  %v5441_v37 = vrot.slane %v9792_v40, 6  ;;  %v702_v31 = vadd.f32 %v15091_v0, %v425_v41  ;;  %v9796_v28 = vld [vmem:[%s11813_s11 + $0x98] sm:$0x3] }
 0x193   : > { %v5433_v54 = vrot.slane %v5431_v55, 4  ;;  %v705_v23 = vadd.f32 %v15092_v18, %v428_v6  ;;  %v703_v63 = vadd.f32 %v15093_v30, %v426_v2  ;;  %v9805_v34 = vrot.slane %v9793_v32, 10  ;;  %v9826_v41 = vld [vmem:[%s11813_s11 + $0x54] sm:$0x8]  ;;  %v14273_v2 = vld [vmem:[%s15017_s2 + $0x2e] sm:$0x3] }
 0x194   : > { %10810 = vmatmul.mubr.msk.bf16.gmra.mrb[44].mxu0 %vm564_vm2, %v9776_v56  ;;  %v5445_v11 = vrot.slane %v13857_v50, 6  ;;  %v9811_v15 = vcombine.low %v14214_v4, %v14222_v14  ;;  %v6954_v61 = vsel %vm480_vm0, %v13907_v9, 0  ;;  %v5432_v33 = vsel %vm11816_vm5, %v9803_v38, %v5431_v55  ;;  %719 = vst.msk [vmem:[#allocation2 + $0x60] sm:$0xff] %vm348_vm1, %v702_v31  ;;  %v9798_v56 = vld [vmem:[%s11813_s11 + $0xa4] sm:$0x3] }
 0x195   : > { %10815 = vmatprep.mubr.msk.bf16.mxu0 %vm564_vm2, %v9810_v19  ;;  %722 = vst.msk [vmem:[#allocation2 + $0x78] sm:$0xff] %vm348_vm1, %v705_v23  ;;  %v5448_v17 = vrot.slane %v9794_v8, 6  ;;  %v5435_v21 = vsel %vm11816_vm5, %v5433_v54, %v5434_v20  ;;  %v14250_v7 = vsel %vm11816_vm5, %v9804_v5, %v5438_v12  ;;  %720 = vst.msk [vmem:[#allocation2 + $0x68] sm:$0xff] %vm348_vm1, %v703_v63  ;;  %v5452_v52 = vrot.slane %v13885_v36, 6  ;;  %v9799_v12 = vld [vmem:[%s11813_s11 + $0xa8] sm:$0xc] }
 0x196   : > { %v5447_v9 = vrot.slane %v5445_v11, 4  ;;  %v14257_v19 = vsel %vm11816_vm5, %v5440_v29, %v5441_v37  ;;  %v9806_v25 = vrot.slane %v9795_v45, 10  ;;  %v9807_v55 = vrot.slane %v9797_v46, 10  ;;  %10906 = vmatmul.mubr.msk.bf16.vlgmr.msra.gmra.mrb[16].mxu1 %vm564_vm2, %v11619_v43  ;;  %v9800_v20 = vld [vmem:[%s11813_s11 + $0xb0] sm:$0x3] }
 0x197   : > { %v5459_v40 = vrot.slane %v14082_v27, 6  ;;  %v14263_v6 = vsel %vm11816_vm5, %v9805_v34, %v5445_v11  ;;  %v5454_v38 = vrot.slane %v5452_v52, 4  ;;  %v5455_v59 = vrot.slane %v9796_v28, 6  ;;  %v9827_v5 = vld [vmem:[%s11813_s11 + $0x5c] sm:$0xf]  ;;  %10922 = vmatpush3.bf16.msra.mxu1 %v6954_v61  ;;  %10909 = vmatprep.mubr.msk.bf16.mxu1 %vm564_vm2, %v11620_v48 }
 0x198   : > { %v14267_v4 = vsel %vm11816_vm5, %v5447_v9, %v5448_v17  ;;  %v9812_v32 = vcombine.low %v5432_v33, %v5435_v21  ;;  %v5462_v54 = vrot.slane %v9798_v56, 6  ;;  %v9813_v8 = vcombine.low %v14250_v7, %v14257_v19  ;;  %v14285_v31 = vld [vmem:[%s11813_s11 + $0x34] sm:$0xf]  ;;  %v9961_v34 = vld [vmem:[%s11813_s11 + $0x30] sm:$0xc]  ;;  %11555 = vmatprep.subr.msk.bf16.mxu1 %vm480_vm0, %v14273_v2  ;;  %v11622_v9 = vld [vmem:[%s11813_s11 + $0x60] sm:$0xff]  }
 0x199   : > { %v5461_v14 = vrot.slane %v5459_v40, 4  ;;  %v5466_v29 = vrot.slane %v14136_v35, 6  ;;  %v5840_v37 = vsel %vm480_vm0, %v14168_v49, 0  ;;  %v5654_v0 = vshrl.u32 %v9826_v41, 16  ;;  %v9963_v11 = vld [vmem:[%s11813_s11 + $0x38] sm:$0x3] }
 0x19a   : > { %v9814_v18 = vcombine.low %v14263_v6, %v14267_v4  ;;  %v14291_v23 = vsel %vm11816_vm5, %v9806_v25, %v5452_v52  ;;  %v14295_v30 = vsel %vm11816_vm5, %v9807_v55, %v5459_v40  ;;  %v9808_v63 = vrot.slane %v9799_v12, 10  ;;  %v9828_v33 = vld [vmem:[%s11813_s11 + $0x60] sm:$0x8]  ;;  %v11621_v17 = vld [vmem:[%s11813_s11 + $0x54] sm:$0xff]   ;;  %v9829_v7 = vld [vmem:[%s11813_s11 + $0x68] sm:$0xf] }
 0x19b   : > { %v14304_v49 = vsel %vm11816_vm5, %v5454_v38, %v5455_v59  ;;  %v9842_v45 = vrot.slane %v5654_v0, 11  ;;  %v15094_v46 = vshrl.u32 %v13741_v53, 16  ;;  %v5663_v61 = vshrl.u32 %v9827_v5, 16  ;;  %v9830_v0 = vld [vmem:[%s11813_s11 + $0x6c] sm:$0x8] }
 0x19c   : > { %10816 = vmatmul.mubr.msk.bf16.vlgmr.msra.gmra.mrb[32].mxu0 %vm564_vm2, %v9811_v15  ;;  %v14313_v28 = vsel %vm11816_vm5, %v5461_v14, %v5462_v54  ;;  %v5469_v21 = vrot.slane %v9800_v20, 6  ;;  %v5666_v15 = vshll.u32 %v9827_v5, 16  ;;  %v6849_v48 = vrot.slane %v14285_v31, 6  ;;  %v14541_v35 = vld [vmem:[%s15018_s3 + $0x4] sm:$0xf] }
 0x19d   : > { %v5658_v43 = vrot.slane %v15094_v46, 7  ;;  %10819 = vmatprep.mubr.msk.bf16.mxu0 %vm564_vm2, %v9812_v32  ;;  %10832 = vmatpush3.bf16.msra.mxu0 %v5840_v37  ;;  %v5468_v52 = vrot.slane %v5466_v29, 4  ;;  %v15095_v56 = vshll.u32 %v13741_v53, 16  ;;  %v5665_v55 = vrot.slane %v5663_v61, 7  ;;  %v9964_v37 = vld [vmem:[%s11813_s11 + $0x3c] sm:$0xc] }
 0x19e   : > { %v9985_v40 = vrot.slane %v9961_v34, 10  ;;  %v6851_v41 = vrot.slane %v6849_v48, 4  ;;  %v6852_v6 = vrot.slane %v9963_v11, 6  ;;  %v5671_v4 = vshrl.u32 %v9828_v33, 16  ;;  %10910 = vmatmul.mubr.msk.bf16.gmra.mrb[20].mxu1 %vm564_vm2, %v11621_v17  ;;  %v9831_v46 = vld [vmem:[%s11813_s11 + $0x74] sm:$0xf] }
 0x19f   : > { %v5659_v19 = vor.u32 %v5658_v43, %v15095_v56  ;;  %v5661_v25 = vrot.slane %v5658_v43, 4  ;;  %v5668_v59 = vor.u32 %v5666_v15, %v5665_v55  ;;  %v15096_v12 = vshrl.u32 %v13757_v44, 16  ;;  %10913 = vmatprep.mubr.msk.bf16.mxu1 %vm564_vm2, %v11622_v9  ;;  %v14369_v55 = vld [vmem:[%s11813_s11 + $0x4c] sm:$0xf] }
 0x1a0   : > { %v5680_v14 = vshrl.u32 %v9829_v7, 16  ;;  %v9815_v53 = vcombine.low %v14291_v23, %v14304_v49  ;;  %v14329_v54 = vsel %vm11816_vm5, %v9808_v63, %v5466_v29  ;;  %v9843_v20 = vrot.slane %v5671_v4, 11  ;;  %v9832_v4 = vld [vmem:[%s11813_s11 + $0x78] sm:$0x8] }
 0x1a1   : > { %v5660_v38 = vsel %vm13014_vm15, %v9842_v45, %v5659_v19  ;;  %v5675_v32 = vrot.slane %v15096_v12, 7  ;;  %v5683_v5 = vshll.u32 %v9829_v7, 16  ;;  %v9816_v34 = vcombine.low %v14295_v30, %v14313_v28  ;;  %v9966_v19 = vld [vmem:[%s11813_s11 + $0x44] sm:$0x3] }
 0x1a2   : > { %v14338_v11 = vsel %vm11816_vm5, %v5468_v52, %v5469_v21  ;;  %v5669_v45 = vsel %vm13014_vm15, %v5661_v25, %v5668_v59  ;;  %v15097_v29 = vshll.u32 %v13757_v44, 16  ;;  %v14349_v61 = vsel %vm11816_vm5, %v9985_v40, %v6849_v48  ;;  %v14352_v21 = vld [vmem:[%s11813_s11 + $0x40] sm:$0xf]  ;;  %v11623_v48 = vld [vmem:[%s11813_s11 + $0x6c] sm:$0xff]   ;;  %v11624_v40 = vld [vmem:[%s11813_s11 + $0x78] sm:$0xff]  }
 0x1a3   : > { %v14345_v43 = vcombine.low %v5660_v38, %v5669_v45  ;;  %v5678_v33 = vrot.slane %v5675_v32, 4  ;;  %v5682_v17 = vrot.slane %v5680_v14, 7  ;;  %v14357_v44 = vsel %vm11816_vm5, %v6851_v41, %v6852_v6  ;;  %v9967_v14 = vld [vmem:[%s11813_s11 + $0x48] sm:$0xc]  ;;  %v14424_v30 = vld [vmem:[%s11813_s11 + $0x64] sm:$0xf] }
 0x1a4   : > { %v5676_v63 = vor.u32 %v5675_v32, %v15097_v29  ;;  %10820 = vmatmul.mubr.msk.bf16.gmra.mrb[36].mxu0 %vm564_vm2, %v9813_v8  ;;  %v9986_v15 = vrot.slane %v9964_v37, 10  ;;  %v5688_v7 = vshrl.u32 %v9830_v0, 16  ;;  %v5692_v9 = vrot.slane %v5079_v62, 7  ;;  %v9969_v37 = vld [vmem:[%s11813_s11 + $0x50] sm:$0x3] }
 0x1a5   : > { %10823 = vmatprep.mubr.msk.bf16.mxu0 %vm564_vm2, %v9814_v18  ;;  %v9817_v52 = vcombine.low %v14329_v54, %v14338_v11  ;;  %v5685_v56 = vor.u32 %v5683_v5, %v5682_v17  ;;  %v5697_v25 = vshrl.u32 %v9831_v46, 16  ;;  %v6856_v62 = vrot.slane %v14352_v21, 6  ;;  %v9970_v17 = vld [vmem:[%s11813_s11 + $0x54] sm:$0xc] }
 0x1a6   : > { %v5677_v8 = vsel %vm13014_vm15, %v9843_v20, %v5676_v63  ;;  %v9844_v41 = vrot.slane %v5688_v7, 11  ;;  %v5693_v18 = vor.u32 %v5692_v9, %v5075_v57  ;;  %v5700_v6 = vshll.u32 %v9831_v46, 16  ;;  %v9833_v20 = vld [vmem:[%s11813_s11 + $0x80] sm:$0xf]  ;;  %10914 = vmatmul.mubr.msk.bf16.gmra.mrb[24].mxu1 %vm564_vm2, %v11623_v48 }
 0x1a7   : > { %v9994_v38 = vcombine.low %v14349_v61, %v14357_v44  ;;  %v5686_v59 = vsel %vm13014_vm15, %v5678_v33, %v5685_v56  ;;  %v5695_v12 = vrot.slane %v5692_v9, 4  ;;  %v5699_v32 = vrot.slane %v5697_v25, 7  ;;  %10917 = vmatprep.mubr.msk.bf16.mxu1 %vm564_vm2, %v11624_v40  ;;  %v9972_v56 = vld [vmem:[%s11813_s11 + $0x5c] sm:$0x3] }
 0x1a8   : > { %v14382_v5 = vcombine.low %v5677_v8, %v5686_v59  ;;  %v14386_v3 = vsel %vm11816_vm5, %v9986_v15, %v6856_v62  ;;  %v6859_v57 = vrot.slane %v9966_v19, 6  ;;  %v6863_v0 = vrot.slane %v14369_v55, 6  ;;  %v14397_v15 = vld [vmem:[%s11813_s11 + $0x58] sm:$0xf]  ;;  %v9835_v59 = vld [vmem:[%s11813_s11 + $0x8c] sm:$0xf] }
 0x1a9   : > { %v5694_v45 = vsel %vm13014_vm15, %v9844_v41, %v5693_v18  ;;  %v5702_v29 = vor.u32 %v5700_v6, %v5699_v32  ;;  %v5705_v63 = vshrl.u32 %v9832_v4, 16  ;;  %v15098_v46 = vshrl.u32 %v13835_v47, 16  ;;  %v9834_v4 = vld [vmem:[%s11813_s11 + $0x84] sm:$0x8] }
 0x1aa   : > { %v6858_v7 = vrot.slane %v6856_v62, 4  ;;  %v9987_v9 = vrot.slane %v9967_v14, 10  ;;  %v5714_v8 = vshrl.u32 %v9833_v20, 16  ;;  %v5717_v48 = vshll.u32 %v9833_v20, 16 }
 0x1ab   : > { %v5709_v33 = vrot.slane %v15098_v46, 7  ;;  %v5703_v19 = vsel %vm13014_vm15, %v5695_v12, %v5702_v29  ;;  %v6866_v25 = vrot.slane %v9969_v37, 6  ;;  %v9845_v41 = vrot.slane %v5705_v63, 11 }
 0x1ac   : > { %v15099_v18 = vshll.u32 %v13835_v47, 16  ;;  %10824 = vmatmul.mubr.msk.bf16.gmra.mrb[40].mxu0 %vm564_vm2, %v9815_v53  ;;  %v14411_v40 = vcombine.low %v5694_v45, %v5703_v19  ;;  %v6865_v62 = vrot.slane %v6863_v0, 4  ;;  %v5716_v14 = vrot.slane %v5714_v8, 7  ;;  %v11625_v47 = vld [vmem:[%s11813_s11 + $0x84] sm:$0xff]   ;;  %v9836_v8 = vld [vmem:[%s11813_s11 + $0x90] sm:$0x8] }
 0x1ad   : > { %v5712_v32 = vrot.slane %v5709_v33, 4  ;;  %10827 = vmatprep.mubr.msk.bf16.mxu0 %vm564_vm2, %v9816_v34  ;;  %v9988_v23 = vrot.slane %v9970_v17, 10  ;;  %v6870_v49 = vrot.slane %v14397_v15, 6  ;;  %v6873_v53 = vrot.slane %v9972_v56, 6  ;;  %v9973_v17 = vld [vmem:[%s11813_s11 + $0x60] sm:$0xc] }
 0x1ae   : > { %v5710_v6 = vor.u32 %v5709_v33, %v15099_v18  ;;  %v5719_v20 = vor.u32 %v5717_v48, %v5716_v14  ;;  %v5722_v37 = vshrl.u32 %v9834_v4, 16  ;;  %v15100_v45 = vshrl.u32 %v13857_v50, 16  ;;  %10918 = vmatmul.mubr.msk.bf16.gmra.mrb[28].mxu1 %vm564_vm2, %v11625_v47  ;;  %v9837_v4 = vld [vmem:[%s11813_s11 + $0x98] sm:$0xf] }
 0x1af   : > { %v5731_v63 = vshrl.u32 %v9835_v59, 16  ;;  %v6860_v28 = vsel %vm11816_vm5, %v6858_v7, %v6859_v57  ;;  %v14430_v34 = vsel %vm11816_vm5, %v9987_v9, %v6863_v0  ;;  %v6872_v46 = vrot.slane %v6870_v49, 4  ;;  %v9975_v57 = vld [vmem:[%s11813_s11 + $0x68] sm:$0x3]  ;;  %10923 = vmatprep.mubr.msk.bf16.mxu1 %vm564_vm2, %v9994_v38 }
 0x1b0   : > { %v5711_v12 = vsel %vm13014_vm15, %v9845_v41, %v5710_v6  ;;  %v5726_v29 = vrot.slane %v15100_v45, 7  ;;  %v5734_v33 = vshll.u32 %v9835_v59, 16  ;;  %v6867_v48 = vsel %vm11816_vm5, %v6865_v62, %v6866_v25  ;;  %v9839_v45 = vld [vmem:[%s11813_s11 + $0xa4] sm:$0xf] }
 0x1b1   : > { %v5720_v56 = vsel %vm13014_vm15, %v5712_v32, %v5719_v20  ;;  %v9846_v19 = vrot.slane %v5722_v37, 11  ;;  %v15101_v41 = vshll.u32 %v13857_v50, 16  ;;  %v5733_v9 = vrot.slane %v5731_v63, 7 }
 0x1b2   : > { %v14442_v7 = vcombine.low %v5711_v12, %v5720_v56  ;;  %v5729_v0 = vrot.slane %v5726_v29, 4  ;;  %v6877_v6 = vrot.slane %v14424_v30, 6  ;;  %v14452_v50 = vsel %vm11816_vm5, %v9988_v23, %v6870_v49 }
 0x1b3   : > { %v5727_v18 = vor.u32 %v5726_v29, %v15101_v41  ;;  %v14456_v25 = vsel %vm11816_vm5, %v6872_v46, %v6873_v53  ;;  %v9989_v59 = vrot.slane %v9973_v17, 10  ;;  %v5739_v62 = vshrl.u32 %v9836_v8, 16  ;;  %v9838_v53 = vld [vmem:[%s11813_s11 + $0x9c] sm:$0x8]  ;;  %v9979_v41 = vld [vmem:[%s11813_s11 + $0x78] sm:$0xc] }
 0x1b4   : > { %v5736_v14 = vor.u32 %v5734_v33, %v5733_v9  ;;  %v6880_v47 = vrot.slane %v9975_v57, 6  ;;  %v15102_v61 = vshrl.u32 %v13885_v36, 16  ;;  %10828 = vmatmul.mubr.msk.bf16.gmra.mrb[44].mxu0 %vm564_vm2, %v9817_v52  ;;  %v6879_v38 = vrot.slane %v6877_v6, 4  ;;  %v14481_v33 = vld [vmem:[%s11813_s11 + $0x70] sm:$0xf] }
 0x1b5   : > { %v5728_v32 = vsel %vm13014_vm15, %v9846_v19, %v5727_v18  ;;  %v9847_v12 = vrot.slane %v5739_v62, 11  ;;  %v5748_v23 = vshrl.u32 %v9837_v4, 16  ;;  %v5751_v49 = vshll.u32 %v9837_v4, 16  ;;  %10833 = vmatprep.mubr.msk.bf16.mxu0 %vm564_vm2, %v14345_v43  ;;  %v14497_v18 = vld [vmem:[%s11813_s11 + $0x7c] sm:$0xf] }
 0x1b6   : > { %v5743_v44 = vrot.slane %v15102_v61, 7  ;;  %v9995_v20 = vcombine.low %v14386_v3, %v6860_v28  ;;  %v7136_v37 = vsel %vm480_vm0, %v14273_v2, 0  ;;  %v5737_v54 = vsel %vm13014_vm15, %v5729_v0, %v5736_v14  ;;  %v9976_v28 = vld [vmem:[%s11813_s11 + $0x6c] sm:$0xc]  ;;  %v14502_v57 = vld [vmem:[%s15017_s2 + $0x30] sm:$0x3] }
 0x1b7   : > { %v15103_v11 = vshll.u32 %v13885_v36, 16  ;;  %v9996_v29 = vcombine.low %v14430_v34, %v6867_v48  ;;  %v14478_v63 = vcombine.low %v5728_v32, %v5737_v54  ;;  %v5750_v43 = vrot.slane %v5748_v23, 7  ;;  %v9978_v36 = vld [vmem:[%s11813_s11 + $0x74] sm:$0x3]  ;;  %v9840_v4 = vld [vmem:[%s11813_s11 + $0xa8] sm:$0x8] }
 0x1b8   : > { %v5746_v46 = vrot.slane %v5743_v44, 4  ;;  %v9997_v2 = vcombine.low %v14452_v50, %v14456_v25  ;;  %v6878_v3 = vsel %vm11816_vm5, %v9989_v59, %v6877_v6  ;;  %v5756_v17 = vshrl.u32 %v9838_v53, 16  ;;  %10924 = vmatmul.mubr.msk.bf16.vlgmr.msra.gmra.mrb[16].mxu1 %vm564_vm2, %v9995_v20  ;;  %v9841_v32 = vld [vmem:[%s11813_s11 + $0xb0] sm:$0xf] }
 0x1b9   : > { %v5744_v52 = vor.u32 %v5743_v44, %v15103_v11  ;;  %v5760_v34 = vrot.slane %v5175_v1, 7  ;;  %v6881_v8 = vsel %vm11816_vm5, %v6879_v38, %v6880_v47  ;;  %v5753_v56 = vor.u32 %v5751_v49, %v5750_v43  ;;  %10940 = vmatpush3.bf16.msra.mxu1 %v7136_v37  ;;  %10927 = vmatprep.mubr.msk.bf16.mxu1 %vm564_vm2, %v9996_v29  ;;  %v9981_v44 = vld [vmem:[%s11813_s11 + $0x80] sm:$0x3] }
 0x1ba   : > { %v5765_v19 = vshrl.u32 %v9839_v45, 16  ;;  %v6884_v1 = vrot.slane %v14481_v33, 6  ;;  %v9848_v0 = vrot.slane %v5756_v17, 11  ;;  %v5768_v6 = vshll.u32 %v9839_v45, 16  ;;  %11556 = vmatprep.subr.msk.bf16.mxu1 %vm480_vm0, %v14502_v57  ;;  %v14530_v45 = vld [vmem:[%s11813_s11 + $0x88] sm:$0xf] }
 0x1bb   : > { %v5745_v48 = vsel %vm13014_vm15, %v9847_v12, %v5744_v52  ;;  %v5761_v9 = vor.u32 %v5760_v34, %v5171_v51  ;;  %v5754_v50 = vsel %vm13014_vm15, %v5746_v46, %v5753_v56  ;;  %v9990_v25 = vrot.slane %v9976_v28, 10  ;;  %v9982_v56 = vld [vmem:[%s11813_s11 + $0x84] sm:$0xc] }
 0x1bc   : > { %v5763_v59 = vrot.slane %v5760_v34, 4  ;;  %v5767_v62 = vrot.slane %v5765_v19, 7  ;;  %v9998_v14 = vcombine.low %v6878_v3, %v6881_v8  ;;  %v9856_v47 = vcombine.low %v5745_v48, %v5754_v50  ;;  %10834 = vmatmul.mubr.msk.bf16.vlgmr.msra.gmra.mrb[32].mxu0 %vm564_vm2, %v14382_v5  ;;  %v9984_v19 = vld [vmem:[%s11813_s11 + $0x8c] sm:$0x3] }
 0x1bd   : > { %v6887_v61 = vrot.slane %v9978_v36, 6  ;;  %v6891_v38 = vrot.slane %v14497_v18, 6  ;;  %v5762_v27 = vsel %vm13014_vm15, %v9848_v0, %v5761_v9  ;;  %v5773_v12 = vshrl.u32 %v9840_v4, 16  ;;  %10837 = vmatprep.mubr.msk.bf16.mxu0 %vm564_vm2, %v14411_v40  ;;  %v8019_v40 = vld [vmem:[%s15018_s3] sm:$0xf]  ;;  %v7959_v50 = vld [vmem:[#allocation2 + $0x8] sm:$0xff] }
 0x1be   : > { %v5770_v51 = vor.u32 %v5768_v6, %v5767_v62  ;;  %v5777_v23 = vrot.slane %v5199_v10, 7  ;;  %v6886_v49 = vrot.slane %v6884_v1, 4  ;;  %v9991_v53 = vrot.slane %v9979_v41, 10  ;;  %11559 = vmatprep.subr.msk.bf16.mxu0 %vm8044_vm3, %v8019_v40  ;;  %v7958_v4 = vld [vmem:[#allocation2] sm:$0xff] }
 0x1bf   : > { %v5782_v20 = vshrl.u32 %v9841_v32, 16  ;;  %v5785_v37 = vshll.u32 %v9841_v32, 16  ;;  %v6894_v11 = vrot.slane %v9981_v44, 6  ;;  %v9849_v5 = vrot.slane %v5773_v12, 11  ;;  %v10010_v32 = vld [vmem:[%s11813_s11 + $0x38] sm:$0xf] }
 0x1c0   : > { %v5771_v54 = vsel %vm13014_vm15, %v5763_v59, %v5770_v51  ;;  %v5778_v52 = vor.u32 %v5777_v23, %v5195_v22  ;;  %v6893_v46 = vrot.slane %v6891_v38, 4  ;;  %v5780_v10 = vrot.slane %v5777_v23, 4  ;;  %10928 = vmatmul.mubr.msk.bf16.gmra.mrb[20].mxu1 %vm564_vm2, %v9997_v2  ;;  %v7961_v51 = vld [vmem:[#allocation2 + $0x18] sm:$0xff]  ;;  %v7962_v12 = vld [vmem:[#allocation2 + $0x20] sm:$0xff]  ;;  %v7963_v23 = vld [vmem:[#allocation2 + $0x28] sm:$0xff] }
 0x1c1   : > { %v9857_v29 = vcombine.low %v5762_v27, %v5771_v54  ;;  %v5784_v43 = vrot.slane %v5782_v20, 7  ;;  %10931 = vmatprep.mubr.msk.bf16.mxu1 %vm564_vm2, %v9998_v14  ;;  %v6885_v22 = vsel %vm11816_vm5, %v9990_v25, %v6884_v1  ;;  %v6888_v36 = vsel %vm11816_vm5, %v6886_v49, %v6887_v61  ;;  %v14568_v25 = vld [vmem:[%s15019_s4] ss:$0 sm:$0xff]  ;;  %v7960_v27 = vld [vmem:[#allocation2 + $0x10] sm:$0xff]  ;;  %v10011_v49 = vld [vmem:[%s11813_s11 + $0x44] sm:$0xf] }
 0x1c2   : > { %v5779_v3 = vsel %vm13014_vm15, %v9849_v5, %v5778_v52  ;;  %v6898_v2 = vrot.slane %v14530_v45, 6  ;;  %v8046_v17 = vsel %vm8044_vm3, %v8019_v40, 0  ;;  %v6892_v34 = vsel %vm11816_vm5, %v9991_v53, %v6891_v38  ;;  %v10012_v54 = vld [vmem:[%s11813_s11 + $0x50] sm:$0xf] }
 0x1c3   : > { %v5787_v28 = vor.u32 %v5785_v37, %v5784_v43  ;;  %v6895_v8 = vsel %vm11816_vm5, %v6893_v46, %v6894_v11  ;;  %11012 = vmatpush3.bf16.msra.mxu0 %v8046_v17  ;;  %v9999_v1 = vcombine.low %v6885_v22, %v6888_v36  ;;  %v9992_v9 = vrot.slane %v9982_v56, 10  ;;  %v7964_v40 = vld [vmem:[#allocation2 + $0x30] sm:$0xff]  ;;  %v7967_v22 = vld [vmem:[#allocation2 + $0x48] sm:$0xff] }
 0x1c4   : > { %10838 = vmatmul.mubr.msk.bf16.gmra.mrb[36].mxu0 %vm564_vm2, %v14442_v7  ;;  %11560 = vmatprep.subr.msk.bf16.mxu0 %vm8044_vm3, %v14541_v35  ;;  %v10000_v0 = vcombine.low %v6892_v34, %v6895_v8  ;;  %v6900_v6 = vrot.slane %v6898_v2, 4  ;;  %v6901_v42 = vrot.slane %v9984_v19, 6  ;;  %v7979_v59 = vadd.f32 %v14568_v25, %v7958_v4  ;;  %v14599_v36 = vld [vmem:[%s15017_s2 + $0x32] sm:$0x3]  ;;  %v10014_v17 = vld [vmem:[%s11813_s11 + $0x68] sm:$0xf] }
 0x1c5   : > { %v5788_v48 = vsel %vm13014_vm15, %v5780_v10, %v5787_v28  ;;  %10841 = vmatprep.mubr.msk.bf16.mxu0 %vm564_vm2, %v14478_v63  ;;  %v6899_v7 = vsel %vm11816_vm5, %v9992_v9, %v6898_v2  ;;  %v7980_v62 = vadd.f32 %v14568_v25, %v7959_v50  ;;  %v10019_v61 = vcombine.low %v14285_v31, %v10010_v32  ;;  %v7966_v28 = vld [vmem:[#allocation2 + $0x40] sm:$0xff]  ;;  %v10673_v19 = vpop.f32.mrb[0].mxu1  ;;  %v3042_v50 = vld [vmem:[#allocation2 + $0x98] sm:$0xff] }
 0x1c6   : > { %v9858_v41 = vcombine.low %v5779_v3, %v5788_v48  ;;  %v6902_v63 = vsel %vm11816_vm5, %v6900_v6, %v6901_v42  ;;  %v7995_v44 = vmax.f32 %v7979_v59, 0.0  ;;  %v7981_v53 = vadd.f32 %v14568_v25, %v7960_v27  ;;  %v7965_v3 = vld [vmem:[#allocation2 + $0x38] sm:$0xff]  ;;  %v3039_v9 = vld [vmem:[#allocation2 + $0x80] sm:$0xff]  ;;  %v7968_v59 = vld [vmem:[#allocation2 + $0x50] sm:$0xff] }
 0x1c7   : > { %v10001_v14 = vcombine.low %v6899_v7, %v6902_v63  ;;  %v7996_v38 = vmax.f32 %v7980_v62, 0.0  ;;  %v7983_v37 = vadd.f32 %v14568_v25, %v7962_v12  ;;  %v7984_v31 = vadd.f32 %v14568_v25, %v7963_v23  ;;  %v7971_v27 = vld [vmem:[#allocation2 + $0x68] sm:$0xff] }
 0x1c8   : > { %10932 = vmatmul.mubr.msk.bf16.gmra.mrb[24].mxu1 %vm564_vm2, %v9999_v1  ;;  %v10020_v11 = vcombine.low %v14352_v21, %v10011_v49  ;;  %v7997_v5 = vmax.f32 %v7981_v53, 0.0  ;;  %v7338_v46 = vsel %vm480_vm0, %v14502_v57, 0  ;;  %v7985_v57 = vadd.f32 %v14568_v25, %v7964_v40  ;;  %v10015_v49 = vld [vmem:[%s11813_s11 + $0x74] sm:$0xf] }
 0x1c9   : > { %10935 = vmatprep.mubr.msk.bf16.mxu1 %vm564_vm2, %v10000_v0  ;;  %v8011_v20 = vpack.c.bf16 %v7996_v38, %v7995_v44  ;;  %v7999_v10 = vmax.f32 %v7983_v37, 0.0  ;;  %v8000_v43 = vmax.f32 %v7984_v31, 0.0  ;;  %v7986_v2 = vadd.f32 %v14568_v25, %v7965_v3  ;;  %v2959_v0 = vpop.f32.mrb[1].mxu1  ;;  %v7969_v38 = vld [vmem:[#allocation2 + $0x58] sm:$0xff]  ;;  %v10016_v37 = vld [vmem:[%s11813_s11 + $0x80] sm:$0xf] }
 0x1ca   : > { %v8255_v34 = vsel %vm8044_vm3, %v14541_v35, 0  ;;  %v7987_v48 = vadd.f32 %v14568_v25, %v7966_v28  ;;  %v7988_v56 = vadd.f32 %v14568_v25, %v7967_v22  ;;  %v11083_v1 = vadd.f32 %v10673_v19, %v13641_v39  ;;  %v10674_v4 = vpop.f32.mrb[2].mxu1  ;;  %v3045_v40 = vld [vmem:[#allocation2 + $0xb0] sm:$0xff]  ;;  %v14640_v28 = vld [vmem:[%s15019_s4 + $0x1] ss:$0 sm:$0xff] }
 0x1cb   : > { %v8013_v8 = vpack.c.bf16 %v8000_v43, %v7999_v10  ;;  %v10023_v6 = vcombine.low %v14424_v30, %v10014_v17  ;;  %v11084_v42 = vadd.f32 %v2959_v0, %v13645_v58  ;;  %v8001_v7 = vmax.f32 %v7985_v57, 0.0  ;;  %v2962_v39 = vpop.f32.mrb[3].mxu1  ;;  %v7973_v10 = vld [vmem:[#allocation2 + $0x78] sm:$0xff] }
 0x1cc   : > { %10842 = vmatmul.mubr.msk.bf16.gmra.mrb[40].mxu0 %vm564_vm2, %v9856_v47  ;;  %v7982_v47 = vadd.f32 %v14568_v25, %v7961_v51  ;;  %v8002_v63 = vmax.f32 %v7986_v2, 0.0  ;;  %v11085_v32 = vadd.f32 %v10674_v4, %v13653_v60  ;;  %v8004_v44 = vmax.f32 %v7988_v56, 0.0  ;;  %v10017_v2 = vld [vmem:[%s11813_s11 + $0x8c] sm:$0xf] }
 0x1cd   : > { %10845 = vmatprep.mubr.msk.bf16.mxu0 %vm564_vm2, %v9857_v29  ;;  %v10021_v29 = vcombine.low %v14369_v55, %v10012_v54  ;;  %v10013_v55 = vld [vmem:[%s11813_s11 + $0x5c] sm:$0xf]  ;;  %v3055_v30 = vadd.f32 %v11084_v42, %v3039_v9  ;;  %v11086_v58 = vadd.f32 %v2962_v39, %v13660_v26  ;;  %v7989_v12 = vadd.f32 %v14568_v25, %v7968_v59  ;;  %v10677_v43 = vpop.f32.mrb[4].mxu1  ;;  %v15105_v42 = vld [vmem:[#allocation7_spill] sm:$0xff] }
 0x1ce   : > { %v7998_v52 = vmax.f32 %v7982_v47, 0.0  ;;  %v10022_v35 = vcombine.low %v14397_v15, %v10013_v55  ;;  %v7970_v15 = vld [vmem:[#allocation2 + $0x60] sm:$0xff]  ;;  %v3058_v51 = vadd.f32 %v11085_v32, %v3042_v50  ;;  %v8014_v23 = vpack.c.bf16 %v8002_v63, %v8001_v7 }
 0x1cf   : > { %3071 = vst.msk [vmem:[#allocation2 + $0x80] sm:$0xff] %vm348_vm1, %v3055_v30  ;;  %v7990_v53 = vadd.f32 %v14568_v25, %v7969_v38  ;;  %v7991_v47 = vadd.f32 %v14568_v25, %v7970_v15  ;;  %v7992_v26 = vadd.f32 %v14568_v25, %v7971_v27  ;;  %v10024_v31 = vcombine.low %v14481_v33, %v10015_v49  ;;  %v3043_v55 = vld [vmem:[#allocation2 + $0xa0] sm:$0xff]  ;;  %v3049_v27 = vld [vmem:[#allocation2 + $0xd0] sm:$0xff] }
 0x1d0   : > { %10936 = vmatmul.mubr.msk.bf16.gmra.mrb[28].mxu1 %vm564_vm2, %v10001_v14  ;;  %v8012_v21 = vpack.c.bf16 %v7998_v52, %v7997_v5  ;;  %v3040_v14 = vld [vmem:[#allocation2 + $0x88] sm:$0xff]  ;;  %3074 = vst.msk [vmem:[#allocation2 + $0x98] sm:$0xff] %vm348_vm1, %v3058_v51  ;;  %v8005_v54 = vmax.f32 %v7989_v12, 0.0  ;;  %v11087_v22 = vadd.f32 %v10677_v43, %v13690_v24  ;;  %v7994_v17 = vadd.f32 %v14568_v25, %v7973_v10 }
 0x1d1   : > { %10941 = vmatprep.mubr.msk.bf16.mxu1 %vm564_vm2, %v10019_v61  ;;  %v8003_v61 = vmax.f32 %v7987_v48, 0.0  ;;  %v3056_v60 = vadd.f32 %v11086_v58, %v3040_v14  ;;  %v8007_v5 = vmax.f32 %v7991_v47, 0.0  ;;  %v8008_v52 = vmax.f32 %v7992_v26, 0.0  ;;  %v3046_v48 = vld [vmem:[#allocation2 + $0xb8] sm:$0xff]  ;;  %v3044_v24 = vld [vmem:[#allocation2 + $0xa8] sm:$0xff] }
 0x1d2   : > { %v3061_v19 = vadd.f32 %v11087_v22, %v3045_v40  ;;  %v8010_v63 = vmax.f32 %v7994_v17, 0.0  ;;  %v11633_v30 = vld [vmem:[%s11813_s11 + $0x6c] sm:$0xff]  }
 0x1d3   : > { %3072 = vst.msk [vmem:[#allocation2 + $0x88] sm:$0xff] %vm348_vm1, %v3056_v60  ;;  %v15106_v58 = vld [vmem:[#allocation8_spill] sm:$0xff]  ;;  %v3047_v60 = vld [vmem:[#allocation2 + $0xc0] sm:$0xff] }
 0x1d4   : > { %10846 = vmatmul.mubr.msk.bf16.gmra.mrb[44].mxu0 %vm564_vm2, %v9858_v41  ;;  %v3041_v41 = vld [vmem:[#allocation2 + $0x90] sm:$0xff]  ;;  %3077 = vst.msk [vmem:[#allocation2 + $0xb0] sm:$0xff] %vm348_vm1, %v3061_v19  ;;  %v11635_v19 = vld [vmem:[%s11813_s11 + $0x84] sm:$0xff]  }
 0x1d5   : > { %11013 = vmatprep.mubr.msk.bf16.mxu0 %vm348_vm1, %v8011_v20  ;;  %v3057_v62 = vadd.f32 %v11083_v1, %v3041_v41  ;;  %v8015_v20 = vpack.c.bf16 %v8004_v44, %v8003_v61  ;;  %v15104_v41 = vld [vmem:[#allocation6_spill] sm:$0xff] }
 0x1d6   : > { %v8167_v3 = vld [vmem:[#allocation2 + $0x80] sm:$0xff] }
 0x1d7   : > { %3073 = vst.msk [vmem:[#allocation2 + $0x90] sm:$0xff] %vm348_vm1, %v3057_v62  ;;  %v8188_v9 = vadd.f32 %v14640_v28, %v8167_v3  ;;  %v11632_v62 = vld [vmem:[%s11813_s11 + $0x60] sm:$0xff]   ;;  %v8170_v32 = vld [vmem:[#allocation2 + $0x98] sm:$0xff] }
 0x1d8   : > { %10942 = vmatmul.mubr.msk.bf16.vlgmr.msra.gmra.mrb[16].mxu1 %vm564_vm2, %v10020_v11  ;;  %v8006_v11 = vmax.f32 %v7990_v53, 0.0  ;;  %v8191_v61 = vadd.f32 %v14640_v28, %v8170_v32  ;;  %v15107_v53 = vld [vmem:[#allocation9_spill] sm:$0xff] }
 0x1d9   : > { %10958 = vmatpush3.bf16.msra.mxu1 %v7338_v46  ;;  %10945 = vmatprep.mubr.msk.bf16.mxu1 %vm564_vm2, %v10021_v29  ;;  %v10025_v29 = vcombine.low %v14497_v18, %v10016_v37  ;;  %v7972_v46 = vld [vmem:[#allocation2 + $0x70] sm:$0xff]  ;;  %v8017_v18 = vpack.c.bf16 %v8008_v52, %v8007_v5  ;;  %v8204_v39 = vmax.f32 %v8188_v9, 0.0  ;;  %v11634_v37 = vld [vmem:[%s11813_s11 + $0x78] sm:$0xff]  }
 0x1da   : > { %11557 = vmatprep.subr.msk.bf16.mxu1 %vm480_vm0, %v14599_v36  ;;  %v7993_v33 = vadd.f32 %v14568_v25, %v7972_v46  ;;  %v8016_v57 = vpack.c.bf16 %v8006_v11, %v8005_v54  ;;  %v8168_v56 = vld [vmem:[#allocation2 + $0x88] sm:$0xff]  ;;  %v7608_v54 = vsel %vm480_vm0, %v14599_v36, 0  ;;  %v15108_v5 = vld [vmem:[#allocation10_spill] sm:$0xff] }
 0x1db   : > { %v3048_v46 = vld [vmem:[#allocation2 + $0xc8] sm:$0xff] }
 0x1dc   : > { %11014 = vmatmul.mubr.msk.bf16.vlgmr.msra.gmra.mrb[48].mxu0 %vm348_vm1, %v8012_v21  ;;  %v2975_v21 = vpop.f32.mrb[5].mxu1  ;;  %v8009_v7 = vmax.f32 %v7993_v33, 0.0  ;;  %v15109_v33 = vld [vmem:[#allocation11_spill] sm:$0xff] }
 0x1dd   : > { %11017 = vmatprep.mubr.msk.bf16.mxu0 %vm348_vm1, %v8013_v8  ;;  %11030 = vmatpush3.bf16.msra.mxu0 %v8255_v34  ;;  %v11088_v34 = vadd.f32 %v2975_v21, %v13701_v16  ;;  %v10678_v8 = vpop.f32.mrb[6].mxu1  ;;  %v10026_v16 = vcombine.low %v14530_v45, %v10017_v2 }
 0x1de   : > { %v11089_v1 = vadd.f32 %v10678_v8, %v15104_v41  ;;  %v2978_v0 = vpop.f32.mrb[7].mxu1  ;;  %v8169_v14 = vld [vmem:[#allocation2 + $0x90] sm:$0xff]  ;;  %v8018_v44 = vpack.c.bf16 %v8010_v63, %v8009_v7 }
 0x1df   : > { %v11090_v25 = vadd.f32 %v2978_v0, %v15105_v42  ;;  %v8190_v38 = vadd.f32 %v14640_v28, %v8169_v14  ;;  %v10681_v15 = vpop.f32.mrb[8].mxu1  ;;  %v11636_v41 = vld [vmem:[%s11813_s11 + $0x90] sm:$0xff]  }
 0x1e0   : > { %10946 = vmatmul.mubr.msk.bf16.gmra.mrb[20].mxu1 %vm564_vm2, %v10022_v35  ;;  %v8189_v35 = vadd.f32 %v14640_v28, %v8168_v56  ;;  %v3062_v4 = vadd.f32 %v11089_v1, %v3046_v48  ;;  %v11091_v51 = vadd.f32 %v10681_v15, %v15106_v58  ;;  %v2991_v12 = vpop.f32.mrb[9].mxu1  ;;  %v15111_v7 = vld [vmem:[#allocation13_spill] sm:$0xff]  ;;  %v3052_v15 = vld [vmem:[#allocation2 + $0xe8] sm:$0xff] }
 0x1e1   : > { %10949 = vmatprep.mubr.msk.bf16.mxu1 %vm564_vm2, %v10023_v6  ;;  %v3059_v6 = vadd.f32 %v11088_v34, %v3043_v55  ;;  %v3060_v59 = vadd.f32 %v11090_v25, %v3044_v24  ;;  %v11092_v47 = vadd.f32 %v2991_v12, %v15107_v53  ;;  %v10682_v26 = vpop.f32.mrb[10].mxu1  ;;  %v8206_v10 = vmax.f32 %v8190_v38, 0.0  ;;  %v14680_v55 = vld [vmem:[%s15017_s2 + $0x34] sm:$0x3]  ;;  %v15113_v12 = vld [vmem:[#allocation15_spill] sm:$0xff] }
 0x1e2   : > { %v8205_v50 = vmax.f32 %v8189_v35, 0.0  ;;  %3078 = vst.msk [vmem:[#allocation2 + $0xb8] sm:$0xff] %vm348_vm1, %v3062_v4  ;;  %v3065_v11 = vadd.f32 %v11091_v51, %v3049_v27  ;;  %v11093_v52 = vadd.f32 %v10682_v26, %v15108_v5  ;;  %v3053_v24 = vld [vmem:[#allocation2 + $0xf0] sm:$0xff]  ;;  %v14697_v35 = vld [vmem:[%s11813_s11 + $0x64] sm:$0xf] }
 0x1e3   : > { %3075 = vst.msk [vmem:[#allocation2 + $0xa0] sm:$0xff] %vm348_vm1, %v3059_v6  ;;  %3076 = vst.msk [vmem:[#allocation2 + $0xa8] sm:$0xff] %vm348_vm1, %v3060_v59  ;;  %v3063_v3 = vadd.f32 %v11092_v47, %v3047_v60  ;;  %v15110_v6 = vld [vmem:[#allocation12_spill] sm:$0xff]  ;;  %v7503_v58 = vrot.slane %v14697_v35, 6  ;;  %v10070_v53 = vld [vmem:[%s11813_s11 + $0x60] sm:$0xc] }
 0x1e4   : > { %11018 = vmatmul.mubr.msk.bf16.gmra.mrb[52].mxu0 %vm348_vm1, %v8014_v23  ;;  %v8220_v45 = vpack.c.bf16 %v8205_v50, %v8204_v39  ;;  %v8207_v23 = vmax.f32 %v8191_v61, 0.0  ;;  %3081 = vst.msk [vmem:[#allocation2 + $0xd0] sm:$0xff] %vm348_vm1, %v3065_v11  ;;  %v15112_v61 = vld [vmem:[#allocation14_spill] sm:$0xff]  ;;  %v10072_v47 = vld [vmem:[%s11813_s11 + $0x68] sm:$0x3] }
 0x1e5   : > { %11021 = vmatprep.mubr.msk.bf16.mxu0 %vm348_vm1, %v8015_v20  ;;  %v3050_v20 = vld [vmem:[#allocation2 + $0xd8] sm:$0xff]  ;;  %3079 = vst.msk [vmem:[#allocation2 + $0xc0] sm:$0xff] %vm348_vm1, %v3063_v3 }
 0x1e6   : > { %v3066_v36 = vadd.f32 %v11093_v52, %v3050_v20  ;;  %v11637_v20 = vld [vmem:[%s11813_s11 + $0x9c] sm:$0xff]   ;;  %v10094_v52 = vrot.slane %v10070_v53, 10 }
 0x1e7   : > { %v14723_v3 = vld [vmem:[%s11813_s11 + $0x7c] sm:$0xf] }
 0x1e8   : > { %10950 = vmatmul.mubr.msk.bf16.gmra.mrb[24].mxu1 %vm564_vm2, %v10024_v31  ;;  %3082 = vst.msk [vmem:[#allocation2 + $0xd8] sm:$0xff] %vm348_vm1, %v3066_v36 }
 0x1e9   : > { %10953 = vmatprep.mubr.msk.bf16.mxu1 %vm564_vm2, %v10025_v29  ;;  %v2994_v29 = vpop.f32.mrb[11].mxu1  ;;  %v8174_v40 = vld [vmem:[#allocation2 + $0xb8] sm:$0xff] }
 0x1ea   : > { %v8171_v49 = vld [vmem:[#allocation2 + $0xa0] sm:$0xff]  ;;  %v8172_v43 = vld [vmem:[#allocation2 + $0xa8] sm:$0xff]  ;;  %v11094_v22 = vadd.f32 %v2994_v29, %v15109_v33  ;;  %v8195_v8 = vadd.f32 %v14640_v28, %v8174_v40  ;;  %v10685_v0 = vpop.f32.mrb[12].mxu1  ;;  %v7505_v29 = vrot.slane %v7503_v58, 4 }
 0x1eb   : > { %v8192_v31 = vadd.f32 %v14640_v28, %v8171_v49  ;;  %v8193_v21 = vadd.f32 %v14640_v28, %v8172_v43  ;;  %v11095_v42 = vadd.f32 %v10685_v0, %v15110_v6  ;;  %v3007_v25 = vpop.f32.mrb[13].mxu1  ;;  %v8177_v50 = vld [vmem:[#allocation2 + $0xd0] sm:$0xff] }
 0x1ec   : > { %11022 = vmatmul.mubr.msk.bf16.gmra.mrb[56].mxu0 %vm348_vm1, %v8016_v57  ;;  %v8221_v57 = vpack.c.bf16 %v8207_v23, %v8206_v10  ;;  %v3064_v2 = vadd.f32 %v11094_v22, %v3048_v46  ;;  %v8211_v1 = vmax.f32 %v8195_v8, 0.0  ;;  %v8175_v4 = vld [vmem:[#allocation2 + $0xc0] sm:$0xff]  ;;  %v11096_v63 = vadd.f32 %v3007_v25, %v15111_v7  ;;  %v10686_v59 = vpop.f32.mrb[14].mxu1  ;;  %v14719_v10 = vld [vmem:[%s11813_s11 + $0x70] sm:$0xf] }
 0x1ed   : > { %11025 = vmatprep.mubr.msk.bf16.mxu0 %vm348_vm1, %v8017_v18  ;;  %v8173_v18 = vld [vmem:[#allocation2 + $0xb0] sm:$0xff]  ;;  %v8208_v17 = vmax.f32 %v8192_v31, 0.0  ;;  %v8209_v34 = vmax.f32 %v8193_v21, 0.0  ;;  %v8196_v39 = vadd.f32 %v14640_v28, %v8175_v4  ;;  %v3010_v38 = vpop.f32.mrb[15].mxu1  ;;  %v8198_v49 = vadd.f32 %v14640_v28, %v8177_v50  ;;  %v11638_v31 = vld [vmem:[%s11813_s11 + $0xa8] sm:$0xff]  }
 0x1ee   : > { %3080 = vst.msk [vmem:[#allocation2 + $0xc8] sm:$0xff] %vm348_vm1, %v3064_v2  ;;  %v8194_v56 = vadd.f32 %v14640_v28, %v8173_v18  ;;  %v11098_v60 = vadd.f32 %v3010_v38, %v15113_v12  ;;  %v7506_v46 = vrot.slane %v10072_v47, 6  ;;  %v10073_v22 = vld [vmem:[%s11813_s11 + $0x6c] sm:$0xc]  ;;  %v10075_v21 = vld [vmem:[%s11813_s11 + $0x74] sm:$0x3] }
 0x1ef   : > { %v8222_v48 = vpack.c.bf16 %v8209_v34, %v8208_v17  ;;  %v8178_v14 = vld [vmem:[#allocation2 + $0xd8] sm:$0xff]  ;;  %v8214_v40 = vmax.f32 %v8198_v49, 0.0  ;;  %v7510_v36 = vrot.slane %v14719_v10, 6  ;;  %v7517_v17 = vrot.slane %v14723_v3, 6  ;;  %v10078_v8 = vld [vmem:[%s11813_s11 + $0x80] sm:$0x3] }
 0x1f0   : > { %10954 = vmatmul.mubr.msk.bf16.gmra.mrb[28].mxu1 %vm564_vm2, %v10026_v16  ;;  %v8210_v9 = vmax.f32 %v8194_v56, 0.0  ;;  %v3051_v16 = vld [vmem:[#allocation2 + $0xe0] sm:$0xff]  ;;  %v7507_v18 = vsel %vm11816_vm5, %v7505_v29, %v7506_v46  ;;  %v10076_v2 = vld [vmem:[%s11813_s11 + $0x78] sm:$0xc]  ;;  %v10095_v56 = vrot.slane %v10073_v22, 10  ;;  %v7520_v50 = vrot.slane %v10078_v8, 6 }
 0x1f1   : > { %10959 = vmatprep.mubr.msk.bf16.mxu1 %vm564_vm2, %v11632_v62  ;;  %v3054_v62 = vld [vmem:[#allocation2 + $0xf8] sm:$0xff]  ;;  %v3067_v51 = vadd.f32 %v11096_v63, %v3051_v16  ;;  %v7512_v0 = vrot.slane %v7510_v36, 4  ;;  %v10096_v6 = vrot.slane %v10076_v2, 10  ;;  %v7519_v4 = vrot.slane %v7517_v17, 4  ;;  %v14744_v7 = vld [vmem:[%s11813_s11 + $0x88] sm:$0xf] }
 0x1f2   : > { %v8223_v32 = vpack.c.bf16 %v8211_v1, %v8210_v9  ;;  %v10084_v12 = vld [vmem:[%s11813_s11 + $0x98] sm:$0x3] }
 0x1f3   : > { %3083 = vst.msk [vmem:[#allocation2 + $0xe0] sm:$0xff] %vm348_vm1, %v3067_v51  ;;  %v7521_v38 = vsel %vm11816_vm5, %v7519_v4, %v7520_v50  ;;  %v10082_v51 = vld [vmem:[%s11813_s11 + $0x90] sm:$0xc] }
 0x1f4   : > { %11026 = vmatmul.mubr.msk.bf16.gmra.mrb[60].mxu0 %vm348_vm1, %v8018_v44  ;;  %v11097_v44 = vadd.f32 %v10686_v59, %v15112_v61  ;;  %v14748_v59 = vld [vmem:[%s11813_s11 + $0x94] sm:$0xf]  ;;  %v7524_v61 = vrot.slane %v14744_v7, 6 }
 0x1f5   : > { %11031 = vmatprep.mubr.msk.bf16.mxu0 %vm348_vm1, %v8220_v45  ;;  %v3069_v45 = vadd.f32 %v11095_v42, %v3053_v24  ;;  %v8176_v27 = vld [vmem:[#allocation2 + $0xc8] sm:$0xff] }
 0x1f6   : > { %v8197_v23 = vadd.f32 %v14640_v28, %v8176_v27  ;;  %v3070_v26 = vadd.f32 %v11097_v44, %v3054_v62  ;;  %v7511_v62 = vsel %vm11816_vm5, %v10095_v56, %v7510_v36  ;;  %v7518_v44 = vsel %vm11816_vm5, %v10096_v6, %v7517_v17  ;;  %v10081_v27 = vld [vmem:[%s11813_s11 + $0x8c] sm:$0x3]  ;;  %v10090_v36 = vld [vmem:[%s11813_s11 + $0xb0] sm:$0x3]  ;;  %v10091_v6 = vld [vmem:[%s11813_s11 + $0xb4] sm:$0xc] }
 0x1f7   : > { %3085 = vst.msk [vmem:[#allocation2 + $0xf0] sm:$0xff] %vm348_vm1, %v3069_v45  ;;  %v10105_v49 = vcombine.low %v7518_v44, %v7521_v38  ;;  %v7526_v47 = vrot.slane %v7524_v61, 4  ;;  %v7548_v56 = vrot.slane %v10090_v36, 6  ;;  %v10120_v44 = vld [vmem:[%s11813_s11 + $0x74] sm:$0xf] }
 0x1f8   : > { %10960 = vmatmul.mubr.msk.bf16.vlgmr.msra.gmra.mrb[16].mxu1 %vm564_vm2, %v11633_v30  ;;  %v8199_v30 = vadd.f32 %v14640_v28, %v8178_v14  ;;  %v8213_v11 = vmax.f32 %v8197_v23, 0.0  ;;  %3086 = vst.msk [vmem:[#allocation2 + $0xf8] sm:$0xff] %vm348_vm1, %v3070_v26  ;;  %v7527_v26 = vrot.slane %v10081_v27, 6  ;;  %v10121_v38 = vld [vmem:[%s11813_s11 + $0x80] sm:$0xf] }
 0x1f9   : > { %10976 = vmatpush3.bf16.msra.mxu1 %v7608_v54  ;;  %10963 = vmatprep.mubr.msk.bf16.mxu1 %vm564_vm2, %v11634_v37  ;;  %v3068_v37 = vadd.f32 %v11098_v60, %v3052_v15  ;;  %v8212_v54 = vmax.f32 %v8196_v39, 0.0  ;;  %v10079_v15 = vld [vmem:[%s11813_s11 + $0x84] sm:$0xc]  ;;  %v10130_v27 = vcombine.low %v14723_v3, %v10121_v38 }
 0x1fa   : > { %11558 = vmatprep.subr.msk.bf16.mxu1 %vm480_vm0, %v14680_v55  ;;  %v8215_v5 = vmax.f32 %v8199_v30, 0.0  ;;  %v7531_v30 = vrot.slane %v14748_v59, 6  ;;  %v10097_v53 = vrot.slane %v10079_v15, 10  ;;  %v10129_v15 = vcombine.low %v14719_v10, %v10120_v44  ;;  %v10124_v3 = vld [vmem:[%s11813_s11 + $0xa4] sm:$0xf] }
 0x1fb   : > { %3084 = vst.msk [vmem:[#allocation2 + $0xe8] sm:$0xff] %vm348_vm1, %v3068_v37  ;;  %v8224_v43 = vpack.c.bf16 %v8213_v11, %v8212_v54  ;;  %v10098_v37 = vrot.slane %v10082_v51, 10  ;;  %v7534_v54 = vrot.slane %v10084_v12, 6  ;;  %v14771_v11 = vld [vmem:[%s11813_s11 + $0xa0] sm:$0xf] }
 0x1fc   : > { %11032 = vmatmul.mubr.msk.bf16.vlgmr.msra.gmra.mrb[48].mxu0 %vm348_vm1, %v8221_v57  ;;  %v8225_v33 = vpack.c.bf16 %v8215_v5, %v8214_v40  ;;  %v7504_v57 = vsel %vm11816_vm5, %v10094_v52, %v7503_v58  ;;  %v14774_v5 = vld [vmem:[%s11813_s11 + $0xac] sm:$0xf]  ;;  %v7528_v52 = vsel %vm11816_vm5, %v7526_v47, %v7527_v26  ;;  %v7538_v29 = vrot.slane %v14771_v11, 6  ;;  %v10085_v40 = vld [vmem:[%s11813_s11 + $0x9c] sm:$0xc] }
 0x1fd   : > { %11035 = vmatprep.mubr.msk.bf16.mxu0 %vm348_vm1, %v8222_v48  ;;  %v11639_v48 = vld [vmem:[%s11813_s11 + $0xb4] sm:$0xff]   ;;  %v10103_v1 = vcombine.low %v7504_v57, %v7507_v18  ;;  %v7532_v46 = vsel %vm11816_vm5, %v10098_v37, %v7531_v30  ;;  %v7545_v22 = vrot.slane %v14774_v5, 6  ;;  %v10099_v2 = vrot.slane %v10085_v40, 10  ;;  %v10125_v51 = vld [vmem:[%s11813_s11 + $0xb0] sm:$0xf]  ;;  %v5957_v37 = vld [vmem:[#allocation2 + $0x108] sm:$0xff] }
 0x1fe   : > { %v8181_v34 = vld [vmem:[#allocation2 + $0xf0] sm:$0xff]  ;;  %v7540_v17 = vrot.slane %v7538_v29, 4  ;;  %v10133_v12 = vcombine.low %v14771_v11, %v10124_v3  ;;  %v5959_v47 = vld [vmem:[#allocation2 + $0x118] sm:$0xff] }
 0x1ff   : > { %v8182_v9 = vld [vmem:[#allocation2 + $0xf8] sm:$0xff]  ;;  %v8202_v25 = vadd.f32 %v14640_v28, %v8181_v34 }
 0x200   : > { %10964 = vmatmul.mubr.msk.bf16.gmra.mrb[20].mxu1 %vm564_vm2, %v11635_v19  ;;  %v7513_v19 = vrot.slane %v10075_v21, 6  ;;  %v8203_v16 = vadd.f32 %v14640_v28, %v8182_v9  ;;  %v10088_v21 = vld [vmem:[%s11813_s11 + $0xa8] sm:$0xc] }
 0x201   : > { %10967 = vmatprep.mubr.msk.bf16.mxu1 %vm564_vm2, %v11636_v41  ;;  %v8179_v41 = vld [vmem:[#allocation2 + $0xe0] sm:$0xff]  ;;  %v10100_v8 = vrot.slane %v10088_v21, 10 }
 0x202   : > { %v8200_v24 = vadd.f32 %v14640_v28, %v8179_v41  ;;  %v8180_v42 = vld [vmem:[#allocation2 + $0xe8] sm:$0xff]  ;;  %v7514_v39 = vsel %vm11816_vm5, %v7512_v0, %v7513_v19  ;;  %v10092_v19 = vld [vmem:[%s11813_s11 + $0xb8] sm:$0xf]  ;;  %v7539_v41 = vsel %vm11816_vm5, %v10099_v2, %v7538_v29  ;;  %v5960_v29 = vld [vmem:[#allocation2 + $0x120] sm:$0xff] }
 0x203   : > { %v8201_v63 = vadd.f32 %v14640_v28, %v8180_v42  ;;  %v8218_v28 = vmax.f32 %v8202_v25, 0.0  ;;  %v10104_v60 = vcombine.low %v7511_v62, %v7514_v39  ;;  %v7552_v0 = vrot.slane %v10092_v19, 6  ;;  %v10093_v42 = vld [vmem:[%s11813_s11 + $0xbc] sm:$0x3]  ;;  %v10165_v25 = vld [vmem:[%s15018_s3 + $0x8] sm:$0xf] }
 0x204   : > { %11036 = vmatmul.mubr.msk.bf16.gmra.mrb[52].mxu0 %vm348_vm1, %v8223_v32  ;;  %v8219_v32 = vmax.f32 %v8203_v16, 0.0  ;;  %v8216_v14 = vmax.f32 %v8200_v24, 0.0  ;;  %v7546_v24 = vsel %vm11816_vm5, %v10100_v8, %v7545_v22  ;;  %11561 = vmatprep.subr.msk.bf16.mxu0 %vm8044_vm3, %v10165_v25  ;;  %v8458_v16 = vsel %vm8044_vm3, %v10165_v25, 0  ;;  %v14854_v21 = vld [vmem:[%s15019_s4 + $0x2] ss:$0 sm:$0xff]  ;;  %v5967_v25 = vld [vmem:[#allocation2 + $0x158] sm:$0xff] }
 0x205   : > { %11039 = vmatprep.mubr.msk.bf16.mxu0 %vm348_vm1, %v8224_v43  ;;  %v8217_v45 = vmax.f32 %v8201_v63, 0.0  ;;  %11048 = vmatpush3.bf16.msra.mxu0 %v8458_v16  ;;  %v10101_v63 = vrot.slane %v10091_v6, 10  ;;  %v7554_v62 = vrot.slane %v7552_v0, 4 }
 0x206   : > { %v8227_v23 = vpack.c.bf16 %v8219_v32, %v8218_v28  ;;  %v7555_v32 = vrot.slane %v10093_v42, 6 }
 0x207   : > { %v8226_v58 = vpack.c.bf16 %v8217_v45, %v8216_v14  ;;  %v7553_v39 = vsel %vm11816_vm5, %v10101_v63, %v7552_v0  ;;  %v10119_v45 = vld [vmem:[%s11813_s11 + $0x68] sm:$0xf]  ;;  %v5966_v0 = vld [vmem:[#allocation2 + $0x150] sm:$0xff] }
 0x208   : > { %10968 = vmatmul.mubr.msk.bf16.gmra.mrb[24].mxu1 %vm564_vm2, %v11637_v20  ;;  %v7790_v20 = vsel %vm480_vm0, %v14680_v55, 0  ;;  %v7525_v55 = vsel %vm11816_vm5, %v10097_v53, %v7524_v61  ;;  %v7556_v14 = vsel %vm11816_vm5, %v7554_v62, %v7555_v32  ;;  %v10128_v28 = vcombine.low %v14697_v35, %v10119_v45  ;;  %v14831_v35 = vld [vmem:[%s15018_s3 + $0xc] sm:$0xf] }
 0x209   : > { %10971 = vmatprep.mubr.msk.bf16.mxu1 %vm564_vm2, %v11638_v31  ;;  %v7533_v31 = vrot.slane %v7531_v30, 4  ;;  %v10106_v57 = vcombine.low %v7525_v55, %v7528_v52  ;;  %v10110_v61 = vcombine.low %v7553_v39, %v7556_v14  ;;  %v10123_v30 = vld [vmem:[%s11813_s11 + $0x98] sm:$0xf]  ;;  %11562 = vmatprep.subr.msk.bf16.mxu0 %vm8044_vm3, %v14831_v35  ;;  %v5962_v52 = vld [vmem:[#allocation2 + $0x130] sm:$0xff]  ;;  %v5965_v62 = vld [vmem:[#allocation2 + $0x148] sm:$0xff]  ;;  %vm8856_vm0 = vcmask 60416  }
 0x20a   : > { %v10132_v10 = vcombine.low %v14748_v59, %v10123_v30  ;;  %v5956_v59 = vld [vmem:[#allocation2 + $0x100] sm:$0xff] }
 0x20b   : > { %v7535_v43 = vsel %vm11816_vm5, %v7533_v31, %v7534_v54 }
 0x20c   : > { %11040 = vmatmul.mubr.msk.bf16.gmra.mrb[56].mxu0 %vm348_vm1, %v8225_v33  ;;  %v10087_v33 = vld [vmem:[%s11813_s11 + $0xa4] sm:$0x3]  ;;  %v10107_v18 = vcombine.low %v7532_v46, %v7535_v43  ;;  %v5963_v43 = vld [vmem:[#allocation2 + $0x138] sm:$0xff] }
 0x20d   : > { %11043 = vmatprep.mubr.msk.bf16.mxu0 %vm348_vm1, %v8226_v58  ;;  %v7541_v34 = vrot.slane %v10087_v33, 6  ;;  %v10131_v58 = vcombine.low %v14744_v7, %v10122_v13  ;;  %v10126_v7 = vld [vmem:[%s11813_s11 + $0xbc] sm:$0xf] }
 0x210   : > { %10972 = vmatmul.mubr.msk.bf16.gmra.mrb[28].mxu1 %vm564_vm2, %v11639_v48  ;;  %v7547_v48 = vrot.slane %v7545_v22, 4  ;;  %v5961_v22 = vld [vmem:[#allocation2 + $0x128] sm:$0xff] }
 0x211   : > { %10977 = vmatprep.mubr.msk.bf16.mxu1 %vm564_vm2, %v10103_v1  ;;  %v7542_v1 = vsel %vm11816_vm5, %v7540_v17, %v7541_v34 }
 0x212   : > { %v7549_v9 = vsel %vm11816_vm5, %v7547_v48, %v7548_v56  ;;  %v10108_v4 = vcombine.low %v7539_v41, %v7542_v1 }
 0x213   : > { %v10109_v50 = vcombine.low %v7546_v24, %v7549_v9  ;;  %v5964_v9 = vld [vmem:[#allocation2 + $0x140] sm:$0xff] }
 0x214   : > { %11044 = vmatmul.mubr.msk.bf16.gmra.mrb[60].mxu0 %vm348_vm1, %v8227_v23  ;;  %v10135_v23 = vcombine.low %v10092_v19, %v10126_v7 }
 0x218   : > { %10978 = vmatmul.mubr.msk.bf16.vlgmr.msra.gmra.mrb[16].mxu1 %vm564_vm2, %v10104_v60  ;;  %v10134_v60 = vcombine.low %v14774_v5, %v10125_v51 }
 0x219   : > { %10994 = vmatpush3.bf16.msra.mxu1 %v7790_v20  ;;  %10981 = vmatprep.mubr.msk.bf16.mxu1 %vm564_vm2, %v10105_v49  ;;  %v5958_v49 = vld [vmem:[#allocation2 + $0x110] sm:$0xff] }
 0x220   : > { %10982 = vmatmul.mubr.msk.bf16.gmra.mrb[20].mxu1 %vm564_vm2, %v10106_v57 }
 0x221   : > { %10985 = vmatprep.mubr.msk.bf16.mxu1 %vm564_vm2, %v10107_v18 }
 0x228   : > { %10986 = vmatmul.mubr.msk.bf16.gmra.mrb[24].mxu1 %vm564_vm2, %v10108_v4 }
 0x229   : > { %10989 = vmatprep.mubr.msk.bf16.mxu1 %vm564_vm2, %v10109_v50 }
 0x230   : > { %10990 = vmatmul.mubr.msk.bf16.gmra.mrb[28].mxu1 %vm564_vm2, %v10110_v61 }
 0x231   : > { %10995 = vmatprep.mubr.msk.bf16.mxu1 %vm564_vm2, %v10128_v28 }
 0x238   : > { %10996 = vmatmul.mubr.msk.bf16.vlgmr.msra.gmra.mrb[16].mxu1 %vm564_vm2, %v10129_v15 }
 0x239   : > { %10999 = vmatprep.mubr.msk.bf16.mxu1 %vm564_vm2, %v10130_v27  ;;  %v8661_v27 = vsel %vm8044_vm3, %v14831_v35, 0  ;;  %v5970_v35 = vld [vmem:[#allocation2 + $0x170] sm:$0xff] }
 0x240   : > { %11000 = vmatmul.mubr.msk.bf16.gmra.mrb[20].mxu1 %vm564_vm2, %v10131_v58 }
 0x241   : > { %11003 = vmatprep.mubr.msk.bf16.mxu1 %vm564_vm2, %v10132_v10 }
 0x248   : > { %11004 = vmatmul.mubr.msk.bf16.gmra.mrb[24].mxu1 %vm564_vm2, %v10133_v12 }
 0x249   : > { %11007 = vmatprep.mubr.msk.bf16.mxu1 %vm564_vm2, %v10134_v60  ;;  %v5968_v60 = vld [vmem:[#allocation2 + $0x160] sm:$0xff] }
 0x250   : > { %11008 = vmatmul.mubr.msk.bf16.gmra.mrb[28].mxu1 %vm564_vm2, %v10135_v23 }
 0x28f   : > { %v10835_v53 = vpop.f32.mrb[32].mxu0 }
 0x290   : > { %v5974_v26 = vadd.f32 %v10835_v53, %v5958_v49  ;;  %v5876_v20 = vpop.f32.mrb[33].mxu0  ;;  %v5971_v49 = vld [vmem:[#allocation2 + $0x178] sm:$0xff] }
 0x291   : > { %v5972_v31 = vadd.f32 %v5956_v59, %v5876_v20  ;;  %v10836_v54 = vpop.f32.mrb[34].mxu0  ;;  %v5969_v20 = vld [vmem:[#allocation2 + $0x168] sm:$0xff] }
 0x292   : > { %5990 = vst.msk [vmem:[#allocation2 + $0x110] sm:$0xff] %vm348_vm1, %v5974_v26  ;;  %v5975_v11 = vadd.f32 %v10836_v54, %v5959_v47  ;;  %v5879_v5 = vpop.f32.mrb[35].mxu0 }
 0x293   : > { %5988 = vst.msk [vmem:[#allocation2 + $0x100] sm:$0xff] %vm348_vm1, %v5972_v31  ;;  %v5973_v55 = vadd.f32 %v5957_v37, %v5879_v5 }
 0x294   : > { %5991 = vst.msk [vmem:[#allocation2 + $0x118] sm:$0xff] %vm348_vm1, %v5975_v11 }
 0x295   : > { %5989 = vst.msk [vmem:[#allocation2 + $0x108] sm:$0xff] %vm348_vm1, %v5973_v55 }
 0x297   : > { %v10839_v46 = vpop.f32.mrb[36].mxu0 }
 0x298   : > { %v5978_v40 = vadd.f32 %v10839_v46, %v5962_v52  ;;  %v5892_v33 = vpop.f32.mrb[37].mxu0 }
 0x299   : > { %v5976_v36 = vadd.f32 %v5960_v29, %v5892_v33  ;;  %v10840_v57 = vpop.f32.mrb[38].mxu0  ;;  %v8372_v18 = vld [vmem:[#allocation2 + $0x110] sm:$0xff] }
 0x29a   : > { %5994 = vst.msk [vmem:[#allocation2 + $0x130] sm:$0xff] %vm348_vm1, %v5978_v40  ;;  %v5979_v2 = vadd.f32 %v10840_v57, %v5963_v43  ;;  %v5895_v17 = vpop.f32.mrb[39].mxu0  ;;  %v8370_v34 = vld [vmem:[#allocation2 + $0x100] sm:$0xff]  ;;  %v8393_v41 = vadd.f32 %v14854_v21, %v8372_v18 }
 0x29b   : > { %5992 = vst.msk [vmem:[#allocation2 + $0x120] sm:$0xff] %vm348_vm1, %v5976_v36  ;;  %v5977_v8 = vadd.f32 %v5961_v22, %v5895_v17  ;;  %v8391_v48 = vadd.f32 %v14854_v21, %v8370_v34  ;;  %v8373_v56 = vld [vmem:[#allocation2 + $0x118] sm:$0xff] }
 0x29c   : > { %5995 = vst.msk [vmem:[#allocation2 + $0x138] sm:$0xff] %vm348_vm1, %v5979_v2  ;;  %v8371_v19 = vld [vmem:[#allocation2 + $0x108] sm:$0xff]  ;;  %v8394_v1 = vadd.f32 %v14854_v21, %v8373_v56  ;;  %v8409_v32 = vmax.f32 %v8393_v41, 0.0 }
 0x29d   : > { %5993 = vst.msk [vmem:[#allocation2 + $0x128] sm:$0xff] %vm348_vm1, %v5977_v8  ;;  %v8392_v24 = vadd.f32 %v14854_v21, %v8371_v19  ;;  %v8407_v16 = vmax.f32 %v8391_v48, 0.0 }
 0x29e   : > { %v8410_v6 = vmax.f32 %v8394_v1, 0.0 }
 0x29f   : > { %v10843_v42 = vpop.f32.mrb[40].mxu0  ;;  %v8408_v4 = vmax.f32 %v8392_v24, 0.0 }
 0x2a0   : > { %v5982_v50 = vadd.f32 %v10843_v42, %v5966_v0  ;;  %v5908_v63 = vpop.f32.mrb[41].mxu0  ;;  %v8424_v38 = vpack.c.bf16 %v8410_v6, %v8409_v32  ;;  %v7908_v32 = vld [vmem:[#allocation2 + $0x190] sm:$0xff] }
 0x2a1   : > { %v5980_v39 = vadd.f32 %v5964_v9, %v5908_v63  ;;  %v10844_v14 = vpop.f32.mrb[42].mxu0  ;;  %v8423_v45 = vpack.c.bf16 %v8408_v4, %v8407_v16  ;;  %v8376_v61 = vld [vmem:[#allocation2 + $0x130] sm:$0xff] }
 0x2a2   : > { %5998 = vst.msk [vmem:[#allocation2 + $0x150] sm:$0xff] %vm348_vm1, %v5982_v50  ;;  %v5983_v28 = vadd.f32 %v10844_v14, %v5967_v25  ;;  %v5911_v44 = vpop.f32.mrb[43].mxu0  ;;  %v8374_v15 = vld [vmem:[#allocation2 + $0x120] sm:$0xff]  ;;  %v8397_v3 = vadd.f32 %v14854_v21, %v8376_v61 }
 0x2a3   : > { %5996 = vst.msk [vmem:[#allocation2 + $0x140] sm:$0xff] %vm348_vm1, %v5980_v39  ;;  %v5981_v13 = vadd.f32 %v5965_v62, %v5911_v44  ;;  %11049 = vmatprep.mubr.msk.bf16.mxu0 %vm348_vm1, %v8423_v45  ;;  %v8395_v30 = vadd.f32 %v14854_v21, %v8374_v15  ;;  %v8377_v58 = vld [vmem:[#allocation2 + $0x138] sm:$0xff]  ;;  %v7906_v39 = vld [vmem:[#allocation2 + $0x180] sm:$0xff]  ;;  %v7907_v44 = vld [vmem:[#allocation2 + $0x188] sm:$0xff] }
 0x2a4   : > { %5999 = vst.msk [vmem:[#allocation2 + $0x158] sm:$0xff] %vm348_vm1, %v5983_v28  ;;  %11050 = vmatmul.mubr.msk.bf16.vlgmr.msra.gmra.mrb[48].mxu0 %vm348_vm1, %v8424_v38  ;;  %v8375_v10 = vld [vmem:[#allocation2 + $0x128] sm:$0xff]  ;;  %v8398_v51 = vadd.f32 %v14854_v21, %v8377_v58  ;;  %v8413_v37 = vmax.f32 %v8397_v3, 0.0  ;;  %v7909_v45 = vld [vmem:[#allocation2 + $0x198] sm:$0xff]  ;;  %v7910_v58 = vld [vmem:[#allocation2 + $0x1a0] sm:$0xff] }
 0x2a5   : > { %5997 = vst.msk [vmem:[#allocation2 + $0x148] sm:$0xff] %vm348_vm1, %v5981_v13  ;;  %v8396_v12 = vadd.f32 %v14854_v21, %v8375_v10  ;;  %11066 = vmatpush3.bf16.msra.mxu0 %v8661_v27  ;;  %v8411_v59 = vmax.f32 %v8395_v30, 0.0  ;;  %v7912_v30 = vld [vmem:[#allocation2 + $0x1b0] sm:$0xff]  ;;  %v7913_v3 = vld [vmem:[#allocation2 + $0x1b8] sm:$0xff] }
 0x2a6   : > { %v8414_v7 = vmax.f32 %v8398_v51, 0.0 }
 0x2a7   : > { %v10847_v23 = vpop.f32.mrb[44].mxu0  ;;  %v8412_v53 = vmax.f32 %v8396_v12, 0.0  ;;  %v7911_v12 = vld [vmem:[#allocation2 + $0x1a8] sm:$0xff] }
 0x2a8   : > { %v5986_v47 = vadd.f32 %v10847_v23, %v5970_v35  ;;  %v5924_v26 = vpop.f32.mrb[45].mxu0  ;;  %v8426_v29 = vpack.c.bf16 %v8414_v7, %v8413_v37 }
 0x2a9   : > { %v5984_v31 = vadd.f32 %v5968_v60, %v5924_v26  ;;  %v10848_v54 = vpop.f32.mrb[46].mxu0  ;;  %v8425_v11 = vpack.c.bf16 %v8412_v53, %v8411_v59  ;;  %v8380_v5 = vld [vmem:[#allocation2 + $0x150] sm:$0xff]  ;;  %v14901_v60 = vld [vmem:[%s15019_s4 + $0x3] ss:$0 sm:$0xff] }
 0x2aa   : > { %6002 = vst.msk [vmem:[#allocation2 + $0x170] sm:$0xff] %vm348_vm1, %v5986_v47  ;;  %v5987_v55 = vadd.f32 %v10848_v54, %v5971_v49  ;;  %v5927_v52 = vpop.f32.mrb[47].mxu0  ;;  %v8378_v46 = vld [vmem:[#allocation2 + $0x140] sm:$0xff]  ;;  %v8401_v36 = vadd.f32 %v14854_v21, %v8380_v5  ;;  %v7916_v5 = vld [vmem:[#allocation2 + $0x1d0] sm:$0xff] }
 0x2ab   : > { %6000 = vst.msk [vmem:[#allocation2 + $0x160] sm:$0xff] %vm348_vm1, %v5984_v31  ;;  %v5985_v43 = vadd.f32 %v5969_v20, %v5927_v52  ;;  %11053 = vmatprep.mubr.msk.bf16.mxu0 %vm348_vm1, %v8425_v11  ;;  %v8399_v40 = vadd.f32 %v14854_v21, %v8378_v46  ;;  %v8381_v33 = vld [vmem:[#allocation2 + $0x158] sm:$0xff]  ;;  %v7914_v52 = vld [vmem:[#allocation2 + $0x1c0] sm:$0xff] }
 0x2ac   : > { %6003 = vst.msk [vmem:[#allocation2 + $0x178] sm:$0xff] %vm348_vm1, %v5987_v55  ;;  %11054 = vmatmul.mubr.msk.bf16.gmra.mrb[52].mxu0 %vm348_vm1, %v8426_v29  ;;  %v8379_v22 = vld [vmem:[#allocation2 + $0x148] sm:$0xff]  ;;  %v8402_v57 = vadd.f32 %v14854_v21, %v8381_v33  ;;  %v8417_v8 = vmax.f32 %v8401_v36, 0.0 }
 0x2ad   : > { %6001 = vst.msk [vmem:[#allocation2 + $0x168] sm:$0xff] %vm348_vm1, %v5985_v43  ;;  %v8400_v18 = vadd.f32 %v14854_v21, %v8379_v22  ;;  %v8415_v17 = vmax.f32 %v8399_v40, 0.0  ;;  %v7917_v43 = vld [vmem:[#allocation2 + $0x1d8] sm:$0xff] }
 0x2ae   : > { %v8418_v2 = vmax.f32 %v8402_v57, 0.0  ;;  %v7915_v57 = vld [vmem:[#allocation2 + $0x1c8] sm:$0xff] }
 0x2af   : > { %v8416_v34 = vmax.f32 %v8400_v18, 0.0 }
 0x2b0   : > { %v8428_v19 = vpack.c.bf16 %v8418_v2, %v8417_v8 }
 0x2b1   : > { %v8427_v48 = vpack.c.bf16 %v8416_v34, %v8415_v17  ;;  %v8384_v56 = vld [vmem:[#allocation2 + $0x170] sm:$0xff] }
 0x2b2   : > { %v8382_v41 = vld [vmem:[#allocation2 + $0x160] sm:$0xff]  ;;  %v8405_v9 = vadd.f32 %v14854_v21, %v8384_v56 }
 0x2b3   : > { %11057 = vmatprep.mubr.msk.bf16.mxu0 %vm348_vm1, %v8427_v48  ;;  %v8403_v1 = vadd.f32 %v14854_v21, %v8382_v41  ;;  %v8385_v0 = vld [vmem:[#allocation2 + $0x178] sm:$0xff] }
 0x2b4   : > { %11058 = vmatmul.mubr.msk.bf16.gmra.mrb[56].mxu0 %vm348_vm1, %v8428_v19  ;;  %v8383_v24 = vld [vmem:[#allocation2 + $0x168] sm:$0xff]  ;;  %v8406_v6 = vadd.f32 %v14854_v21, %v8385_v0  ;;  %v8421_v50 = vmax.f32 %v8405_v9, 0.0 }
 0x2b5   : > { %v8404_v42 = vadd.f32 %v14854_v21, %v8383_v24  ;;  %v8419_v16 = vmax.f32 %v8403_v1, 0.0 }
 0x2b6   : > { %v8422_v25 = vmax.f32 %v8406_v6, 0.0 }
 0x2b7   : > { %v8420_v4 = vmax.f32 %v8404_v42, 0.0 }
 0x2b8   : > { %v8430_v62 = vpack.c.bf16 %v8422_v25, %v8421_v50  ;;  %v7920_v25 = vld [vmem:[#allocation2 + $0x1f0] sm:$0xff] }
 0x2b9   : > { %v8429_v63 = vpack.c.bf16 %v8420_v4, %v8419_v16  ;;  %v7918_v4 = vld [vmem:[#allocation2 + $0x1e0] sm:$0xff] }
 0x2bb   : > { %11061 = vmatprep.mubr.msk.bf16.mxu0 %vm348_vm1, %v8429_v63 }
 0x2bc   : > { %11062 = vmatmul.mubr.msk.bf16.gmra.mrb[60].mxu0 %vm348_vm1, %v8430_v62  ;;  %v7921_v62 = vld [vmem:[#allocation2 + $0x1f8] sm:$0xff] }
 0x30b   : > { %v10997_v14 = vpop.f32.mrb[16].mxu1 }
 0x30c   : > { %v7924_v61 = vadd.f32 %v10997_v14, %v7908_v32  ;;  %v7826_v28 = vpop.f32.mrb[17].mxu1 }
 0x30d   : > { %v7922_v38 = vadd.f32 %v7906_v39, %v7826_v28  ;;  %v10998_v15 = vpop.f32.mrb[18].mxu1 }
 0x30e   : > { %7940 = vst.msk [vmem:[#allocation2 + $0x190] sm:$0xff] %vm348_vm1, %v7924_v61  ;;  %v7925_v21 = vadd.f32 %v10998_v15, %v7909_v45  ;;  %v7829_v27 = vpop.f32.mrb[19].mxu1  ;;  %v7919_v61 = vld [vmem:[#allocation2 + $0x1e8] sm:$0xff] }
 0x30f   : > { %7938 = vst.msk [vmem:[#allocation2 + $0x180] sm:$0xff] %vm348_vm1, %v7922_v38  ;;  %v7923_v13 = vadd.f32 %v7907_v44, %v7829_v27 }
 0x310   : > { %7941 = vst.msk [vmem:[#allocation2 + $0x198] sm:$0xff] %vm348_vm1, %v7925_v21 }
 0x311   : > { %7939 = vst.msk [vmem:[#allocation2 + $0x188] sm:$0xff] %vm348_vm1, %v7923_v13 }
 0x313   : > { %v11001_v10 = vpop.f32.mrb[20].mxu1 }
 0x314   : > { %v7928_v51 = vadd.f32 %v11001_v10, %v7912_v30  ;;  %v7842_v35 = vpop.f32.mrb[21].mxu1 }
 0x315   : > { %v7926_v7 = vadd.f32 %v7910_v58, %v7842_v35  ;;  %v11002_v23 = vpop.f32.mrb[22].mxu1  ;;  %v8575_v49 = vld [vmem:[#allocation2 + $0x190] sm:$0xff] }
 0x316   : > { %7944 = vst.msk [vmem:[#allocation2 + $0x1b0] sm:$0xff] %vm348_vm1, %v7928_v51  ;;  %v7929_v59 = vadd.f32 %v11002_v23, %v7913_v3  ;;  %v7845_v53 = vpop.f32.mrb[23].mxu1  ;;  %v8573_v47 = vld [vmem:[#allocation2 + $0x180] sm:$0xff]  ;;  %v8596_v54 = vadd.f32 %v14901_v60, %v8575_v49 }
 0x317   : > { %7942 = vst.msk [vmem:[#allocation2 + $0x1a0] sm:$0xff] %vm348_vm1, %v7926_v7  ;;  %v7927_v26 = vadd.f32 %v7911_v12, %v7845_v53  ;;  %v8594_v20 = vadd.f32 %v14901_v60, %v8573_v47  ;;  %v8576_v37 = vld [vmem:[#allocation2 + $0x198] sm:$0xff] }
 0x318   : > { %7945 = vst.msk [vmem:[#allocation2 + $0x1b8] sm:$0xff] %vm348_vm1, %v7929_v59  ;;  %v8574_v31 = vld [vmem:[#allocation2 + $0x188] sm:$0xff]  ;;  %v8597_v11 = vadd.f32 %v14901_v60, %v8576_v37  ;;  %v8612_v18 = vmax.f32 %v8596_v54, 0.0 }
 0x319   : > { %7943 = vst.msk [vmem:[#allocation2 + $0x1a8] sm:$0xff] %vm348_vm1, %v7927_v26  ;;  %v8595_v55 = vadd.f32 %v14901_v60, %v8574_v31  ;;  %v8610_v40 = vmax.f32 %v8594_v20, 0.0 }
 0x31a   : > { %v8613_v29 = vmax.f32 %v8597_v11, 0.0 }
 0x31b   : > { %v11005_v46 = vpop.f32.mrb[24].mxu1  ;;  %v8611_v33 = vmax.f32 %v8595_v55, 0.0 }
 0x31c   : > { %v7932_v22 = vadd.f32 %v11005_v46, %v7916_v5  ;;  %v7858_v36 = vpop.f32.mrb[25].mxu1  ;;  %v8627_v19 = vpack.c.bf16 %v8613_v29, %v8612_v18 }
 0x31d   : > { %v7930_v2 = vadd.f32 %v7914_v52, %v7858_v36  ;;  %v11006_v17 = vpop.f32.mrb[26].mxu1  ;;  %v8626_v34 = vpack.c.bf16 %v8611_v33, %v8610_v40  ;;  %v8579_v8 = vld [vmem:[#allocation2 + $0x1b0] sm:$0xff] }
 0x31e   : > { %7948 = vst.msk [vmem:[#allocation2 + $0x1d0] sm:$0xff] %vm348_vm1, %v7932_v22  ;;  %v7933_v48 = vadd.f32 %v11006_v17, %v7917_v43  ;;  %v7861_v56 = vpop.f32.mrb[27].mxu1  ;;  %v8577_v41 = vld [vmem:[#allocation2 + $0x1a0] sm:$0xff]  ;;  %v8600_v6 = vadd.f32 %v14901_v60, %v8579_v8 }
 0x31f   : > { %7946 = vst.msk [vmem:[#allocation2 + $0x1c0] sm:$0xff] %vm348_vm1, %v7930_v2  ;;  %v7931_v1 = vadd.f32 %v7915_v57, %v7861_v56  ;;  %11067 = vmatprep.mubr.msk.bf16.mxu0 %vm348_vm1, %v8626_v34  ;;  %v8598_v0 = vadd.f32 %v14901_v60, %v8577_v41  ;;  %v8580_v24 = vld [vmem:[#allocation2 + $0x1b8] sm:$0xff] }
 0x320   : > { %7949 = vst.msk [vmem:[#allocation2 + $0x1d8] sm:$0xff] %vm348_vm1, %v7933_v48  ;;  %11068 = vmatmul.mubr.msk.bf16.vlgmr.msra.gmra.mrb[48].mxu0 %vm348_vm1, %v8627_v19  ;;  %v8578_v9 = vld [vmem:[#allocation2 + $0x1a8] sm:$0xff]  ;;  %v8601_v42 = vadd.f32 %v14901_v60, %v8580_v24  ;;  %v8616_v28 = vmax.f32 %v8600_v6, 0.0 }
 0x321   : > { %7947 = vst.msk [vmem:[#allocation2 + $0x1c8] sm:$0xff] %vm348_vm1, %v7931_v1  ;;  %v8599_v16 = vadd.f32 %v14901_v60, %v8578_v9  ;;  %v8614_v32 = vmax.f32 %v8598_v0, 0.0 }
 0x322   : > { %v8617_v50 = vmax.f32 %v8601_v42, 0.0 }
 0x323   : > { %v11009_v63 = vpop.f32.mrb[28].mxu1  ;;  %v8615_v39 = vmax.f32 %v8599_v16, 0.0 }
 0x324   : > { %v7936_v14 = vadd.f32 %v11009_v63, %v7920_v25  ;;  %v7874_v45 = vpop.f32.mrb[29].mxu1  ;;  %v8629_v30 = vpack.c.bf16 %v8617_v50, %v8616_v28 }
 0x325   : > { %v7934_v44 = vadd.f32 %v7918_v4, %v7874_v45  ;;  %v11010_v38 = vpop.f32.mrb[30].mxu1  ;;  %v8628_v15 = vpack.c.bf16 %v8615_v39, %v8614_v32  ;;  %v8583_v21 = vld [vmem:[#allocation2 + $0x1d0] sm:$0xff] }
 0x326   : > { %7952 = vst.msk [vmem:[#allocation2 + $0x1f0] sm:$0xff] %vm348_vm1, %v7936_v14  ;;  %v7937_v27 = vadd.f32 %v11010_v38, %v7921_v62  ;;  %v7877_v13 = vpop.f32.mrb[31].mxu1  ;;  %v8581_v58 = vld [vmem:[#allocation2 + $0x1c0] sm:$0xff]  ;;  %v8604_v12 = vadd.f32 %v14901_v60, %v8583_v21 }
 0x327   : > { %7950 = vst.msk [vmem:[#allocation2 + $0x1e0] sm:$0xff] %vm348_vm1, %v7934_v44  ;;  %v7935_v10 = vadd.f32 %v7919_v61, %v7877_v13  ;;  %11071 = vmatprep.mubr.msk.bf16.mxu0 %vm348_vm1, %v8628_v15  ;;  %v8602_v3 = vadd.f32 %v14901_v60, %v8581_v58  ;;  %v8584_v51 = vld [vmem:[#allocation2 + $0x1d8] sm:$0xff] }
 0x328   : > { %7953 = vst.msk [vmem:[#allocation2 + $0x1f8] sm:$0xff] %vm348_vm1, %v7937_v27  ;;  %11072 = vmatmul.mubr.msk.bf16.gmra.mrb[52].mxu0 %vm348_vm1, %v8629_v30  ;;  %v8582_v35 = vld [vmem:[#allocation2 + $0x1c8] sm:$0xff]  ;;  %v8605_v7 = vadd.f32 %v14901_v60, %v8584_v51  ;;  %v8620_v47 = vmax.f32 %v8604_v12, 0.0 }
 0x329   : > { %7951 = vst.msk [vmem:[#allocation2 + $0x1e8] sm:$0xff] %vm348_vm1, %v7935_v10  ;;  %v8603_v23 = vadd.f32 %v14901_v60, %v8582_v35  ;;  %v8618_v59 = vmax.f32 %v8602_v3, 0.0 }
 0x32a   : > { %v8621_v49 = vmax.f32 %v8605_v7, 0.0 }
 0x32b   : > { %v8619_v53 = vmax.f32 %v8603_v23, 0.0 }
 0x32c   : > { %v8631_v37 = vpack.c.bf16 %v8621_v49, %v8620_v47 }
 0x32d   : > { %v8630_v26 = vpack.c.bf16 %v8619_v53, %v8618_v59  ;;  %v8587_v20 = vld [vmem:[#allocation2 + $0x1f0] sm:$0xff] }
 0x32e   : > { %v8585_v31 = vld [vmem:[#allocation2 + $0x1e0] sm:$0xff]  ;;  %v8608_v55 = vadd.f32 %v14901_v60, %v8587_v20 }
 0x32f   : > { %11075 = vmatprep.mubr.msk.bf16.mxu0 %vm348_vm1, %v8630_v26  ;;  %v8606_v54 = vadd.f32 %v14901_v60, %v8585_v31  ;;  %v8588_v11 = vld [vmem:[#allocation2 + $0x1f8] sm:$0xff] }
 0x330   : > { %11076 = vmatmul.mubr.msk.bf16.gmra.mrb[56].mxu0 %vm348_vm1, %v8631_v37  ;;  %v8586_v5 = vld [vmem:[#allocation2 + $0x1e8] sm:$0xff]  ;;  %v8609_v52 = vadd.f32 %v14901_v60, %v8588_v11  ;;  %v8624_v33 = vmax.f32 %v8608_v55, 0.0 }
 0x331   : > { %v8607_v29 = vadd.f32 %v14901_v60, %v8586_v5  ;;  %v8622_v43 = vmax.f32 %v8606_v54, 0.0  ;;  %v14945_v60 = vld [vmem:[%s330_s19] ss:$0 sm:$0xff] }
 0x332   : > { %v8625_v46 = vmax.f32 %v8609_v52, 0.0 }
 0x333   : > { %v8623_v40 = vmax.f32 %v8607_v29, 0.0 }
 0x334   : > { %v8633_v36 = vpack.c.bf16 %v8625_v46, %v8624_v33 }
 0x335   : > { %v8632_v22 = vpack.c.bf16 %v8623_v40, %v8622_v43 }
 0x337   : > { %11079 = vmatprep.mubr.msk.bf16.mxu0 %vm348_vm1, %v8632_v22 }
 0x338   : > { %11080 = vmatmul.mubr.msk.bf16.gmra.mrb[60].mxu0 %vm348_vm1, %v8633_v36 }
 0x3f3   : > { %v11069_v57 = vpop.f32.mrb[48].mxu0 }
 0x3f4   : > { %v11099_v18 = vadd.f32 %v11069_v57, %v14945_v60  ;;  %v8697_v2 = vpop.f32.mrb[49].mxu0 }
 0x3f5   : > { %v11100_v17 = vadd.f32 %v14945_v60, %v8697_v2  ;;  %v11070_v34 = vpop.f32.mrb[50].mxu0 }
 0x3f6   : > { %v8778_v8 = vmax.f32 %v11099_v18, 0.0  ;;  %v11101_v48 = vadd.f32 %v11070_v34, %v14945_v60  ;;  %v8700_v56 = vpop.f32.mrb[51].mxu0 }
 0x3f7   : > { %v8776_v19 = vmax.f32 %v11100_v17, 0.0  ;;  %v11102_v41 = vadd.f32 %v14945_v60, %v8700_v56 }
 0x3f8   : > { %v10205_v1 = vpack.c.bf16 %v8778_v8, %v8778_v8  ;;  %v8779_v0 = vmax.f32 %v11101_v48, 0.0 }
 0x3f9   : > { %v10203_v24 = vpack.c.bf16 %v8776_v19, %v8776_v19  ;;  %v8777_v9 = vmax.f32 %v11102_v41, 0.0 }
 0x3fa   : > { %8859 = vst.msk [vmem:[%s14953_s7 + $0x8] sm:$0xf] %vm8856_vm0, %v10205_v1  ;;  %v10206_v6 = vpack.c.bf16 %v8779_v0, %v8779_v0 }
 0x3fb   : > { %8857 = vst.msk [vmem:[%s14953_s7] sm:$0xf] %vm8856_vm0, %v10203_v24  ;;  %v10204_v42 = vpack.c.bf16 %v8777_v9, %v8777_v9  ;;  %v11073_v25 = vpop.f32.mrb[52].mxu0 }
 0x3fc   : > { %8860 = vst.msk [vmem:[%s14953_s7 + $0xc] sm:$0xf] %vm8856_vm0, %v10206_v6  ;;  %v11103_v16 = vadd.f32 %v11073_v25, %v14945_v60  ;;  %v8713_v4 = vpop.f32.mrb[53].mxu0 }
 0x3fd   : > { %8858 = vst.msk [vmem:[%s14953_s7 + $0x4] sm:$0xf] %vm8856_vm0, %v10204_v42  ;;  %v11104_v50 = vadd.f32 %v14945_v60, %v8713_v4  ;;  %v11074_v63 = vpop.f32.mrb[54].mxu0 }
 0x3fe   : > { %v8782_v62 = vmax.f32 %v11103_v16, 0.0  ;;  %v11105_v32 = vadd.f32 %v11074_v63, %v14945_v60  ;;  %v8716_v39 = vpop.f32.mrb[55].mxu0 }
 0x3ff   : > { %v8780_v14 = vmax.f32 %v11104_v50, 0.0  ;;  %v11106_v45 = vadd.f32 %v14945_v60, %v8716_v39 }
 0x400   : > { %v10209_v61 = vpack.c.bf16 %v8782_v62, %v8782_v62  ;;  %v8783_v28 = vmax.f32 %v11105_v32, 0.0 }
 0x401   : > { %v10207_v44 = vpack.c.bf16 %v8780_v14, %v8780_v14  ;;  %v8781_v38 = vmax.f32 %v11106_v45, 0.0 }
 0x402   : > { %8863 = vst.msk [vmem:[%s14953_s7 + $0x18] sm:$0xf] %vm8856_vm0, %v10209_v61  ;;  %v10210_v15 = vpack.c.bf16 %v8783_v28, %v8783_v28 }
 0x403   : > { %8861 = vst.msk [vmem:[%s14953_s7 + $0x10] sm:$0xf] %vm8856_vm0, %v10207_v44  ;;  %v10208_v21 = vpack.c.bf16 %v8781_v38, %v8781_v38  ;;  %v11077_v27 = vpop.f32.mrb[56].mxu0 }
 0x404   : > { %8864 = vst.msk [vmem:[%s14953_s7 + $0x1c] sm:$0xf] %vm8856_vm0, %v10210_v15  ;;  %v11107_v13 = vadd.f32 %v11077_v27, %v14945_v60  ;;  %v8729_v30 = vpop.f32.mrb[57].mxu0 }
 0x405   : > { %8862 = vst.msk [vmem:[%s14953_s7 + $0x14] sm:$0xf] %vm8856_vm0, %v10208_v21  ;;  %v11108_v58 = vadd.f32 %v14945_v60, %v8729_v30  ;;  %v11078_v10 = vpop.f32.mrb[58].mxu0 }
 0x406   : > { %v8786_v3 = vmax.f32 %v11107_v13, 0.0  ;;  %v11109_v51 = vadd.f32 %v11078_v10, %v14945_v60  ;;  %v8732_v35 = vpop.f32.mrb[59].mxu0 }
 0x407   : > { %v8784_v12 = vmax.f32 %v11108_v58, 0.0  ;;  %v11110_v7 = vadd.f32 %v14945_v60, %v8732_v35 }
 0x408   : > { %v10213_v23 = vpack.c.bf16 %v8786_v3, %v8786_v3  ;;  %v8787_v49 = vmax.f32 %v11109_v51, 0.0 }
 0x409   : > { %v10211_v59 = vpack.c.bf16 %v8784_v12, %v8784_v12  ;;  %v8785_v53 = vmax.f32 %v11110_v7, 0.0 }
 0x40a   : > { %8867 = vst.msk [vmem:[%s14953_s7 + $0x28] sm:$0xf] %vm8856_vm0, %v10213_v23  ;;  %v10214_v47 = vpack.c.bf16 %v8787_v49, %v8787_v49 }
 0x40b   : > { %8865 = vst.msk [vmem:[%s14953_s7 + $0x20] sm:$0xf] %vm8856_vm0, %v10211_v59  ;;  %v10212_v26 = vpack.c.bf16 %v8785_v53, %v8785_v53  ;;  %v11081_v20 = vpop.f32.mrb[60].mxu0 }
 0x40c   : > { %8868 = vst.msk [vmem:[%s14953_s7 + $0x2c] sm:$0xf] %vm8856_vm0, %v10214_v47  ;;  %v11111_v37 = vadd.f32 %v11081_v20, %v14945_v60  ;;  %v8745_v31 = vpop.f32.mrb[61].mxu0 }
 0x40d   : > { %8866 = vst.msk [vmem:[%s14953_s7 + $0x24] sm:$0xf] %vm8856_vm0, %v10212_v26  ;;  %v11112_v54 = vadd.f32 %v14945_v60, %v8745_v31  ;;  %v11082_v11 = vpop.f32.mrb[62].mxu0 }
 0x40e   : > { %v8790_v5 = vmax.f32 %v11111_v37, 0.0  ;;  %v11113_v55 = vadd.f32 %v11082_v11, %v14945_v60  ;;  %v8748_v52 = vpop.f32.mrb[63].mxu0 }
 0x40f   : > { %v8788_v29 = vmax.f32 %v11112_v54, 0.0  ;;  %v11114_v46 = vadd.f32 %v14945_v60, %v8748_v52 }
 0x410   : > { %v10217_v43 = vpack.c.bf16 %v8790_v5, %v8790_v5  ;;  %v8791_v40 = vmax.f32 %v11113_v55, 0.0 }
 0x411   : > { %v10215_v33 = vpack.c.bf16 %v8788_v29, %v8788_v29  ;;  %v8789_v22 = vmax.f32 %v11114_v46, 0.0 }
 0x412   : > { %8871 = vst.msk [vmem:[%s14953_s7 + $0x38] sm:$0xf] %vm8856_vm0, %v10217_v43  ;;  %v10218_v36 = vpack.c.bf16 %v8791_v40, %v8791_v40 }
 0x413   : > { %8869 = vst.msk [vmem:[%s14953_s7 + $0x30] sm:$0xf] %vm8856_vm0, %v10215_v33  ;;  %v10216_v57 = vpack.c.bf16 %v8789_v22, %v8789_v22 }
 0x414   : > { %8872 = vst.msk [vmem:[%s14953_s7 + $0x3c] sm:$0xf] %vm8856_vm0, %v10218_v36 }
 0x415   : > { %8870 = vst.msk [vmem:[%s14953_s7 + $0x34] sm:$0xf] %vm8856_vm0, %v10216_v57 }
 0x416 PF: > { %s16_s25 = sadd.s32 1, %s11687_s25   ;;  %s15114_s21 = smov %s11679_s23 }
 0x417   : > { %p13_p7 = scmp.ge.s32.totalorder %s16_s25, 6   ;;  %s15115_s22 = smov %s11683_s24 }
 0x418   : > { %s15116_s23 = smov %s15119_s26  ;;  %s15117_s24 = smov %s15123_s27 }
 0x419   :  { %15 = sbr.rel (!%p13_p7) target bundleno = 3 (0x3), region = 130 }

</bundles_post_ra>
